<compile_context>
chip_gen: v7x
topology: tpu7x:2x2x1
jax: 0.10.0
libtpu: 0.0.40
codegen_flags: <defaults>
</compile_context>

<pallas_src>
import math

import jax
import jax.numpy as jnp
from jax.experimental import pallas as pl
from jax.experimental.pallas import tpu as pltpu


_G = 16          # sublane group: rows filled per static slice / packed store
_TQ_DEFAULT = 256
_TK_DEFAULT = 512


def _bucket_from_distance(dist, num_buckets, max_distance, bidirectional):
    """Vectorized T5 relative-position bucket (mirrors the torch forward)."""
    part_buckets = num_buckets // (2 if bidirectional else 1)
    exact_buckets = part_buckets // 2
    log_buckets = part_buckets - exact_buckets
    if exact_buckets <= 0:
        raise ValueError(
            "num_buckets too small: exact_buckets must be >= 1 "
            f"(num_buckets={num_buckets}, bidirectional={bidirectional})")
    neg_pos = dist < 0
    rel = jnp.abs(dist)
    small_pos = rel < exact_buckets
    # max(rel, 1) avoids log(0); rel == 0 always takes the `small_pos` branch.
    logv = (jnp.log(jnp.maximum(rel, 1).astype(jnp.float32) / exact_buckets)
            / math.log(max_distance / exact_buckets))
    log_pos = (jnp.clip(logv, 0.0, 0.9999) * log_buckets).astype(jnp.int32)
    log_pos = log_pos + exact_buckets
    buckets = jnp.where(small_pos, rel, log_pos)
    if bidirectional:
        buckets = jnp.where(neg_pos, buckets + part_buckets, buckets)
    else:
        buckets = jnp.where(neg_pos, 0, buckets)   # masked_fill(neg_pos, 0)
    return buckets


def _make_toeplitz_fill_kernel(tq, tk, g):
    """Kernel: fill an (H, tq, tk) bias block from its shifted table window."""

    def kernel(*refs):
        out_ref = refs[-1]
        # (H, G, tq + tk) float32 window: every distance this tile needs.
        win = jnp.concatenate([r[...] for r in refs[:-1]], axis=2)
        # Row r = g*a + b of the tile needs win[:, b, (tq - g*(a+1)) + c] for
        # c in [0, tk): one static lane slice + one packed g-row store per
        # group -- no MXU, no gather, no cross-tile reshape.
        for a in range(tq // g):
            s = tq - g * (a + 1)
            out_ref[:, a * g:(a + 1) * g, :] = (
                win[:, :, s:s + tk].astype(out_ref.dtype))

    return kernel


def relative_position_embedding(relative_attention_bias, query, key,
                                edge_index=None, edge_dist=None, *,
                                num_buckets=32, max_distance=128,
                                bidirectional=False):
    """JAX/Pallas equivalent of RelativePositionEmbedding.forward (int path).

    Args:
      relative_attention_bias: (num_buckets, num_heads) parameter.
      query, key: integer lengths (the int path of the torch forward).
      edge_index, edge_dist: unused by the torch forward; kept for parity.
    Returns:
      (num_heads, query, key) bias tensor, dtype of the parameter.
    """
    # TODO(synk): the torch forward also accepts 1-D/2-D position tensors for
    # query/key; only the integer-length path is implemented here.
    assert isinstance(query, int) and isinstance(key, int)
    del edge_index, edge_dist
    nb, num_heads = relative_attention_bias.shape
    assert nb == num_buckets
    out_dtype = relative_attention_bias.dtype

    # ---- tile selection -----------------------------------------------------
    # TQ multiple of 128 (window blocks are TQ-wide on the lane axis) and of
    # G=16 (packed bf16 stores); TK a multiple of TQ so every window start is
    # TQ-aligned.  Shrink TK for very large head counts so the double-buffered
    # output block stays well inside VMEM (v7x has only 64 MiB physical).
    tq, tk = _TQ_DEFAULT, _TK_DEFAULT
    if num_heads * tq * tk * jnp.dtype(out_dtype).itemsize > 8 * 1024 * 1024:
        tk = tq
    wb = tq                       # window block width along the distance axis
    nwin = (tq + tk) // wb        # window blocks per grid step
    ratio = tk // tq

    nq = pl.cdiv(query, tq)
    nk = pl.cdiv(key, tk)
    q_pad, k_pad = nq * tq, nk * tk
    lc = q_pad + k_pad            # distance-table length (multiple of wb)

    # ---- per-distance table, built once in plain XLA (O(Q + K) work) --------
    # u indexes the reversed distance axis: d = q - k = (q_pad - 1) - u.
    u = jnp.arange(lc + _G - 1, dtype=jnp.int32)
    buckets = _bucket_from_distance((q_pad - 1) - u, num_buckets,
                                    max_distance, bidirectional)
    # (H, lc + G - 1) float32.  float32 keeps every in-kernel lane slice on the
    # safest 32-bit layout path; values round-trip exactly (bf16->f32->bf16).
    # TODO(synk): a bf16 table would halve the slice/cast work on v7x.
    tfull = jnp.take(relative_attention_bias.astype(jnp.float32).T,
                     buckets, axis=1)
    # Pre-shift by the sublane group: t16[h, b, t] = tfull[h, t + G - 1 - b],
    # so that inside the kernel every slice offset is a compile-time constant.
    t16 = jnp.stack([tfull[:, (_G - 1 - b):(_G - 1 - b) + lc]
                     for b in range(_G)], axis=1)          # (H, G, lc)

    # ---- Pallas kernel: Toeplitz fill of the (H, Q, K) bias -----------------
    # Window start for tile (i, j) is j*tk - (i+1)*tq + q_pad (a multiple of
    # tq), i.e. window block  ratio*j - i - 1 + nq  (always in [0, lc/wb - 1]).
    def win_spec(m):
        return pl.BlockSpec(
            (num_heads, _G, wb),
            lambda i, j, m=m: (0, 0, ratio * j - i - 1 + nq + m))

    kernel = _make_toeplitz_fill_kernel(tq, tk, _G)
    out = pl.pallas_call(
        kernel,
        out_shape=jax.ShapeDtypeStruct((num_heads, query, key), out_dtype),
        grid=(nq, nk),
        in_specs=[win_spec(m) for m in range(nwin)],
        out_specs=pl.BlockSpec((num_heads, tq, tk), lambda i, j: (0, i, j)),
        compiler_params=pltpu.CompilerParams(
            dimension_semantics=("parallel", "parallel"),
            vmem_limit_bytes=32 * 1024 * 1024,
        ),
    )(*([t16] * nwin))
    return out


def _reference(bias, q_len, k_len, num_buckets, max_distance, bidirectional):
    """Pure-JAX reference mirroring the torch forward (int-length path)."""
    part_buckets = num_buckets // (2 if bidirectional else 1)
    exact_buckets = part_buckets // 2
    log_buckets = part_buckets - exact_buckets
    q = jnp.arange(q_len, dtype=jnp.int32)
    k = jnp.arange(k_len, dtype=jnp.int32)
    rel = q[:, None] - k[None, :]
    neg = rel < 0
    rel = jnp.abs(rel)
    small = rel < exact_buckets
    log_pos = (jnp.clip(
        jnp.log(jnp.maximum(rel, 1).astype(jnp.float32) / exact_buckets)
        / math.log(max_distance / exact_buckets), 0, 0.9999)
        * log_buckets).astype(jnp.int32) + exact_buckets
    buckets = jnp.where(small, rel, log_pos)
    if bidirectional:
        buckets = jnp.where(neg, buckets + part_buckets, buckets)
    else:
        buckets = jnp.where(neg, 0, buckets)
    emb = bias[buckets]                          # (Q, K, H)
    return jnp.transpose(emb, (2, 0, 1))         # (H, Q, K)


if __name__ == "__main__":
    num_heads = 8
    num_buckets = 32
    max_distance = 128

    # Deterministic parameter init: normal(mean=0, std=1), torch.half -> bf16.
    key0 = jax.random.PRNGKey(0)
    relative_attention_bias = (
        jax.random.normal(key0, (num_buckets, num_heads), dtype=jnp.float32)
        * 1.0 + 0.0).astype(jnp.bfloat16)

    def check(q_len, k_len, bidirectional):
        out = relative_position_embedding(
            relative_attention_bias, q_len, k_len, None, None,
            num_buckets=num_buckets, max_distance=max_distance,
            bidirectional=bidirectional)
        out = jax.block_until_ready(out)
        ref = _reference(relative_attention_bias, q_len, k_len,
                         num_buckets, max_distance, bidirectional)
        assert out.shape == (num_heads, q_len, k_len), out.shape
        assert out.dtype == relative_attention_bias.dtype, out.dtype
        assert jnp.allclose(out.astype(jnp.float32), ref.astype(jnp.float32),
                            atol=1e-2, rtol=1e-2), (
            f"mismatch vs reference (q={q_len}, k={k_len}, "
            f"bidirectional={bidirectional})")

    # 1) Small square, unidirectional (module defaults).
    check(16, 16, bidirectional=False)
    # 2) Non-tile-aligned Q/K (exercises clipped boundary blocks) + bidirectional.
    check(20, 300, bidirectional=True)
    # 3) Multi-tile grid (nq=2, nk=2): exercises the shifted window indexing.
    check(300, 700, bidirectional=True)

    print("KERNEL_OK")
</pallas_src>

<mosaic_0001>
module attributes {stable_mosaic.version = 11 : i64} {
  func.func @kernel(%arg0: i32, %arg1: i32, %arg2: memref<8x16x256xf32, #tpu.memory_space<vmem>>, %arg3: memref<8x16x256xf32, #tpu.memory_space<vmem>>, %arg4: memref<8x16x256xf32, #tpu.memory_space<vmem>>, %arg5: memref<8x256x512xbf16, #tpu.memory_space<vmem>>) attributes {dimension_semantics = [#tpu.dimension_semantics<parallel>, #tpu.dimension_semantics<parallel>], iteration_bounds = array<i64: 1, 1>, scalar_prefetch = 0 : i64, scratch_operands = 0 : i64, tpu.core_type = #tpu.core_type<tc>, window_params = [{transform_indices = @transform_0, window_bounds = array<i64: 8, 16, 256>}, {transform_indices = @transform_1, window_bounds = array<i64: 8, 16, 256>}, {transform_indices = @transform_2, window_bounds = array<i64: 8, 16, 256>}, {transform_indices = @transform_3, window_bounds = array<i64: 8, 256, 512>}]} {
    %c0 = arith.constant 0 : index
    %c0_0 = arith.constant 0 : index
    %c0_1 = arith.constant 0 : index
    %0 = vector.load %arg2[%c0, %c0_0, %c0_1] : memref<8x16x256xf32, #tpu.memory_space<vmem>>, vector<8x16x256xf32>
    %c0_2 = arith.constant 0 : index
    %c0_3 = arith.constant 0 : index
    %c0_4 = arith.constant 0 : index
    %1 = vector.load %arg3[%c0_2, %c0_3, %c0_4] : memref<8x16x256xf32, #tpu.memory_space<vmem>>, vector<8x16x256xf32>
    %c0_5 = arith.constant 0 : index
    %c0_6 = arith.constant 0 : index
    %c0_7 = arith.constant 0 : index
    %2 = vector.load %arg4[%c0_5, %c0_6, %c0_7] : memref<8x16x256xf32, #tpu.memory_space<vmem>>, vector<8x16x256xf32>
    %3 = tpu.concatenate %0, %1, %2 in 2 : vector<8x16x256xf32>, vector<8x16x256xf32>, vector<8x16x256xf32> -> vector<8x16x768xf32>
    %4 = vector.extract_strided_slice %3 {offsets = [0, 0, 240], sizes = [8, 16, 512], strides = [1, 1, 1]} : vector<8x16x768xf32> to vector<8x16x512xf32>
    %5 = arith.truncf %4 : vector<8x16x512xf32> to vector<8x16x512xbf16>
    %c0_8 = arith.constant 0 : index
    %c0_9 = arith.constant 0 : index
    %c0_10 = arith.constant 0 : index
    %6 = vector.load %arg5[%c0_8, %c0_9, %c0_10] : memref<8x256x512xbf16, #tpu.memory_space<vmem>>, vector<8x16x512xbf16>
    tpu.vector_store %arg5[%c0_8, %c0_9, %c0_10], %5 {strides = array<i32>} : memref<8x256x512xbf16, #tpu.memory_space<vmem>>, vector<8x16x512xbf16>,
    %7 = vector.extract_strided_slice %3 {offsets = [0, 0, 224], sizes = [8, 16, 512], strides = [1, 1, 1]} : vector<8x16x768xf32> to vector<8x16x512xf32>
    %8 = arith.truncf %7 : vector<8x16x512xf32> to vector<8x16x512xbf16>
    %c0_11 = arith.constant 0 : index
    %c16 = arith.constant 16 : index
    %c0_12 = arith.constant 0 : index
    %9 = vector.load %arg5[%c0_11, %c16, %c0_12] : memref<8x256x512xbf16, #tpu.memory_space<vmem>>, vector<8x16x512xbf16>
    tpu.vector_store %arg5[%c0_11, %c16, %c0_12], %8 {strides = array<i32>} : memref<8x256x512xbf16, #tpu.memory_space<vmem>>, vector<8x16x512xbf16>,
    %10 = vector.extract_strided_slice %3 {offsets = [0, 0, 208], sizes = [8, 16, 512], strides = [1, 1, 1]} : vector<8x16x768xf32> to vector<8x16x512xf32>
    %11 = arith.truncf %10 : vector<8x16x512xf32> to vector<8x16x512xbf16>
    %c0_13 = arith.constant 0 : index
    %c32 = arith.constant 32 : index
    %c0_14 = arith.constant 0 : index
    %12 = vector.load %arg5[%c0_13, %c32, %c0_14] : memref<8x256x512xbf16, #tpu.memory_space<vmem>>, vector<8x16x512xbf16>
    tpu.vector_store %arg5[%c0_13, %c32, %c0_14], %11 {strides = array<i32>} : memref<8x256x512xbf16, #tpu.memory_space<vmem>>, vector<8x16x512xbf16>,
    %13 = vector.extract_strided_slice %3 {offsets = [0, 0, 192], sizes = [8, 16, 512], strides = [1, 1, 1]} : vector<8x16x768xf32> to vector<8x16x512xf32>
    %14 = arith.truncf %13 : vector<8x16x512xf32> to vector<8x16x512xbf16>
    %c0_15 = arith.constant 0 : index
    %c48 = arith.constant 48 : index
    %c0_16 = arith.constant 0 : index
    %15 = vector.load %arg5[%c0_15, %c48, %c0_16] : memref<8x256x512xbf16, #tpu.memory_space<vmem>>, vector<8x16x512xbf16>
    tpu.vector_store %arg5[%c0_15, %c48, %c0_16], %14 {strides = array<i32>} : memref<8x256x512xbf16, #tpu.memory_space<vmem>>, vector<8x16x512xbf16>,
    %16 = vector.extract_strided_slice %3 {offsets = [0, 0, 176], sizes = [8, 16, 512], strides = [1, 1, 1]} : vector<8x16x768xf32> to vector<8x16x512xf32>
    %17 = arith.truncf %16 : vector<8x16x512xf32> to vector<8x16x512xbf16>
    %c0_17 = arith.constant 0 : index
    %c64 = arith.constant 64 : index
    %c0_18 = arith.constant 0 : index
    %18 = vector.load %arg5[%c0_17, %c64, %c0_18] : memref<8x256x512xbf16, #tpu.memory_space<vmem>>, vector<8x16x512xbf16>
    tpu.vector_store %arg5[%c0_17, %c64, %c0_18], %17 {strides = array<i32>} : memref<8x256x512xbf16, #tpu.memory_space<vmem>>, vector<8x16x512xbf16>,
    %19 = vector.extract_strided_slice %3 {offsets = [0, 0, 160], sizes = [8, 16, 512], strides = [1, 1, 1]} : vector<8x16x768xf32> to vector<8x16x512xf32>
    %20 = arith.truncf %19 : vector<8x16x512xf32> to vector<8x16x512xbf16>
    %c0_19 = arith.constant 0 : index
    %c80 = arith.constant 80 : index
    %c0_20 = arith.constant 0 : index
    %21 = vector.load %arg5[%c0_19, %c80, %c0_20] : memref<8x256x512xbf16, #tpu.memory_space<vmem>>, vector<8x16x512xbf16>
    tpu.vector_store %arg5[%c0_19, %c80, %c0_20], %20 {strides = array<i32>} : memref<8x256x512xbf16, #tpu.memory_space<vmem>>, vector<8x16x512xbf16>,
    %22 = vector.extract_strided_slice %3 {offsets = [0, 0, 144], sizes = [8, 16, 512], strides = [1, 1, 1]} : vector<8x16x768xf32> to vector<8x16x512xf32>
    %23 = arith.truncf %22 : vector<8x16x512xf32> to vector<8x16x512xbf16>
    %c0_21 = arith.constant 0 : index
    %c96 = arith.constant 96 : index
    %c0_22 = arith.constant 0 : index
    %24 = vector.load %arg5[%c0_21, %c96, %c0_22] : memref<8x256x512xbf16, #tpu.memory_space<vmem>>, vector<8x16x512xbf16>
    tpu.vector_store %arg5[%c0_21, %c96, %c0_22], %23 {strides = array<i32>} : memref<8x256x512xbf16, #tpu.memory_space<vmem>>, vector<8x16x512xbf16>,
    %25 = vector.extract_strided_slice %3 {offsets = [0, 0, 128], sizes = [8, 16, 512], strides = [1, 1, 1]} : vector<8x16x768xf32> to vector<8x16x512xf32>
    %26 = arith.truncf %25 : vector<8x16x512xf32> to vector<8x16x512xbf16>
    %c0_23 = arith.constant 0 : index
    %c112 = arith.constant 112 : index
    %c0_24 = arith.constant 0 : index
    %27 = vector.load %arg5[%c0_23, %c112, %c0_24] : memref<8x256x512xbf16, #tpu.memory_space<vmem>>, vector<8x16x512xbf16>
    tpu.vector_store %arg5[%c0_23, %c112, %c0_24], %26 {strides = array<i32>} : memref<8x256x512xbf16, #tpu.memory_space<vmem>>, vector<8x16x512xbf16>,
    %28 = vector.extract_strided_slice %3 {offsets = [0, 0, 112], sizes = [8, 16, 512], strides = [1, 1, 1]} : vector<8x16x768xf32> to vector<8x16x512xf32>
    %29 = arith.truncf %28 : vector<8x16x512xf32> to vector<8x16x512xbf16>
    %c0_25 = arith.constant 0 : index
    %c128 = arith.constant 128 : index
    %c0_26 = arith.constant 0 : index
    %30 = vector.load %arg5[%c0_25, %c128, %c0_26] : memref<8x256x512xbf16, #tpu.memory_space<vmem>>, vector<8x16x512xbf16>
    tpu.vector_store %arg5[%c0_25, %c128, %c0_26], %29 {strides = array<i32>} : memref<8x256x512xbf16, #tpu.memory_space<vmem>>, vector<8x16x512xbf16>,
    %31 = vector.extract_strided_slice %3 {offsets = [0, 0, 96], sizes = [8, 16, 512], strides = [1, 1, 1]} : vector<8x16x768xf32> to vector<8x16x512xf32>
    %32 = arith.truncf %31 : vector<8x16x512xf32> to vector<8x16x512xbf16>
    %c0_27 = arith.constant 0 : index
    %c144 = arith.constant 144 : index
    %c0_28 = arith.constant 0 : index
    %33 = vector.load %arg5[%c0_27, %c144, %c0_28] : memref<8x256x512xbf16, #tpu.memory_space<vmem>>, vector<8x16x512xbf16>
    tpu.vector_store %arg5[%c0_27, %c144, %c0_28], %32 {strides = array<i32>} : memref<8x256x512xbf16, #tpu.memory_space<vmem>>, vector<8x16x512xbf16>,
    %34 = vector.extract_strided_slice %3 {offsets = [0, 0, 80], sizes = [8, 16, 512], strides = [1, 1, 1]} : vector<8x16x768xf32> to vector<8x16x512xf32>
    %35 = arith.truncf %34 : vector<8x16x512xf32> to vector<8x16x512xbf16>
    %c0_29 = arith.constant 0 : index
    %c160 = arith.constant 160 : index
    %c0_30 = arith.constant 0 : index
    %36 = vector.load %arg5[%c0_29, %c160, %c0_30] : memref<8x256x512xbf16, #tpu.memory_space<vmem>>, vector<8x16x512xbf16>
    tpu.vector_store %arg5[%c0_29, %c160, %c0_30], %35 {strides = array<i32>} : memref<8x256x512xbf16, #tpu.memory_space<vmem>>, vector<8x16x512xbf16>,
    %37 = vector.extract_strided_slice %3 {offsets = [0, 0, 64], sizes = [8, 16, 512], strides = [1, 1, 1]} : vector<8x16x768xf32> to vector<8x16x512xf32>
    %38 = arith.truncf %37 : vector<8x16x512xf32> to vector<8x16x512xbf16>
    %c0_31 = arith.constant 0 : index
    %c176 = arith.constant 176 : index
    %c0_32 = arith.constant 0 : index
    %39 = vector.load %arg5[%c0_31, %c176, %c0_32] : memref<8x256x512xbf16, #tpu.memory_space<vmem>>, vector<8x16x512xbf16>
    tpu.vector_store %arg5[%c0_31, %c176, %c0_32], %38 {strides = array<i32>} : memref<8x256x512xbf16, #tpu.memory_space<vmem>>, vector<8x16x512xbf16>,
    %40 = vector.extract_strided_slice %3 {offsets = [0, 0, 48], sizes = [8, 16, 512], strides = [1, 1, 1]} : vector<8x16x768xf32> to vector<8x16x512xf32>
    %41 = arith.truncf %40 : vector<8x16x512xf32> to vector<8x16x512xbf16>
    %c0_33 = arith.constant 0 : index
    %c192 = arith.constant 192 : index
    %c0_34 = arith.constant 0 : index
    %42 = vector.load %arg5[%c0_33, %c192, %c0_34] : memref<8x256x512xbf16, #tpu.memory_space<vmem>>, vector<8x16x512xbf16>
    tpu.vector_store %arg5[%c0_33, %c192, %c0_34], %41 {strides = array<i32>} : memref<8x256x512xbf16, #tpu.memory_space<vmem>>, vector<8x16x512xbf16>,
    %43 = vector.extract_strided_slice %3 {offsets = [0, 0, 32], sizes = [8, 16, 512], strides = [1, 1, 1]} : vector<8x16x768xf32> to vector<8x16x512xf32>
    %44 = arith.truncf %43 : vector<8x16x512xf32> to vector<8x16x512xbf16>
    %c0_35 = arith.constant 0 : index
    %c208 = arith.constant 208 : index
    %c0_36 = arith.constant 0 : index
    %45 = vector.load %arg5[%c0_35, %c208, %c0_36] : memref<8x256x512xbf16, #tpu.memory_space<vmem>>, vector<8x16x512xbf16>
    tpu.vector_store %arg5[%c0_35, %c208, %c0_36], %44 {strides = array<i32>} : memref<8x256x512xbf16, #tpu.memory_space<vmem>>, vector<8x16x512xbf16>,
    %46 = vector.extract_strided_slice %3 {offsets = [0, 0, 16], sizes = [8, 16, 512], strides = [1, 1, 1]} : vector<8x16x768xf32> to vector<8x16x512xf32>
    %47 = arith.truncf %46 : vector<8x16x512xf32> to vector<8x16x512xbf16>
    %c0_37 = arith.constant 0 : index
    %c224 = arith.constant 224 : index
    %c0_38 = arith.constant 0 : index
    %48 = vector.load %arg5[%c0_37, %c224, %c0_38] : memref<8x256x512xbf16, #tpu.memory_space<vmem>>, vector<8x16x512xbf16>
    tpu.vector_store %arg5[%c0_37, %c224, %c0_38], %47 {strides = array<i32>} : memref<8x256x512xbf16, #tpu.memory_space<vmem>>, vector<8x16x512xbf16>,
    %49 = vector.extract_strided_slice %3 {offsets = [0, 0, 0], sizes = [8, 16, 512], strides = [1, 1, 1]} : vector<8x16x768xf32> to vector<8x16x512xf32>
    %50 = arith.truncf %49 : vector<8x16x512xf32> to vector<8x16x512xbf16>
    %c0_39 = arith.constant 0 : index
    %c240 = arith.constant 240 : index
    %c0_40 = arith.constant 0 : index
    %51 = vector.load %arg5[%c0_39, %c240, %c0_40] : memref<8x256x512xbf16, #tpu.memory_space<vmem>>, vector<8x16x512xbf16>
    tpu.vector_store %arg5[%c0_39, %c240, %c0_40], %50 {strides = array<i32>} : memref<8x256x512xbf16, #tpu.memory_space<vmem>>, vector<8x16x512xbf16>,
    return
  }
  func.func @transform_0(%arg0: i32, %arg1: i32) -> (i32, i32, i32) {
    %c2_i32 = arith.constant 2 : i32
    %0 = arith.muli %c2_i32, %arg1 : i32
    %1 = arith.subi %0, %arg0 : i32
    %c1_i32 = arith.constant 1 : i32
    %2 = arith.subi %1, %c1_i32 : i32
    %c1_i32_0 = arith.constant 1 : i32
    %3 = arith.addi %2, %c1_i32_0 : i32
    %c0_i32 = arith.constant 0 : i32
    %4 = arith.addi %3, %c0_i32 : i32
    %c0_i32_1 = arith.constant 0 : i32
    %c0_i32_2 = arith.constant 0 : i32
    %c0_i32_3 = arith.constant 0 : i32
    return %c0_i32_1, %c0_i32_2, %4 : i32, i32, i32
  }
  func.func @transform_1(%arg0: i32, %arg1: i32) -> (i32, i32, i32) {
    %c2_i32 = arith.constant 2 : i32
    %0 = arith.muli %c2_i32, %arg1 : i32
    %1 = arith.subi %0, %arg0 : i32
    %c1_i32 = arith.constant 1 : i32
    %2 = arith.subi %1, %c1_i32 : i32
    %c1_i32_0 = arith.constant 1 : i32
    %3 = arith.addi %2, %c1_i32_0 : i32
    %c1_i32_1 = arith.constant 1 : i32
    %4 = arith.addi %3, %c1_i32_1 : i32
    %c0_i32 = arith.constant 0 : i32
    %c0_i32_2 = arith.constant 0 : i32
    %c0_i32_3 = arith.constant 0 : i32
    return %c0_i32, %c0_i32_2, %4 : i32, i32, i32
  }
  func.func @transform_2(%arg0: i32, %arg1: i32) -> (i32, i32, i32) {
    %c2_i32 = arith.constant 2 : i32
    %0 = arith.muli %c2_i32, %arg1 : i32
    %1 = arith.subi %0, %arg0 : i32
    %c1_i32 = arith.constant 1 : i32
    %2 = arith.subi %1, %c1_i32 : i32
    %c1_i32_0 = arith.constant 1 : i32
    %3 = arith.addi %2, %c1_i32_0 : i32
    %c2_i32_1 = arith.constant 2 : i32
    %4 = arith.addi %3, %c2_i32_1 : i32
    %c0_i32 = arith.constant 0 : i32
    %c0_i32_2 = arith.constant 0 : i32
    %c0_i32_3 = arith.constant 0 : i32
    return %c0_i32, %c0_i32_2, %4 : i32, i32, i32
  }
  func.func @transform_3(%arg0: i32, %arg1: i32) -> (i32, i32, i32) {
    %c0_i32 = arith.constant 0 : i32
    %c0_i32_0 = arith.constant 0 : i32
    return %c0_i32, %arg0, %arg1 : i32, i32, i32
  }
}

</mosaic_0001>

<bundles_post_ra>
// kernel: tpu_custom_call.1
= control target key start
LH: loop header
LB: loop body
LE: loop exit
PB: predicated region body
PF: predicated region fallthrough
CT: control target
= control target key end

     0   :  { %8 = vsyncpa [#allocation3], 0  ;;  %s7713_s0 = inlined_call_operand.hbm [shape: f32[8,16,768], index: 0, kind: input, shape index: {}]   ;;  %s7714_s1 = inlined_call_operand.hbm [shape: f32[8,16,768], index: 1, kind: input, shape index: {}]   ;;  %s7715_s2 = inlined_call_operand.hbm [shape: f32[8,16,768], index: 2, kind: input, shape index: {}]   ;;  %s7716_s3 = inlined_call_operand.hbm [shape: bf16[8,16,16], index: 3, kind: output, shape index: {}]  }
   0x1   :  { %9 = vsyncpa [#allocation6], 0 }
   0x2   :  { %10 = vsyncpa [#allocation4], 0  ;;  %s4996_s14 = scalar_lea.hbm %s7714_s1, 256  ;;  %s4951_s15 = smov [#allocation5]  }
   0x3   :  { %s39_s16 = sshll.u32 %s4951_s15, 4  ;;  %s4952_s17 = smov [#allocation2]   ;;  %s40_s16 = int_to_ptr.vmem [resolvable:$true] %s39_s16 }
   0x4   :  { %s21_s18 = sshll.u32 %s4952_s17, 4  ;;  %s4897_s21 = scalar_lea.hbm %s7714_s1, 4352  ;;  %s4998_s18 = int_to_ptr.vmem [resolvable:$true] %s21_s18 }
   0x5   :  { %p4874_p0 = scmp.ne.s32.totalorder %s4996_s14, %s4897_s21  ;;  %s4875_s24 = scalar_lea.hbm %s7714_s1, 12288 }
   0x6   :  { %p4876_p1 = scmp.lt.u32.totalorder %s4996_s14, %s7714_s1  ;;  %p4877_p2 = scmp.lt.u32.totalorder %s4875_s24, %s4897_s21 }
   0x7   :  { %p4879_p4 = scmp.lt.u32.totalorder %s4897_s21, %s4996_s14 }
   0x8   :  { %p4878_p3 = por %p4877_p2, %p4876_p1 }
   0xa   :  { %p4880_p5 = por %p4879_p4, %p4878_p3 }
   0xc   :  { %p4881_p6 = pnand %p4880_p5, %p4874_p0 }
   0xe   :  { %4884 = shalt.err (!%p4881_p6)
}
   0xf   :  { %s4885_s27 = scalar_lea.vmem %s40_s16, 4096  ;;  %p4890_p8 = scmp.lt.s32.totalorder %s40_s16, %s40_s16 }
  0x10   :  { %p4886_p7 = scmp.ne.s32.totalorder %s40_s16, %s4885_s27  ;;  %p4891_p9 = scmp.lt.s32.totalorder %s4885_s27, %s4885_s27 }
  0x12   :  { %p4892_p10 = por %p4891_p9, %p4890_p8 }
  0x14   :  { %p4893_p11 = pnand %p4892_p10, %p4886_p7 }
  0x16   :  { %4896 = shalt.err (!%p4893_p11)
}
  0x17   :  { %s4953_s28 = smov 768   ;;  %s4954_s29 = smov 256  }
  0x18   :  { %s4955_s30 = smov 16   ;;  %s4898_s5 = scalar_lea.hbm %s7713_s0, 4096 }
  0x19   :  { %45 = dma.hbm_to_vmem [thread:$0]  %s4996_s14, 4096, %s40_s16, [#allocation6], %s4953_s28, %s4954_s29, %s4955_s30  }
  0x1a   :  { %p4899_p12 = scmp.ne.s32.totalorder %s7713_s0, %s4898_s5  ;;  %s4900_s10 = scalar_lea.hbm %s7713_s0, 12288 }
  0x1b   :  { %p4901_p13 = scmp.lt.u32.totalorder %s4900_s10, %s4898_s5  ;;  %p4902_p0 = scmp.lt.u32.totalorder %s4898_s5, %s7713_s0 }
  0x1d   :  { %p4903_p1 = por %p4902_p0, %p4901_p13 }
  0x1f   :  { %p4904_p2 = pnand %p4903_p1, %p4899_p12 }
  0x21   :  { %4907 = shalt.err (!%p4904_p2)
}
  0x22   :  { %s4908_s13 = scalar_lea.vmem %s4998_s18, 4096  ;;  %p4913_p4 = scmp.lt.s32.totalorder %s4998_s18, %s4998_s18 }
  0x23   :  { %p4909_p3 = scmp.ne.s32.totalorder %s4998_s18, %s4908_s13  ;;  %p4914_p5 = scmp.lt.s32.totalorder %s4908_s13, %s4908_s13 }
  0x25   :  { %p4915_p6 = por %p4914_p5, %p4913_p4 }
  0x27   :  { %p4916_p7 = pnand %p4915_p6, %p4909_p3 }
  0x29   :  { %4919 = shalt.err (!%p4916_p7)
}
  0x2a   :  { %27 = dma.hbm_to_vmem [thread:$0]  %s7713_s0, 4096, %s4998_s18, [#allocation3], %s4953_s28, %s4954_s29, %s4955_s30  }
  0x2b   :  { %s4466_s19 = scalar_lea.hbm %s7715_s2, 512  ;;  %s4956_s20 = smov [#allocation7]  }
  0x2c   :  { %s57_s21 = sshll.u32 %s4956_s20, 4  ;;  %s4944_s24 = scalar_lea.hbm %s7715_s2, 4608  ;;  %s58_s21 = int_to_ptr.vmem [resolvable:$true] %s57_s21 }
  0x2d   :  { %p4921_p8 = scmp.ne.s32.totalorder %s4466_s19, %s4944_s24  ;;  %s4922_s27 = scalar_lea.hbm %s7715_s2, 12288 }
  0x2e   :  { %p4923_p9 = scmp.lt.u32.totalorder %s4466_s19, %s7715_s2  ;;  %p4924_p10 = scmp.lt.u32.totalorder %s4922_s27, %s4944_s24 }
  0x2f   :  { %p4926_p12 = scmp.lt.u32.totalorder %s4944_s24, %s4466_s19 }
  0x30   :  { %p4925_p11 = por %p4924_p10, %p4923_p9 }
  0x32   :  { %p4927_p13 = por %p4926_p12, %p4925_p11 }
  0x34   :  { %p4928_p0 = pnand %p4927_p13, %p4921_p8 }
  0x36   :  { %4931 = shalt.err (!%p4928_p0)
}
  0x37   :  { %s4932_s0 = scalar_lea.vmem %s58_s21, 4096  ;;  %p4937_p2 = scmp.lt.s32.totalorder %s58_s21, %s58_s21 }
  0x38   :  { %p4933_p1 = scmp.ne.s32.totalorder %s58_s21, %s4932_s0  ;;  %p4938_p3 = scmp.lt.s32.totalorder %s4932_s0, %s4932_s0 }
  0x3a   :  { %p4939_p4 = por %p4938_p3, %p4937_p2 }
  0x3c   :  { %p4940_p5 = pnand %p4939_p4, %p4933_p1 }
  0x3e   :  { %4943 = shalt.err (!%p4940_p5)
}
  0x3f   :  { %63 = dma.hbm_to_vmem [thread:$0]  %s4466_s19, 4096, %s58_s21, [#allocation6], %s4953_s28, %s4954_s29, %s4955_s30  }
  0x40   :  { %4945 = dma.done.wait [#allocation3], 4096  }
  0x41   :  { %4946 = vsyncadd [#allocation3], 4294963200 }
  0x42   :  { %4947 = dma.done.wait [#allocation6], 8192  }
  0x43   :  { %4948 = vsyncadd [#allocation6], 4294959104  ;;  %v149_v0 = vld [vmem:[#allocation7 + $0x8] sm:$0xff]  ;;  %v116_v2 = vld [vmem:[#allocation5] sm:$0xff]  ;;  %s4957_s2 = smov 32   ;;  %vm532_vm0 = vcmask 1043456  }
  0x44   :  { %v85_v1 = vld [vmem:[#allocation2 + $0x8] sm:$0xff]  ;;  %v5054_v3 = vpack.c.bf16 %v149_v0, %v149_v0  ;;  %v87_v5 = vld [vmem:[#allocation2 + $0x18] sm:$0xff]  ;;  %v118_v6 = vld [vmem:[#allocation5 + $0x10] sm:$0xff]  ;;  %vm534_vm1 = vcmask 130048   ;;  %s4958_s18 = smov 48   ;;  %vm807_vm2 = vcmask 261120  }
  0x45   :  { %v5056_v4 = vpack.c.bf16 %v116_v2, %v85_v1  ;;  %v117_v7 = vld [vmem:[#allocation5 + $0x8] sm:$0xff]  ;;  %v5058_v8 = vpack.c.bf16 %v118_v6, %v87_v5  ;;  %v148_v9 = vld [vmem:[#allocation7] sm:$0xff]  ;;  %v151_v10 = vld [vmem:[#allocation7 + $0x18] sm:$0xff]  ;;  %s4959_s28 = smov 64   ;;  %vm1080_vm3 = vcmask 392192   ;;  %s4960_s29 = smov 80  }
  0x46   :  { %v119_v11 = vld [vmem:[#allocation5 + $0x18] sm:$0xff]  ;;  %392 = vrot.lane.b32.xlu1 %v5054_v3, %s4955_s30  ;;  %v5065_v12 = vpack.c.bf16 %v148_v9, %v117_v7  ;;  %v150_v13 = vld [vmem:[#allocation7 + $0x10] sm:$0xff]  ;;  %v121_v14 = vld [vmem:[#allocation5 + $0x28] sm:$0xff]  ;;  %v5083_v27 = vpack.c.bf16 %v151_v10, %v151_v10  ;;  %vm1353_vm4 = vcmask 523264   ;;  %s4961_s5 = smov 96   ;;  %vm1626_vm5 = vcmask 654336  }
  0x47   :  { %388 = vrot.lane.b32.xlu0 %v5056_v4, %s4955_s30  ;;  %2332 = vst [vmem:[#allocation8 + $0xe0] sm:$0xff] %v5056_v4  ;;  %v152_v15 = vld [vmem:[#allocation7 + $0x20] sm:$0xff]  ;;  %2334 = vst [vmem:[#allocation8 + $0xf0] sm:$0xff] %v5058_v8  ;;  %v5068_v16 = vpack.c.bf16 %v150_v13, %v119_v11  ;;  %v89_v18 = vld [vmem:[#allocation2 + $0x28] sm:$0xff]  ;;  %s4962_s6 = smov 112   ;;  %vm1899_vm6 = vcmask 785408  }
  0x48   :  { %v5070_v17 = vpack.c.bf16 %v152_v15, %v121_v14  ;;  %v120_v19 = vld [vmem:[#allocation5 + $0x20] sm:$0xff]  ;;  %v91_v20 = vld [vmem:[#allocation2 + $0x38] sm:$0xff]  ;;  %2333 = vst [vmem:[#allocation8 + $0xe8] sm:$0xff] %v5065_v12  ;;  %v122_v22 = vld [vmem:[#allocation5 + $0x30] sm:$0xff]  ;;  %vm2172_vm7 = vcmask 916480  }
  0x49   :  { %v5073_v21 = vpack.c.bf16 %v120_v19, %v89_v18  ;;  %2335 = vst [vmem:[#allocation8 + $0xf8] sm:$0xff] %v5068_v16  ;;  %v5077_v23 = vpack.c.bf16 %v122_v22, %v91_v20  ;;  %v123_v24 = vld [vmem:[#allocation5 + $0x38] sm:$0xff]  ;;  %v154_v25 = vld [vmem:[#allocation7 + $0x30] sm:$0xff]  ;;  %v125_v26 = vld [vmem:[#allocation5 + $0x48] sm:$0xff] }
  0x4a   :  { %2337 = vst [vmem:[#allocation8 + $0x2e8] sm:$0xff] %v5070_v17  ;;  %394 = vrot.lane.b32.xlu1 %v5058_v8, %s4955_s30  ;;  %v5086_v28 = vpack.c.bf16 %v154_v25, %v123_v24  ;;  %v156_v29 = vld [vmem:[#allocation7 + $0x40] sm:$0xff]  ;;  %v93_v30 = vld [vmem:[#allocation2 + $0x48] sm:$0xff]  ;;  %v95_v34 = vld [vmem:[#allocation2 + $0x58] sm:$0xff] }
  0x4b   :  { %390 = vrot.lane.b32.xlu0 %v5065_v12, %s4955_s30  ;;  %2336 = vst [vmem:[#allocation8 + $0x2e0] sm:$0xff] %v5073_v21  ;;  %v124_v31 = vld [vmem:[#allocation5 + $0x40] sm:$0xff]  ;;  %2338 = vst [vmem:[#allocation8 + $0x2f0] sm:$0xff] %v5077_v23  ;;  %v5089_v32 = vpack.c.bf16 %v156_v29, %v125_v26  ;;  %v126_v35 = vld [vmem:[#allocation5 + $0x50] sm:$0xff] }
  0x4c   :  { %v5091_v33 = vpack.c.bf16 %v124_v31, %v93_v30  ;;  %2339 = vst [vmem:[#allocation8 + $0x2f8] sm:$0xff] %v5086_v28  ;;  %v5094_v36 = vpack.c.bf16 %v126_v35, %v95_v34  ;;  %v127_v37 = vld [vmem:[#allocation5 + $0x58] sm:$0xff]  ;;  %v158_v38 = vld [vmem:[#allocation7 + $0x50] sm:$0xff]  ;;  %v129_v40 = vld [vmem:[#allocation5 + $0x68] sm:$0xff] }
  0x4d   :  { %2341 = vst [vmem:[#allocation8 + $0x4e8] sm:$0xff] %v5089_v32  ;;  %v5098_v39 = vpack.c.bf16 %v158_v38, %v127_v37  ;;  %v160_v41 = vld [vmem:[#allocation7 + $0x60] sm:$0xff]  ;;  %v97_v42 = vld [vmem:[#allocation2 + $0x68] sm:$0xff]  ;;  %v99_v45 = vld [vmem:[#allocation2 + $0x78] sm:$0xff] }
  0x4e   :  { %2340 = vst [vmem:[#allocation8 + $0x4e0] sm:$0xff] %v5091_v33  ;;  %398 = vrot.lane.b32.xlu1 %v5083_v27, %s4955_s30  ;;  %2342 = vst [vmem:[#allocation8 + $0x4f0] sm:$0xff] %v5094_v36  ;;  %v5105_v43 = vpack.c.bf16 %v160_v41, %v129_v40  ;;  %v128_v44 = vld [vmem:[#allocation5 + $0x60] sm:$0xff]  ;;  %v130_v46 = vld [vmem:[#allocation5 + $0x70] sm:$0xff] }
  0x4f   :  { %396 = vrot.lane.b32.xlu0 %v5068_v16, %s4955_s30  ;;  %v153_v47 = vld [vmem:[#allocation7 + $0x28] sm:$0xff]  ;;  %2343 = vst [vmem:[#allocation8 + $0x4f8] sm:$0xff] %v5098_v39  ;;  %v5108_v48 = vpack.c.bf16 %v128_v44, %v97_v42  ;;  %v5110_v49 = vpack.c.bf16 %v130_v46, %v99_v45  ;;  %v131_v50 = vld [vmem:[#allocation5 + $0x78] sm:$0xff]  ;;  %v162_v51 = vld [vmem:[#allocation7 + $0x70] sm:$0xff] }
  0x50   :  { %2345 = vst [vmem:[#allocation8 + $0x6e8] sm:$0xff] %v5105_v43  ;;  %v133_v52 = vld [vmem:[#allocation5 + $0x88] sm:$0xff]  ;;  %v164_v53 = vld [vmem:[#allocation7 + $0x80] sm:$0xff]  ;;  %v5115_v54 = vpack.c.bf16 %v162_v51, %v131_v50  ;;  %v103_v58 = vld [vmem:[#allocation2 + $0x98] sm:$0xff]  ;;  %v5123_v59 = vpack.c.bf16 %v153_v47, %v153_v47 }
  0x51   :  { %2344 = vst [vmem:[#allocation8 + $0x6e0] sm:$0xff] %v5108_v48  ;;  %2346 = vst [vmem:[#allocation8 + $0x6f0] sm:$0xff] %v5110_v49  ;;  %v5117_v55 = vpack.c.bf16 %v164_v53, %v133_v52  ;;  %v101_v56 = vld [vmem:[#allocation2 + $0x88] sm:$0xff]  ;;  %v132_v57 = vld [vmem:[#allocation5 + $0x80] sm:$0xff] }
  0x52   :  { %402 = vrot.lane.b32.xlu1 %v5070_v17, %s4955_s30  ;;  %v155_v60 = vld [vmem:[#allocation7 + $0x38] sm:$0xff]  ;;  %v5125_v61 = vpack.c.bf16 %v132_v57, %v101_v56  ;;  %v134_v62 = vld [vmem:[#allocation5 + $0x90] sm:$0xff]  ;;  %2347 = vst [vmem:[#allocation8 + $0x6f8] sm:$0xff] %v5115_v54  ;;  %v137_v2 = vld [vmem:[#allocation5 + $0xa8] sm:$0xff] }
  0x53   :  { %400 = vrot.lane.b32.xlu0 %v5073_v21, %s4955_s30  ;;  %2349 = vst [vmem:[#allocation8 + $0x8e8] sm:$0xff] %v5117_v55  ;;  %v5129_v63 = vpack.c.bf16 %v134_v62, %v103_v58  ;;  %v135_v0 = vld [vmem:[#allocation5 + $0x98] sm:$0xff]  ;;  %v166_v1 = vld [vmem:[#allocation7 + $0x90] sm:$0xff]  ;;  %v168_v6 = vld [vmem:[#allocation7 + $0xa0] sm:$0xff]  ;;  %v5143_v15 = vpack.c.bf16 %v155_v60, %v155_v60 }
  0x54   :  { %2348 = vst [vmem:[#allocation8 + $0x8e0] sm:$0xff] %v5125_v61  ;;  %v5132_v5 = vpack.c.bf16 %v166_v1, %v135_v0  ;;  %v105_v7 = vld [vmem:[#allocation2 + $0xa8] sm:$0xff]  ;;  %v136_v9 = vld [vmem:[#allocation5 + $0xa0] sm:$0xff]  ;;  %v5135_v10 = vpack.c.bf16 %v168_v6, %v137_v2  ;;  %v107_v13 = vld [vmem:[#allocation2 + $0xb8] sm:$0xff] }
  0x55   :  { %2350 = vst [vmem:[#allocation8 + $0x8f0] sm:$0xff] %v5129_v63  ;;  %v5137_v11 = vpack.c.bf16 %v136_v9, %v105_v7  ;;  %v138_v14 = vld [vmem:[#allocation5 + $0xb0] sm:$0xff]  ;;  %v139_v19 = vld [vmem:[#allocation5 + $0xb8] sm:$0xff]  ;;  %v141_v24 = vld [vmem:[#allocation5 + $0xc8] sm:$0xff] }
  0x56   :  { %406 = vrot.lane.b32.xlu1 %v5077_v23, %s4955_s30  ;;  %2351 = vst [vmem:[#allocation8 + $0x8f8] sm:$0xff] %v5132_v5  ;;  %v5146_v18 = vpack.c.bf16 %v138_v14, %v107_v13  ;;  %v170_v20 = vld [vmem:[#allocation7 + $0xb0] sm:$0xff]  ;;  %2353 = vst [vmem:[#allocation8 + $0xae8] sm:$0xff] %v5135_v10  ;;  %v172_v25 = vld [vmem:[#allocation7 + $0xc0] sm:$0xff] }
  0x57   :  { %404 = vrot.lane.b32.xlu0 %v5123_v59, %s4955_s30  ;;  %2352 = vst [vmem:[#allocation8 + $0xae0] sm:$0xff] %v5137_v11  ;;  %v5150_v22 = vpack.c.bf16 %v170_v20, %v139_v19  ;;  %v109_v26 = vld [vmem:[#allocation2 + $0xc8] sm:$0xff]  ;;  %v5153_v29 = vpack.c.bf16 %v172_v25, %v141_v24  ;;  %v140_v30 = vld [vmem:[#allocation5 + $0xc0] sm:$0xff]  ;;  %v111_v31 = vld [vmem:[#allocation2 + $0xd8] sm:$0xff] }
  0x58   :  { %2354 = vst [vmem:[#allocation8 + $0xaf0] sm:$0xff] %v5146_v18  ;;  %v142_v34 = vld [vmem:[#allocation5 + $0xd0] sm:$0xff]  ;;  %v157_v35 = vld [vmem:[#allocation7 + $0x48] sm:$0xff]  ;;  %v5156_v37 = vpack.c.bf16 %v140_v30, %v109_v26  ;;  %v143_v40 = vld [vmem:[#allocation5 + $0xd8] sm:$0xff] }
  0x59   :  { %2355 = vst [vmem:[#allocation8 + $0xaf8] sm:$0xff] %v5150_v22  ;;  %v5158_v38 = vpack.c.bf16 %v142_v34, %v111_v31  ;;  %2357 = vst [vmem:[#allocation8 + $0xce8] sm:$0xff] %v5153_v29  ;;  %v174_v41 = vld [vmem:[#allocation7 + $0xd0] sm:$0xff]  ;;  %v145_v42 = vld [vmem:[#allocation5 + $0xe8] sm:$0xff]  ;;  %v5181_v60 = vpack.c.bf16 %v157_v35, %v157_v35 }
  0x5a   :  { %410 = vrot.lane.b32.xlu1 %v5143_v15, %s4955_s30  ;;  %v176_v44 = vld [vmem:[#allocation7 + $0xe0] sm:$0xff]  ;;  %2356 = vst [vmem:[#allocation8 + $0xce0] sm:$0xff] %v5156_v37  ;;  %v5167_v45 = vpack.c.bf16 %v174_v41, %v143_v40  ;;  %v113_v47 = vld [vmem:[#allocation2 + $0xe8] sm:$0xff]  ;;  %v115_v51 = vld [vmem:[#allocation2 + $0xf8] sm:$0xff] }
  0x5b   :  { %408 = vrot.lane.b32.xlu0 %v5086_v28, %s4955_s30  ;;  %2358 = vst [vmem:[#allocation8 + $0xcf0] sm:$0xff] %v5158_v38  ;;  %v5169_v46 = vpack.c.bf16 %v176_v44, %v145_v42  ;;  %v144_v50 = vld [vmem:[#allocation5 + $0xe0] sm:$0xff]  ;;  %v146_v53 = vld [vmem:[#allocation5 + $0xf0] sm:$0xff]  ;;  %v147_v57 = vld [vmem:[#allocation5 + $0xf8] sm:$0xff] }
  0x5c   :  { %v5171_v52 = vpack.c.bf16 %v144_v50, %v113_v47  ;;  %2359 = vst [vmem:[#allocation8 + $0xcf8] sm:$0xff] %v5167_v45  ;;  %v5175_v56 = vpack.c.bf16 %v146_v53, %v115_v51  ;;  %v178_v58 = vld [vmem:[#allocation7 + $0xf0] sm:$0xff]  ;;  %v159_v0 = vld [vmem:[#allocation7 + $0x58] sm:$0xff]  ;;  %v161_v2 = vld [vmem:[#allocation7 + $0x68] sm:$0xff] }
  0x5d   :  { %2361 = vst [vmem:[#allocation8 + $0xee8] sm:$0xff] %v5169_v46  ;;  %v5184_v62 = vpack.c.bf16 %v178_v58, %v147_v57  ;;  %v5192_v1 = vpack.c.bf16 %v159_v0, %v159_v0  ;;  %v5202_v6 = vpack.c.bf16 %v161_v2, %v161_v2  ;;  %v163_v7 = vld [vmem:[#allocation7 + $0x78] sm:$0xff]  ;;  %v165_v13 = vld [vmem:[#allocation7 + $0x88] sm:$0xff] }
  0x5e   :  { %414 = vrot.lane.b32.xlu1 %v5089_v32, %s4955_s30  ;;  %2360 = vst [vmem:[#allocation8 + $0xee0] sm:$0xff] %v5171_v52  ;;  %2362 = vst [vmem:[#allocation8 + $0xef0] sm:$0xff] %v5175_v56  ;;  %v5208_v9 = vpack.c.bf16 %v163_v7, %v163_v7  ;;  %v5218_v14 = vpack.c.bf16 %v165_v13, %v165_v13  ;;  %v167_v19 = vld [vmem:[#allocation7 + $0x98] sm:$0xff]  ;;  %v169_v24 = vld [vmem:[#allocation7 + $0xa8] sm:$0xff] }
  0x5f   :  { %412 = vrot.lane.b32.xlu0 %v5091_v33, %s4955_s30  ;;  %2363 = vst [vmem:[#allocation8 + $0xef8] sm:$0xff] %v5184_v62  ;;  %v5224_v20 = vpack.c.bf16 %v167_v19, %v167_v19  ;;  %v5234_v25 = vpack.c.bf16 %v169_v24, %v169_v24  ;;  %v171_v26 = vld [vmem:[#allocation7 + $0xb8] sm:$0xff]  ;;  %v173_v31 = vld [vmem:[#allocation7 + $0xc8] sm:$0xff] }
  0x60   :  { %v5240_v30 = vpack.c.bf16 %v171_v26, %v171_v26  ;;  %v5250_v34 = vpack.c.bf16 %v173_v31, %v173_v31  ;;  %v175_v35 = vld [vmem:[#allocation7 + $0xd8] sm:$0xff]  ;;  %v177_v41 = vld [vmem:[#allocation7 + $0xe8] sm:$0xff] }
  0x61   :  { %v5256_v40 = vpack.c.bf16 %v175_v35, %v175_v35  ;;  %v5266_v42 = vpack.c.bf16 %v177_v41, %v177_v41  ;;  %v179_v44 = vld [vmem:[#allocation7 + $0xf8] sm:$0xff] }
  0x62   :  { %418 = vrot.lane.b32.xlu1 %v5094_v36, %s4955_s30  ;;  %v5272_v47 = vpack.c.bf16 %v179_v44, %v179_v44 }
  0x63   :  { %416 = vrot.lane.b32.xlu0 %v5181_v60, %s4955_s30 }
  0x66   :  { %422 = vrot.lane.b32.xlu1 %v5192_v1, %s4955_s30 }
  0x67   :  { %420 = vrot.lane.b32.xlu0 %v5098_v39, %s4955_s30 }
  0x6a   :  { %426 = vrot.lane.b32.xlu1 %v5105_v43, %s4955_s30 }
  0x6b   :  { %424 = vrot.lane.b32.xlu0 %v5108_v48, %s4955_s30 }
  0x6e   :  { %430 = vrot.lane.b32.xlu1 %v5110_v49, %s4955_s30 }
  0x6f   :  { %428 = vrot.lane.b32.xlu0 %v5202_v6, %s4955_s30 }
  0x72   :  { %434 = vrot.lane.b32.xlu1 %v5208_v9, %s4955_s30 }
  0x73   :  { %432 = vrot.lane.b32.xlu0 %v5115_v54, %s4955_s30 }
  0x76   :  { %438 = vrot.lane.b32.xlu1 %v5117_v55, %s4955_s30 }
  0x77   :  { %436 = vrot.lane.b32.xlu0 %v5125_v61, %s4955_s30 }
  0x7a   :  { %442 = vrot.lane.b32.xlu1 %v5129_v63, %s4955_s30 }
  0x7b   :  { %440 = vrot.lane.b32.xlu0 %v5218_v14, %s4955_s30 }
  0x7e   :  { %446 = vrot.lane.b32.xlu1 %v5224_v20, %s4955_s30 }
  0x7f   :  { %444 = vrot.lane.b32.xlu0 %v5132_v5, %s4955_s30 }
  0x82   :  { %450 = vrot.lane.b32.xlu1 %v5135_v10, %s4955_s30 }
  0x83   :  { %448 = vrot.lane.b32.xlu0 %v5137_v11, %s4955_s30 }
  0x86   :  { %454 = vrot.lane.b32.xlu1 %v5146_v18, %s4955_s30 }
  0x87   :  { %452 = vrot.lane.b32.xlu0 %v5234_v25, %s4955_s30 }
  0x8a   :  { %458 = vrot.lane.b32.xlu1 %v5240_v30, %s4955_s30 }
  0x8b   :  { %456 = vrot.lane.b32.xlu0 %v5150_v22, %s4955_s30 }
  0x8e   :  { %462 = vrot.lane.b32.xlu1 %v5153_v29, %s4955_s30 }
  0x8f   :  { %460 = vrot.lane.b32.xlu0 %v5156_v37, %s4955_s30 }
  0x92   :  { %466 = vrot.lane.b32.xlu1 %v5158_v38, %s4955_s30 }
  0x93   :  { %464 = vrot.lane.b32.xlu0 %v5250_v34, %s4955_s30 }
  0x96   :  { %470 = vrot.lane.b32.xlu1 %v5256_v40, %s4955_s30 }
  0x97   :  { %468 = vrot.lane.b32.xlu0 %v5167_v45, %s4955_s30 }
  0x9a   :  { %474 = vrot.lane.b32.xlu1 %v5169_v46, %s4955_s30 }
  0x9b   :  { %472 = vrot.lane.b32.xlu0 %v5171_v52, %s4955_s30 }
  0x9e   :  { %478 = vrot.lane.b32.xlu1 %v5175_v56, %s4955_s30 }
  0x9f   :  { %476 = vrot.lane.b32.xlu0 %v5266_v42, %s4955_s30 }
  0xa2   :  { %482 = vrot.lane.b32.xlu1 %v5272_v47, %s4955_s30 }
  0xa3   :  { %480 = vrot.lane.b32.xlu0 %v5184_v62, %s4955_s30 }
  0xa6   :  { %664 = vrot.lane.b32.xlu1 %v5065_v12, %s4957_s2 }
  0xa7   :  { %662 = vrot.lane.b32.xlu0 %v5056_v4, %s4957_s2 }
  0xaa   :  { %668 = vrot.lane.b32.xlu1 %v5058_v8, %s4957_s2 }
  0xab   :  { %666 = vrot.lane.b32.xlu0 %v5054_v3, %s4957_s2 }
  0xae   :  { %672 = vrot.lane.b32.xlu1 %v5083_v27, %s4957_s2 }
  0xaf   :  { %670 = vrot.lane.b32.xlu0 %v5068_v16, %s4957_s2 }
  0xb2   :  { %676 = vrot.lane.b32.xlu1 %v5070_v17, %s4957_s2 }
  0xb3   :  { %674 = vrot.lane.b32.xlu0 %v5073_v21, %s4957_s2 }
  0xb6   :  { %680 = vrot.lane.b32.xlu1 %v5077_v23, %s4957_s2 }
  0xb7   :  { %678 = vrot.lane.b32.xlu0 %v5123_v59, %s4957_s2 }
  0xb8   :  { %v393_v50 = vpop.permute.xlu1 %392 }
  0xb9   :  { %v389_v51 = vpop.permute.xlu0 %388  ;;  %v486_v58 = vrot.slane %v393_v50, 4 }
  0xba   :  { %684 = vrot.lane.b32.xlu1 %v5143_v15, %s4957_s2  ;;  %v484_v0 = vrot.slane %v389_v51, 4 }
  0xbb   :  { %682 = vrot.lane.b32.xlu0 %v5086_v28, %s4957_s2 }
  0xbc   :  { %v395_v53 = vpop.permute.xlu1 %394 }
  0xbd   :  { %v391_v57 = vpop.permute.xlu0 %390  ;;  %v487_v35 = vrot.slane %v395_v53, 4 }
  0xbe   :  { %v485_v2 = vrot.slane %v391_v57, 4  ;;  %688 = vrot.lane.b32.xlu1 %v5089_v32, %s4957_s2 }
  0xbf   :  { %686 = vrot.lane.b32.xlu0 %v5091_v33, %s4957_s2 }
  0xc0   :  { %v533_v7 = vsel %vm532_vm0, %v484_v0, %v485_v2  ;;  %v536_v13 = vsel %vm532_vm0, %v485_v2, %v486_v58  ;;  %v399_v26 = vpop.permute.xlu1 %398 }
  0xc1   :  { %v535_v19 = vsel %vm534_vm1, %v389_v51, %v533_v7  ;;  %v537_v24 = vsel %vm534_vm1, %v391_v57, %v536_v13  ;;  %v397_v31 = vpop.permute.xlu0 %396  ;;  %v489_v41 = vrot.slane %v399_v26, 4 }
  0xc2   :  { %630 = vst [vmem:[#allocation8] sm:$0xff] %v535_v19  ;;  %631 = vst [vmem:[#allocation8 + $0x8] sm:$0xff] %v537_v24  ;;  %v488_v44 = vrot.slane %v397_v31, 4  ;;  %692 = vrot.lane.b32.xlu1 %v5094_v36, %s4957_s2 }
  0xc3   :  { %690 = vrot.lane.b32.xlu0 %v5181_v60, %s4957_s2 }
  0xc4   :  { %v538_v50 = vsel %vm532_vm0, %v487_v35, %v488_v44  ;;  %v540_v58 = vsel %vm532_vm0, %v488_v44, %v489_v41  ;;  %v403_v0 = vpop.permute.xlu1 %402 }
  0xc5   :  { %v539_v51 = vsel %vm534_vm1, %v395_v53, %v538_v50  ;;  %v541_v57 = vsel %vm534_vm1, %v397_v31, %v540_v58  ;;  %v401_v2 = vpop.permute.xlu0 %400  ;;  %v491_v7 = vrot.slane %v403_v0, 4 }
  0xc6   :  { %632 = vst [vmem:[#allocation8 + $0x10] sm:$0xff] %v539_v51  ;;  %633 = vst [vmem:[#allocation8 + $0x18] sm:$0xff] %v541_v57  ;;  %v490_v13 = vrot.slane %v401_v2, 4  ;;  %696 = vrot.lane.b32.xlu1 %v5192_v1, %s4957_s2 }
  0xc7   :  { %694 = vrot.lane.b32.xlu0 %v5098_v39, %s4957_s2 }
  0xc8   :  { %v542_v19 = vsel %vm532_vm0, %v490_v13, %v491_v7  ;;  %v407_v26 = vpop.permute.xlu1 %406 }
  0xc9   :  { %v543_v24 = vsel %vm534_vm1, %v401_v2, %v542_v19  ;;  %v405_v53 = vpop.permute.xlu0 %404  ;;  %v493_v58 = vrot.slane %v407_v26, 4 }
  0xca   :  { %634 = vst [vmem:[#allocation8 + $0x200] sm:$0xff] %v543_v24  ;;  %v492_v31 = vrot.slane %v405_v53, 4  ;;  %700 = vrot.lane.b32.xlu1 %v5105_v43, %s4957_s2 }
  0xcb   :  { %698 = vrot.lane.b32.xlu0 %v5108_v48, %s4957_s2 }
  0xcc   :  { %v544_v35 = vsel %vm532_vm0, %v491_v7, %v492_v31  ;;  %v411_v44 = vpop.permute.xlu1 %410 }
  0xcd   :  { %v545_v41 = vsel %vm534_vm1, %v403_v0, %v544_v35  ;;  %v409_v50 = vpop.permute.xlu0 %408  ;;  %v495_v51 = vrot.slane %v411_v44, 4 }
  0xce   :  { %635 = vst [vmem:[#allocation8 + $0x208] sm:$0xff] %v545_v41  ;;  %v494_v57 = vrot.slane %v409_v50, 4  ;;  %704 = vrot.lane.b32.xlu1 %v5110_v49, %s4957_s2 }
  0xcf   :  { %702 = vrot.lane.b32.xlu0 %v5202_v6, %s4957_s2 }
  0xd0   :  { %v546_v2 = vsel %vm532_vm0, %v493_v58, %v494_v57  ;;  %v548_v13 = vsel %vm532_vm0, %v494_v57, %v495_v51  ;;  %v415_v19 = vpop.permute.xlu1 %414 }
  0xd1   :  { %v547_v7 = vsel %vm534_vm1, %v407_v26, %v546_v2  ;;  %v549_v0 = vsel %vm534_vm1, %v409_v50, %v548_v13  ;;  %v413_v24 = vpop.permute.xlu0 %412  ;;  %v497_v53 = vrot.slane %v415_v19, 4 }
  0xd2   :  { %636 = vst [vmem:[#allocation8 + $0x210] sm:$0xff] %v547_v7  ;;  %637 = vst [vmem:[#allocation8 + $0x218] sm:$0xff] %v549_v0  ;;  %v496_v31 = vrot.slane %v413_v24, 4  ;;  %708 = vrot.lane.b32.xlu1 %v5208_v9, %s4957_s2 }
  0xd3   :  { %706 = vrot.lane.b32.xlu0 %v5115_v54, %s4957_s2 }
  0xd4   :  { %v550_v35 = vsel %vm532_vm0, %v496_v31, %v497_v53  ;;  %v419_v44 = vpop.permute.xlu1 %418 }
  0xd5   :  { %v551_v41 = vsel %vm534_vm1, %v413_v24, %v550_v35  ;;  %v417_v26 = vpop.permute.xlu0 %416  ;;  %v499_v13 = vrot.slane %v419_v44, 4 }
  0xd6   :  { %638 = vst [vmem:[#allocation8 + $0x400] sm:$0xff] %v551_v41  ;;  %v498_v50 = vrot.slane %v417_v26, 4  ;;  %712 = vrot.lane.b32.xlu1 %v5117_v55, %s4957_s2 }
  0xd7   :  { %710 = vrot.lane.b32.xlu0 %v5125_v61, %s4957_s2 }
  0xd8   :  { %v552_v58 = vsel %vm532_vm0, %v497_v53, %v498_v50  ;;  %v423_v57 = vpop.permute.xlu1 %422 }
  0xd9   :  { %v553_v51 = vsel %vm534_vm1, %v415_v19, %v552_v58  ;;  %v421_v2 = vpop.permute.xlu0 %420  ;;  %v501_v7 = vrot.slane %v423_v57, 4 }
  0xda   :  { %639 = vst [vmem:[#allocation8 + $0x408] sm:$0xff] %v553_v51  ;;  %v500_v0 = vrot.slane %v421_v2, 4  ;;  %716 = vrot.lane.b32.xlu1 %v5129_v63, %s4957_s2 }
  0xdb   :  { %714 = vrot.lane.b32.xlu0 %v5218_v14, %s4957_s2 }
  0xdc   :  { %v554_v24 = vsel %vm532_vm0, %v499_v13, %v500_v0  ;;  %v556_v31 = vsel %vm532_vm0, %v500_v0, %v501_v7  ;;  %v427_v35 = vpop.permute.xlu1 %426 }
  0xdd   :  { %v555_v53 = vsel %vm534_vm1, %v419_v44, %v554_v24  ;;  %v557_v19 = vsel %vm534_vm1, %v421_v2, %v556_v31  ;;  %v425_v41 = vpop.permute.xlu0 %424  ;;  %v503_v26 = vrot.slane %v427_v35, 4 }
  0xde   :  { %640 = vst [vmem:[#allocation8 + $0x410] sm:$0xff] %v555_v53  ;;  %641 = vst [vmem:[#allocation8 + $0x418] sm:$0xff] %v557_v19  ;;  %v502_v50 = vrot.slane %v425_v41, 4  ;;  %720 = vrot.lane.b32.xlu1 %v5224_v20, %s4957_s2 }
  0xdf   :  { %718 = vrot.lane.b32.xlu0 %v5132_v5, %s4957_s2 }
  0xe0   :  { %v558_v58 = vsel %vm532_vm0, %v502_v50, %v503_v26  ;;  %v431_v57 = vpop.permute.xlu1 %430 }
  0xe1   :  { %v559_v51 = vsel %vm534_vm1, %v425_v41, %v558_v58  ;;  %v429_v44 = vpop.permute.xlu0 %428  ;;  %v505_v31 = vrot.slane %v431_v57, 4 }
  0xe2   :  { %642 = vst [vmem:[#allocation8 + $0x600] sm:$0xff] %v559_v51  ;;  %v504_v2 = vrot.slane %v429_v44, 4  ;;  %724 = vrot.lane.b32.xlu1 %v5135_v10, %s4957_s2 }
  0xe3   :  { %722 = vrot.lane.b32.xlu0 %v5137_v11, %s4957_s2 }
  0xe4   :  { %v560_v13 = vsel %vm532_vm0, %v503_v26, %v504_v2  ;;  %v435_v0 = vpop.permute.xlu1 %434 }
  0xe5   :  { %v561_v7 = vsel %vm534_vm1, %v427_v35, %v560_v13  ;;  %v433_v24 = vpop.permute.xlu0 %432  ;;  %v507_v53 = vrot.slane %v435_v0, 4 }
  0xe6   :  { %643 = vst [vmem:[#allocation8 + $0x608] sm:$0xff] %v561_v7  ;;  %v506_v19 = vrot.slane %v433_v24, 4  ;;  %728 = vrot.lane.b32.xlu1 %v5146_v18, %s4957_s2 }
  0xe7   :  { %726 = vrot.lane.b32.xlu0 %v5234_v25, %s4957_s2 }
  0xe8   :  { %v562_v41 = vsel %vm532_vm0, %v505_v31, %v506_v19  ;;  %v564_v50 = vsel %vm532_vm0, %v506_v19, %v507_v53  ;;  %v439_v58 = vpop.permute.xlu1 %438 }
  0xe9   :  { %v563_v26 = vsel %vm534_vm1, %v431_v57, %v562_v41  ;;  %v565_v35 = vsel %vm534_vm1, %v433_v24, %v564_v50  ;;  %v437_v51 = vpop.permute.xlu0 %436  ;;  %v509_v44 = vrot.slane %v439_v58, 4 }
  0xea   :  { %644 = vst [vmem:[#allocation8 + $0x610] sm:$0xff] %v563_v26  ;;  %645 = vst [vmem:[#allocation8 + $0x618] sm:$0xff] %v565_v35  ;;  %v508_v2 = vrot.slane %v437_v51, 4  ;;  %732 = vrot.lane.b32.xlu1 %v5240_v30, %s4957_s2 }
  0xeb   :  { %730 = vrot.lane.b32.xlu0 %v5150_v22, %s4957_s2 }
  0xec   :  { %v566_v13 = vsel %vm532_vm0, %v508_v2, %v509_v44  ;;  %v443_v0 = vpop.permute.xlu1 %442 }
  0xed   :  { %v567_v7 = vsel %vm534_vm1, %v437_v51, %v566_v13  ;;  %v441_v57 = vpop.permute.xlu0 %440  ;;  %v511_v50 = vrot.slane %v443_v0, 4 }
  0xee   :  { %646 = vst [vmem:[#allocation8 + $0x800] sm:$0xff] %v567_v7  ;;  %v510_v24 = vrot.slane %v441_v57, 4  ;;  %736 = vrot.lane.b32.xlu1 %v5153_v29, %s4957_s2 }
  0xef   :  { %734 = vrot.lane.b32.xlu0 %v5156_v37, %s4957_s2 }
  0xf0   :  { %v568_v31 = vsel %vm532_vm0, %v509_v44, %v510_v24  ;;  %v447_v19 = vpop.permute.xlu1 %446 }
  0xf1   :  { %v569_v53 = vsel %vm534_vm1, %v439_v58, %v568_v31  ;;  %v445_v41 = vpop.permute.xlu0 %444  ;;  %v513_v26 = vrot.slane %v447_v19, 4 }
  0xf2   :  { %647 = vst [vmem:[#allocation8 + $0x808] sm:$0xff] %v569_v53  ;;  %v512_v35 = vrot.slane %v445_v41, 4  ;;  %740 = vrot.lane.b32.xlu1 %v5158_v38, %s4957_s2 }
  0xf3   :  { %738 = vrot.lane.b32.xlu0 %v5250_v34, %s4957_s2 }
  0xf4   :  { %v570_v51 = vsel %vm532_vm0, %v511_v50, %v512_v35  ;;  %v572_v2 = vsel %vm532_vm0, %v512_v35, %v513_v26  ;;  %v451_v13 = vpop.permute.xlu1 %450 }
  0xf5   :  { %v571_v44 = vsel %vm534_vm1, %v443_v0, %v570_v51  ;;  %v573_v58 = vsel %vm534_vm1, %v445_v41, %v572_v2  ;;  %v449_v7 = vpop.permute.xlu0 %448  ;;  %v515_v57 = vrot.slane %v451_v13, 4 }
  0xf6   :  { %648 = vst [vmem:[#allocation8 + $0x810] sm:$0xff] %v571_v44  ;;  %649 = vst [vmem:[#allocation8 + $0x818] sm:$0xff] %v573_v58  ;;  %v514_v24 = vrot.slane %v449_v7, 4  ;;  %744 = vrot.lane.b32.xlu1 %v5256_v40, %s4957_s2 }
  0xf7   :  { %742 = vrot.lane.b32.xlu0 %v5167_v45, %s4957_s2 }
  0xf8   :  { %v574_v31 = vsel %vm532_vm0, %v514_v24, %v515_v57  ;;  %v455_v19 = vpop.permute.xlu1 %454 }
  0xf9   :  { %v575_v53 = vsel %vm534_vm1, %v449_v7, %v574_v31  ;;  %v453_v0 = vpop.permute.xlu0 %452  ;;  %v517_v2 = vrot.slane %v455_v19, 4 }
  0xfa   :  { %650 = vst [vmem:[#allocation8 + $0xa00] sm:$0xff] %v575_v53  ;;  %v516_v41 = vrot.slane %v453_v0, 4  ;;  %748 = vrot.lane.b32.xlu1 %v5169_v46, %s4957_s2 }
  0xfb   :  { %746 = vrot.lane.b32.xlu0 %v5171_v52, %s4957_s2 }
  0xfc   :  { %v576_v50 = vsel %vm532_vm0, %v515_v57, %v516_v41  ;;  %v459_v35 = vpop.permute.xlu1 %458 }
  0xfd   :  { %v577_v26 = vsel %vm534_vm1, %v451_v13, %v576_v50  ;;  %v457_v51 = vpop.permute.xlu0 %456  ;;  %v519_v44 = vrot.slane %v459_v35, 4 }
  0xfe   :  { %651 = vst [vmem:[#allocation8 + $0xa08] sm:$0xff] %v577_v26  ;;  %v518_v58 = vrot.slane %v457_v51, 4  ;;  %752 = vrot.lane.b32.xlu1 %v5175_v56, %s4957_s2 }
  0xff   :  { %750 = vrot.lane.b32.xlu0 %v5266_v42, %s4957_s2 }
 0x100   :  { %v578_v7 = vsel %vm532_vm0, %v517_v2, %v518_v58  ;;  %v580_v24 = vsel %vm532_vm0, %v518_v58, %v519_v44  ;;  %v463_v31 = vpop.permute.xlu1 %462 }
 0x101   :  { %v579_v57 = vsel %vm534_vm1, %v455_v19, %v578_v7  ;;  %v581_v13 = vsel %vm534_vm1, %v457_v51, %v580_v24  ;;  %v461_v53 = vpop.permute.xlu0 %460  ;;  %v521_v0 = vrot.slane %v463_v31, 4 }
 0x102   :  { %652 = vst [vmem:[#allocation8 + $0xa10] sm:$0xff] %v579_v57  ;;  %653 = vst [vmem:[#allocation8 + $0xa18] sm:$0xff] %v581_v13  ;;  %v520_v41 = vrot.slane %v461_v53, 4  ;;  %756 = vrot.lane.b32.xlu1 %v5272_v47, %s4957_s2 }
 0x103   :  { %754 = vrot.lane.b32.xlu0 %v5184_v62, %s4957_s2 }
 0x104   :  { %v582_v50 = vsel %vm532_vm0, %v520_v41, %v521_v0  ;;  %v467_v35 = vpop.permute.xlu1 %466 }
 0x105   :  { %v583_v26 = vsel %vm534_vm1, %v461_v53, %v582_v50  ;;  %v465_v19 = vpop.permute.xlu0 %464  ;;  %v523_v24 = vrot.slane %v467_v35, 4 }
 0x106   :  { %654 = vst [vmem:[#allocation8 + $0xc00] sm:$0xff] %v583_v26  ;;  %v522_v51 = vrot.slane %v465_v19, 4  ;;  %937 = vrot.lane.b32.xlu1 %v5065_v12, %s4958_s18 }
 0x107   :  { %935 = vrot.lane.b32.xlu0 %v5056_v4, %s4958_s18 }
 0x108   :  { %v584_v2 = vsel %vm532_vm0, %v521_v0, %v522_v51  ;;  %v471_v58 = vpop.permute.xlu1 %470 }
 0x109   :  { %v585_v44 = vsel %vm534_vm1, %v463_v31, %v584_v2  ;;  %v469_v7 = vpop.permute.xlu0 %468  ;;  %v525_v57 = vrot.slane %v471_v58, 4 }
 0x10a   :  { %655 = vst [vmem:[#allocation8 + $0xc08] sm:$0xff] %v585_v44  ;;  %v524_v13 = vrot.slane %v469_v7, 4  ;;  %941 = vrot.lane.b32.xlu1 %v5058_v8, %s4958_s18 }
 0x10b   :  { %939 = vrot.lane.b32.xlu0 %v5054_v3, %s4958_s18 }
 0x10c   :  { %v586_v12 = vsel %vm532_vm0, %v523_v24, %v524_v13  ;;  %v588_v4 = vsel %vm532_vm0, %v524_v13, %v525_v57  ;;  %v475_v0 = vpop.permute.xlu1 %474 }
 0x10d   :  { %v587_v53 = vsel %vm534_vm1, %v467_v35, %v586_v12  ;;  %v589_v31 = vsel %vm534_vm1, %v469_v7, %v588_v4  ;;  %v473_v41 = vpop.permute.xlu0 %472  ;;  %v527_v50 = vrot.slane %v475_v0, 4 }
 0x10e   :  { %656 = vst [vmem:[#allocation8 + $0xc10] sm:$0xff] %v587_v53  ;;  %657 = vst [vmem:[#allocation8 + $0xc18] sm:$0xff] %v589_v31  ;;  %v526_v26 = vrot.slane %v473_v41, 4  ;;  %945 = vrot.lane.b32.xlu1 %v5083_v27, %s4958_s18 }
 0x10f   :  { %943 = vrot.lane.b32.xlu0 %v5068_v16, %s4958_s18 }
 0x110   :  { %v590_v8 = vsel %vm532_vm0, %v526_v26, %v527_v50  ;;  %v479_v51 = vpop.permute.xlu1 %478 }
 0x111   :  { %v591_v19 = vsel %vm534_vm1, %v473_v41, %v590_v8  ;;  %v477_v35 = vpop.permute.xlu0 %476  ;;  %v529_v24 = vrot.slane %v479_v51, 4 }
 0x112   :  { %658 = vst [vmem:[#allocation8 + $0xe00] sm:$0xff] %v591_v19  ;;  %v528_v2 = vrot.slane %v477_v35, 4  ;;  %949 = vrot.lane.b32.xlu1 %v5070_v17, %s4958_s18 }
 0x113   :  { %947 = vrot.lane.b32.xlu0 %v5073_v21, %s4958_s18 }
 0x114   :  { %v592_v44 = vsel %vm532_vm0, %v527_v50, %v528_v2  ;;  %v483_v7 = vpop.permute.xlu1 %482 }
 0x115   :  { %v593_v58 = vsel %vm534_vm1, %v475_v0, %v592_v44  ;;  %v481_v16 = vpop.permute.xlu0 %480  ;;  %v531_v57 = vrot.slane %v483_v7, 4 }
 0x116   :  { %659 = vst [vmem:[#allocation8 + $0xe08] sm:$0xff] %v593_v58  ;;  %v530_v13 = vrot.slane %v481_v16, 4  ;;  %953 = vrot.lane.b32.xlu1 %v5077_v23, %s4958_s18 }
 0x117   :  { %951 = vrot.lane.b32.xlu0 %v5123_v59, %s4958_s18 }
 0x118   :  { %v594_v17 = vsel %vm532_vm0, %v529_v24, %v530_v13  ;;  %v596_v21 = vsel %vm532_vm0, %v530_v13, %v531_v57  ;;  %v665_v53 = vpop.permute.xlu1 %664 }
 0x119   :  { %v595_v12 = vsel %vm534_vm1, %v479_v51, %v594_v17  ;;  %v597_v4 = vsel %vm534_vm1, %v481_v16, %v596_v21  ;;  %v663_v31 = vpop.permute.xlu0 %662  ;;  %v759_v0 = vrot.slane %v665_v53, 4 }
 0x11a   :  { %660 = vst [vmem:[#allocation8 + $0xe10] sm:$0xff] %v595_v12  ;;  %661 = vst [vmem:[#allocation8 + $0xe18] sm:$0xff] %v597_v4  ;;  %v758_v41 = vrot.slane %v663_v31, 4  ;;  %957 = vrot.lane.b32.xlu1 %v5143_v15, %s4958_s18 }
 0x11b   :  { %955 = vrot.lane.b32.xlu0 %v5086_v28, %s4958_s18 }
 0x11c   :  { %v806_v23 = vsel %vm532_vm0, %v758_v41, %v759_v0  ;;  %v669_v26 = vpop.permute.xlu1 %668 }
 0x11d   :  { %v808_v50 = vsel %vm807_vm2, %v663_v31, %v806_v23  ;;  %v667_v8 = vpop.permute.xlu0 %666  ;;  %v761_v44 = vrot.slane %v669_v26, 4 }
 0x11e   :  { %903 = vst [vmem:[#allocation8 + $0x20] sm:$0xff] %v808_v50  ;;  %v760_v19 = vrot.slane %v667_v8, 4  ;;  %961 = vrot.lane.b32.xlu1 %v5089_v32, %s4958_s18 }
 0x11f   :  { %959 = vrot.lane.b32.xlu0 %v5091_v33, %s4958_s18 }
 0x120   :  { %v809_v51 = vsel %vm532_vm0, %v759_v0, %v760_v19  ;;  %v673_v2 = vpop.permute.xlu1 %672 }
 0x121   :  { %v810_v35 = vsel %vm807_vm2, %v665_v53, %v809_v51  ;;  %v671_v28 = vpop.permute.xlu0 %670  ;;  %v763_v58 = vrot.slane %v673_v2, 4 }
 0x122   :  { %904 = vst [vmem:[#allocation8 + $0x28] sm:$0xff] %v810_v35  ;;  %v762_v7 = vrot.slane %v671_v28, 4  ;;  %965 = vrot.lane.b32.xlu1 %v5094_v36, %s4958_s18 }
 0x123   :  { %963 = vrot.lane.b32.xlu0 %v5181_v60, %s4958_s18 }
 0x124   :  { %v811_v32 = vsel %vm532_vm0, %v761_v44, %v762_v7  ;;  %v813_v33 = vsel %vm532_vm0, %v762_v7, %v763_v58  ;;  %v677_v57 = vpop.permute.xlu1 %676 }
 0x125   :  { %v812_v16 = vsel %vm807_vm2, %v669_v26, %v811_v32  ;;  %v814_v24 = vsel %vm807_vm2, %v671_v28, %v813_v33  ;;  %v675_v13 = vpop.permute.xlu0 %674  ;;  %v765_v17 = vrot.slane %v677_v57, 4 }
 0x126   :  { %905 = vst [vmem:[#allocation8 + $0x30] sm:$0xff] %v812_v16  ;;  %906 = vst [vmem:[#allocation8 + $0x38] sm:$0xff] %v814_v24  ;;  %v764_v21 = vrot.slane %v675_v13, 4  ;;  %969 = vrot.lane.b32.xlu1 %v5192_v1, %s4958_s18 }
 0x127   :  { %967 = vrot.lane.b32.xlu0 %v5098_v39, %s4958_s18 }
 0x128   :  { %v815_v36 = vsel %vm532_vm0, %v764_v21, %v765_v17  ;;  %v681_v4 = vpop.permute.xlu1 %680 }
 0x129   :  { %v816_v12 = vsel %vm807_vm2, %v675_v13, %v815_v36  ;;  %v679_v53 = vpop.permute.xlu0 %678  ;;  %v767_v50 = vrot.slane %v681_v4, 4 }
 0x12a   :  { %907 = vst [vmem:[#allocation8 + $0x220] sm:$0xff] %v816_v12  ;;  %v766_v31 = vrot.slane %v679_v53, 4  ;;  %973 = vrot.lane.b32.xlu1 %v5105_v43, %s4958_s18 }
 0x12b   :  { %971 = vrot.lane.b32.xlu0 %v5108_v48, %s4958_s18 }
 0x12c   :  { %v817_v0 = vsel %vm532_vm0, %v765_v17, %v766_v31  ;;  %v685_v23 = vpop.permute.xlu1 %684 }
 0x12d   :  { %v818_v41 = vsel %vm807_vm2, %v677_v57, %v817_v0  ;;  %v683_v39 = vpop.permute.xlu0 %682  ;;  %v769_v26 = vrot.slane %v685_v23, 4 }
 0x12e   :  { %908 = vst [vmem:[#allocation8 + $0x228] sm:$0xff] %v818_v41  ;;  %v768_v8 = vrot.slane %v683_v39, 4  ;;  %977 = vrot.lane.b32.xlu1 %v5110_v49, %s4958_s18 }
 0x12f   :  { %975 = vrot.lane.b32.xlu0 %v5202_v6, %s4958_s18 }
 0x130   :  { %v819_v43 = vsel %vm532_vm0, %v767_v50, %v768_v8  ;;  %v821_v48 = vsel %vm532_vm0, %v768_v8, %v769_v26  ;;  %v689_v35 = vpop.permute.xlu1 %688 }
 0x131   :  { %v820_v19 = vsel %vm807_vm2, %v681_v4, %v819_v43  ;;  %v822_v51 = vsel %vm807_vm2, %v683_v39, %v821_v48  ;;  %v687_v2 = vpop.permute.xlu0 %686  ;;  %v771_v28 = vrot.slane %v689_v35, 4 }
 0x132   :  { %909 = vst [vmem:[#allocation8 + $0x230] sm:$0xff] %v820_v19  ;;  %910 = vst [vmem:[#allocation8 + $0x238] sm:$0xff] %v822_v51  ;;  %v770_v44 = vrot.slane %v687_v2, 4  ;;  %981 = vrot.lane.b32.xlu1 %v5208_v9, %s4958_s18 }
 0x133   :  { %979 = vrot.lane.b32.xlu0 %v5115_v54, %s4958_s18 }
 0x134   :  { %v823_v49 = vsel %vm532_vm0, %v770_v44, %v771_v28  ;;  %v693_v7 = vpop.permute.xlu1 %692 }
 0x135   :  { %v824_v58 = vsel %vm807_vm2, %v687_v2, %v823_v49  ;;  %v691_v32 = vpop.permute.xlu0 %690  ;;  %v773_v13 = vrot.slane %v693_v7, 4 }
 0x136   :  { %911 = vst [vmem:[#allocation8 + $0x420] sm:$0xff] %v824_v58  ;;  %v772_v33 = vrot.slane %v691_v32, 4  ;;  %985 = vrot.lane.b32.xlu1 %v5117_v55, %s4958_s18 }
 0x137   :  { %983 = vrot.lane.b32.xlu0 %v5125_v61, %s4958_s18 }
 0x138   :  { %v825_v16 = vsel %vm532_vm0, %v771_v28, %v772_v33  ;;  %v697_v57 = vpop.permute.xlu1 %696 }
 0x139   :  { %v826_v24 = vsel %vm807_vm2, %v689_v35, %v825_v16  ;;  %v695_v54 = vpop.permute.xlu0 %694  ;;  %v775_v17 = vrot.slane %v697_v57, 4 }
 0x13a   :  { %912 = vst [vmem:[#allocation8 + $0x428] sm:$0xff] %v826_v24  ;;  %v774_v21 = vrot.slane %v695_v54, 4  ;;  %989 = vrot.lane.b32.xlu1 %v5129_v63, %s4958_s18 }
 0x13b   :  { %987 = vrot.lane.b32.xlu0 %v5218_v14, %s4958_s18 }
 0x13c   :  { %v827_v55 = vsel %vm532_vm0, %v773_v13, %v774_v21  ;;  %v829_v61 = vsel %vm532_vm0, %v774_v21, %v775_v17  ;;  %v701_v4 = vpop.permute.xlu1 %700 }
 0x13d   :  { %v828_v36 = vsel %vm807_vm2, %v693_v7, %v827_v55  ;;  %v830_v12 = vsel %vm807_vm2, %v695_v54, %v829_v61  ;;  %v699_v53 = vpop.permute.xlu0 %698  ;;  %v777_v31 = vrot.slane %v701_v4, 4 }
 0x13e   :  { %913 = vst [vmem:[#allocation8 + $0x430] sm:$0xff] %v828_v36  ;;  %914 = vst [vmem:[#allocation8 + $0x438] sm:$0xff] %v830_v12  ;;  %v776_v0 = vrot.slane %v699_v53, 4  ;;  %993 = vrot.lane.b32.xlu1 %v5224_v20, %s4958_s18 }
 0x13f   :  { %991 = vrot.lane.b32.xlu0 %v5132_v5, %s4958_s18 }
 0x140   :  { %v831_v63 = vsel %vm532_vm0, %v776_v0, %v777_v31  ;;  %v705_v23 = vpop.permute.xlu1 %704 }
 0x141   :  { %v832_v41 = vsel %vm807_vm2, %v699_v53, %v831_v63  ;;  %v703_v39 = vpop.permute.xlu0 %702  ;;  %v779_v48 = vrot.slane %v705_v23, 4 }
 0x142   :  { %915 = vst [vmem:[#allocation8 + $0x620] sm:$0xff] %v832_v41  ;;  %v778_v50 = vrot.slane %v703_v39, 4  ;;  %997 = vrot.lane.b32.xlu1 %v5135_v10, %s4958_s18 }
 0x143   :  { %995 = vrot.lane.b32.xlu0 %v5137_v11, %s4958_s18 }
 0x144   :  { %v833_v26 = vsel %vm532_vm0, %v777_v31, %v778_v50  ;;  %v709_v43 = vpop.permute.xlu1 %708 }
 0x145   :  { %v834_v8 = vsel %vm807_vm2, %v701_v4, %v833_v26  ;;  %v707_v5 = vpop.permute.xlu0 %706  ;;  %v781_v19 = vrot.slane %v709_v43, 4 }
 0x146   :  { %916 = vst [vmem:[#allocation8 + $0x628] sm:$0xff] %v834_v8  ;;  %v780_v51 = vrot.slane %v707_v5, 4  ;;  %1001 = vrot.lane.b32.xlu1 %v5146_v18, %s4958_s18 }
 0x147   :  { %999 = vrot.lane.b32.xlu0 %v5234_v25, %s4958_s18 }
 0x148   :  { %v835_v10 = vsel %vm532_vm0, %v779_v48, %v780_v51  ;;  %v837_v11 = vsel %vm532_vm0, %v780_v51, %v781_v19  ;;  %v713_v28 = vpop.permute.xlu1 %712 }
 0x149   :  { %v836_v35 = vsel %vm807_vm2, %v705_v23, %v835_v10  ;;  %v838_v2 = vsel %vm807_vm2, %v707_v5, %v837_v11  ;;  %v711_v44 = vpop.permute.xlu0 %710  ;;  %v783_v49 = vrot.slane %v713_v28, 4 }
 0x14a   :  { %917 = vst [vmem:[#allocation8 + $0x630] sm:$0xff] %v836_v35  ;;  %918 = vst [vmem:[#allocation8 + $0x638] sm:$0xff] %v838_v2  ;;  %v782_v58 = vrot.slane %v711_v44, 4  ;;  %1005 = vrot.lane.b32.xlu1 %v5240_v30, %s4958_s18 }
 0x14b   :  { %1003 = vrot.lane.b32.xlu0 %v5150_v22, %s4958_s18 }
 0x14c   :  { %v839_v18 = vsel %vm532_vm0, %v782_v58, %v783_v49  ;;  %v717_v32 = vpop.permute.xlu1 %716  ;;  %v5588_v58 = vld [vmem:[#allocation8 + $0xe0] sm:$0xff] }
 0x14d   :  { %v840_v7 = vsel %vm807_vm2, %v711_v44, %v839_v18  ;;  %v715_v33 = vpop.permute.xlu0 %714  ;;  %v785_v13 = vrot.slane %v717_v32, 4 }
 0x14e   :  { %919 = vst [vmem:[#allocation8 + $0x820] sm:$0xff] %v840_v7  ;;  %v784_v16 = vrot.slane %v715_v33, 4  ;;  %1009 = vrot.lane.b32.xlu1 %v5153_v29, %s4958_s18 }
 0x14f   :  { %1007 = vrot.lane.b32.xlu0 %v5156_v37, %s4958_s18 }
 0x150   :  { %v841_v24 = vsel %vm532_vm0, %v783_v49, %v784_v16  ;;  %v721_v54 = vpop.permute.xlu1 %720  ;;  %v5584_v49 = vld [vmem:[#allocation8 + $0xe8] sm:$0xff] }
 0x151   :  { %v842_v57 = vsel %vm807_vm2, %v713_v28, %v841_v24  ;;  %v719_v22 = vpop.permute.xlu0 %718  ;;  %v787_v17 = vrot.slane %v721_v54, 4 }
 0x152   :  { %920 = vst [vmem:[#allocation8 + $0x828] sm:$0xff] %v842_v57  ;;  %v786_v21 = vrot.slane %v719_v22, 4  ;;  %1013 = vrot.lane.b32.xlu1 %v5158_v38, %s4958_s18  ;;  %v5594_v57 = vld [vmem:[#allocation8 + $0xf0] sm:$0xff] }
 0x153   :  { %1011 = vrot.lane.b32.xlu0 %v5250_v34, %s4958_s18 }
 0x154   :  { %v843_v29 = vsel %vm532_vm0, %v785_v13, %v786_v21  ;;  %v845_v37 = vsel %vm532_vm0, %v786_v21, %v787_v17  ;;  %v725_v36 = vpop.permute.xlu1 %724 }
 0x155   :  { %v844_v55 = vsel %vm807_vm2, %v717_v32, %v843_v29  ;;  %v846_v61 = vsel %vm807_vm2, %v719_v22, %v845_v37  ;;  %v723_v12 = vpop.permute.xlu0 %722  ;;  %v789_v4 = vrot.slane %v725_v36, 4 }
 0x156   :  { %921 = vst [vmem:[#allocation8 + $0x830] sm:$0xff] %v844_v55  ;;  %922 = vst [vmem:[#allocation8 + $0x838] sm:$0xff] %v846_v61  ;;  %v788_v53 = vrot.slane %v723_v12, 4  ;;  %1017 = vrot.lane.b32.xlu1 %v5256_v40, %s4958_s18  ;;  %v5606_v61 = vld [vmem:[#allocation8 + $0xf8] sm:$0xff] }
 0x157   :  { %1015 = vrot.lane.b32.xlu0 %v5167_v45, %s4958_s18 }
 0x158   :  { %v847_v38 = vsel %vm532_vm0, %v788_v53, %v789_v4  ;;  %v729_v0 = vpop.permute.xlu1 %728 }
 0x159   :  { %v848_v31 = vsel %vm807_vm2, %v723_v12, %v847_v38  ;;  %v727_v63 = vpop.permute.xlu0 %726  ;;  %v791_v26 = vrot.slane %v729_v0, 4 }
 0x15a   :  { %923 = vst [vmem:[#allocation8 + $0xa20] sm:$0xff] %v848_v31  ;;  %v790_v41 = vrot.slane %v727_v63, 4  ;;  %1021 = vrot.lane.b32.xlu1 %v5169_v46, %s4958_s18  ;;  %v5612_v31 = vld [vmem:[#allocation8 + $0x2e8] sm:$0xff] }
 0x15b   :  { %1019 = vrot.lane.b32.xlu0 %v5171_v52, %s4958_s18 }
 0x15c   :  { %v849_v23 = vsel %vm532_vm0, %v789_v4, %v790_v41  ;;  %v733_v50 = vpop.permute.xlu1 %732 }
 0x15d   :  { %v850_v39 = vsel %vm807_vm2, %v725_v36, %v849_v23  ;;  %v731_v45 = vpop.permute.xlu0 %730  ;;  %v793_v8 = vrot.slane %v733_v50, 4 }
 0x15e   :  { %924 = vst [vmem:[#allocation8 + $0xa28] sm:$0xff] %v850_v39  ;;  %v792_v43 = vrot.slane %v731_v45, 4  ;;  %1025 = vrot.lane.b32.xlu1 %v5175_v56, %s4958_s18 }
 0x15f   :  { %1023 = vrot.lane.b32.xlu0 %v5266_v42, %s4958_s18 }
 0x160   :  { %v851_v46 = vsel %vm532_vm0, %v791_v26, %v792_v43  ;;  %v853_v52 = vsel %vm532_vm0, %v792_v43, %v793_v8  ;;  %v737_v19 = vpop.permute.xlu1 %736  ;;  %v5622_v8 = vld [vmem:[#allocation8 + $0x2f0] sm:$0xff] }
 0x161   :  { %v852_v5 = vsel %vm807_vm2, %v729_v0, %v851_v46  ;;  %v854_v48 = vsel %vm807_vm2, %v731_v45, %v853_v52  ;;  %v735_v51 = vpop.permute.xlu0 %734  ;;  %v795_v10 = vrot.slane %v737_v19, 4  ;;  %v5616_v0 = vld [vmem:[#allocation8 + $0x2e0] sm:$0xff] }
 0x162   :  { %925 = vst [vmem:[#allocation8 + $0xa30] sm:$0xff] %v852_v5  ;;  %926 = vst [vmem:[#allocation8 + $0xa38] sm:$0xff] %v854_v48  ;;  %v794_v11 = vrot.slane %v735_v51, 4  ;;  %1029 = vrot.lane.b32.xlu1 %v5272_v47, %s4958_s18 }
 0x163   :  { %1027 = vrot.lane.b32.xlu0 %v5184_v62, %s4958_s18 }
 0x164   :  { %v855_v56 = vsel %vm532_vm0, %v794_v11, %v795_v10  ;;  %v741_v2 = vpop.permute.xlu1 %740  ;;  %v5634_v11 = vld [vmem:[#allocation8 + $0x2f8] sm:$0xff] }
 0x165   :  { %v856_v35 = vsel %vm807_vm2, %v735_v51, %v855_v56  ;;  %v739_v28 = vpop.permute.xlu0 %738  ;;  %v797_v33 = vrot.slane %v741_v2, 4 }
 0x166   :  { %927 = vst [vmem:[#allocation8 + $0xc20] sm:$0xff] %v856_v35  ;;  %v796_v44 = vrot.slane %v739_v28, 4  ;;  %1210 = vrot.lane.b32.xlu1 %v5584_v49, %s4959_s28 }
 0x167   :  { %1208 = vrot.lane.b32.xlu0 %v5588_v58, %s4959_s28 }
 0x168   :  { %v857_v62 = vsel %vm532_vm0, %v795_v10, %v796_v44  ;;  %v745_v7 = vpop.permute.xlu1 %744 }
 0x169   :  { %v858_v18 = vsel %vm807_vm2, %v737_v19, %v857_v62  ;;  %v743_v32 = vpop.permute.xlu0 %742  ;;  %v799_v16 = vrot.slane %v745_v7, 4  ;;  %v5640_v62 = vld [vmem:[#allocation8 + $0x4e8] sm:$0xff] }
 0x16a   :  { %928 = vst [vmem:[#allocation8 + $0xc28] sm:$0xff] %v858_v18  ;;  %v798_v24 = vrot.slane %v743_v32, 4  ;;  %1214 = vrot.lane.b32.xlu1 %v5594_v57, %s4959_s28  ;;  %v5644_v18 = vld [vmem:[#allocation8 + $0x4e0] sm:$0xff] }
 0x16b   :  { %1212 = vrot.lane.b32.xlu0 %v5054_v3, %s4959_s28 }
 0x16c   :  { %v859_v54 = vsel %vm532_vm0, %v797_v33, %v798_v24  ;;  %v861_v22 = vsel %vm532_vm0, %v798_v24, %v799_v16  ;;  %v749_v21 = vpop.permute.xlu1 %748 }
 0x16d   :  { %v860_v13 = vsel %vm807_vm2, %v741_v2, %v859_v54  ;;  %v862_v17 = vsel %vm807_vm2, %v743_v32, %v861_v22  ;;  %v747_v29 = vpop.permute.xlu0 %746  ;;  %v801_v37 = vrot.slane %v749_v21, 4 }
 0x16e   :  { %929 = vst [vmem:[#allocation8 + $0xc30] sm:$0xff] %v860_v13  ;;  %930 = vst [vmem:[#allocation8 + $0xc38] sm:$0xff] %v862_v17  ;;  %v800_v55 = vrot.slane %v747_v29, 4  ;;  %1218 = vrot.lane.b32.xlu1 %v5083_v27, %s4959_s28  ;;  %v5650_v13 = vld [vmem:[#allocation8 + $0x4f0] sm:$0xff] }
 0x16f   :  { %1216 = vrot.lane.b32.xlu0 %v5606_v61, %s4959_s28 }
 0x170   :  { %v863_v36 = vsel %vm532_vm0, %v800_v55, %v801_v37  ;;  %v753_v4 = vpop.permute.xlu1 %752 }
 0x171   :  { %v864_v12 = vsel %vm807_vm2, %v747_v29, %v863_v36  ;;  %v751_v53 = vpop.permute.xlu0 %750  ;;  %v803_v50 = vrot.slane %v753_v4, 4 }
 0x172   :  { %931 = vst [vmem:[#allocation8 + $0xe20] sm:$0xff] %v864_v12  ;;  %v802_v38 = vrot.slane %v751_v53, 4  ;;  %1222 = vrot.lane.b32.xlu1 %v5612_v31, %s4959_s28  ;;  %v5662_v53 = vld [vmem:[#allocation8 + $0x4f8] sm:$0xff] }
 0x173   :  { %1220 = vrot.lane.b32.xlu0 %v5616_v0, %s4959_s28 }
 0x174   :  { %v865_v63 = vsel %vm532_vm0, %v801_v37, %v802_v38  ;;  %v757_v23 = vpop.permute.xlu1 %756 }
 0x175   :  { %v866_v41 = vsel %vm807_vm2, %v749_v21, %v865_v63  ;;  %v755_v39 = vpop.permute.xlu0 %754  ;;  %v805_v45 = vrot.slane %v757_v23, 4 }
 0x176   :  { %932 = vst [vmem:[#allocation8 + $0xe28] sm:$0xff] %v866_v41  ;;  %v804_v26 = vrot.slane %v755_v39, 4  ;;  %1226 = vrot.lane.b32.xlu1 %v5622_v8, %s4959_s28 }
 0x177   :  { %1224 = vrot.lane.b32.xlu0 %v5123_v59, %s4959_s28 }
 0x178   :  { %v867_v43 = vsel %vm532_vm0, %v803_v50, %v804_v26  ;;  %v869_v46 = vsel %vm532_vm0, %v804_v26, %v805_v45  ;;  %v938_v48 = vpop.permute.xlu1 %937  ;;  %v5668_v50 = vld [vmem:[#allocation8 + $0x6e8] sm:$0xff]  ;;  %v5672_v45 = vld [vmem:[#allocation8 + $0x6e0] sm:$0xff] }
 0x179   :  { %v868_v52 = vsel %vm807_vm2, %v753_v4, %v867_v43  ;;  %v870_v5 = vsel %vm807_vm2, %v755_v39, %v869_v46  ;;  %v936_v19 = vpop.permute.xlu0 %935  ;;  %v1032_v51 = vrot.slane %v938_v48, 4 }
 0x17a   :  { %933 = vst [vmem:[#allocation8 + $0xe30] sm:$0xff] %v868_v52  ;;  %934 = vst [vmem:[#allocation8 + $0xe38] sm:$0xff] %v870_v5  ;;  %v1031_v10 = vrot.slane %v936_v19, 4  ;;  %1230 = vrot.lane.b32.xlu1 %v5143_v15, %s4959_s28 }
 0x17b   :  { %1228 = vrot.lane.b32.xlu0 %v5634_v11, %s4959_s28 }
 0x17c   :  { %v1079_v56 = vsel %vm532_vm0, %v1031_v10, %v1032_v51  ;;  %v942_v2 = vpop.permute.xlu1 %941 }
 0x17d   :  { %v1081_v35 = vsel %vm1080_vm3, %v936_v19, %v1079_v56  ;;  %v940_v28 = vpop.permute.xlu0 %939  ;;  %v1034_v24 = vrot.slane %v942_v2, 4 }
 0x17e   :  { %1176 = vst [vmem:[#allocation8 + $0x40] sm:$0xff] %v1081_v35  ;;  %v1033_v44 = vrot.slane %v940_v28, 4  ;;  %1234 = vrot.lane.b32.xlu1 %v5640_v62, %s4959_s28 }
 0x17f   :  { %1232 = vrot.lane.b32.xlu0 %v5644_v18, %s4959_s28 }
 0x180   :  { %v1082_v7 = vsel %vm532_vm0, %v1032_v51, %v1033_v44  ;;  %v946_v33 = vpop.permute.xlu1 %945  ;;  %v5678_v51 = vld [vmem:[#allocation8 + $0x6f0] sm:$0xff] }
 0x181   :  { %v1083_v32 = vsel %vm1080_vm3, %v938_v48, %v1082_v7  ;;  %v944_v16 = vpop.permute.xlu0 %943  ;;  %v1036_v54 = vrot.slane %v946_v33, 4  ;;  %v5690_v33 = vld [vmem:[#allocation8 + $0x6f8] sm:$0xff] }
 0x182   :  { %1177 = vst [vmem:[#allocation8 + $0x48] sm:$0xff] %v1083_v32  ;;  %v1035_v22 = vrot.slane %v944_v16, 4  ;;  %1238 = vrot.lane.b32.xlu1 %v5650_v13, %s4959_s28 }
 0x183   :  { %1236 = vrot.lane.b32.xlu0 %v5181_v60, %s4959_s28 }
 0x184   :  { %v1084_v17 = vsel %vm532_vm0, %v1034_v24, %v1035_v22  ;;  %v1086_v21 = vsel %vm532_vm0, %v1035_v22, %v1036_v54  ;;  %v950_v55 = vpop.permute.xlu1 %949 }
 0x185   :  { %v1085_v29 = vsel %vm1080_vm3, %v942_v2, %v1084_v17  ;;  %v1087_v37 = vsel %vm1080_vm3, %v944_v16, %v1086_v21  ;;  %v948_v36 = vpop.permute.xlu0 %947  ;;  %v1038_v12 = vrot.slane %v950_v55, 4  ;;  %v5696_v21 = vld [vmem:[#allocation8 + $0x8e8] sm:$0xff] }
 0x186   :  { %1178 = vst [vmem:[#allocation8 + $0x50] sm:$0xff] %v1085_v29  ;;  %1179 = vst [vmem:[#allocation8 + $0x58] sm:$0xff] %v1087_v37  ;;  %v1037_v4 = vrot.slane %v948_v36, 4  ;;  %1242 = vrot.lane.b32.xlu1 %v5192_v1, %s4959_s28  ;;  %v5700_v29 = vld [vmem:[#allocation8 + $0x8e0] sm:$0xff] }
 0x187   :  { %1240 = vrot.lane.b32.xlu0 %v5662_v53, %s4959_s28 }
 0x188   :  { %v1088_v38 = vsel %vm532_vm0, %v1037_v4, %v1038_v12  ;;  %v954_v41 = vpop.permute.xlu1 %953 }
 0x189   :  { %v1089_v63 = vsel %vm1080_vm3, %v948_v36, %v1088_v38  ;;  %v952_v23 = vpop.permute.xlu0 %951  ;;  %v1040_v5 = vrot.slane %v954_v41, 4 }
 0x18a   :  { %1180 = vst [vmem:[#allocation8 + $0x240] sm:$0xff] %v1089_v63  ;;  %v1039_v39 = vrot.slane %v952_v23, 4  ;;  %1246 = vrot.lane.b32.xlu1 %v5668_v50, %s4959_s28 }
 0x18b   :  { %1244 = vrot.lane.b32.xlu0 %v5672_v45, %s4959_s28 }
 0x18c   :  { %v1090_v26 = vsel %vm532_vm0, %v1038_v12, %v1039_v39  ;;  %v958_v46 = vpop.permute.xlu1 %957 }
 0x18d   :  { %v1091_v43 = vsel %vm1080_vm3, %v950_v55, %v1090_v26  ;;  %v956_v52 = vpop.permute.xlu0 %955  ;;  %v1042_v48 = vrot.slane %v958_v46, 4 }
 0x18e   :  { %1181 = vst [vmem:[#allocation8 + $0x248] sm:$0xff] %v1091_v43  ;;  %v1041_v19 = vrot.slane %v956_v52, 4  ;;  %1250 = vrot.lane.b32.xlu1 %v5678_v51, %s4959_s28 }
 0x18f   :  { %1248 = vrot.lane.b32.xlu0 %v5202_v6, %s4959_s28 }
 0x190   :  { %v1092_v10 = vsel %vm532_vm0, %v1040_v5, %v1041_v19  ;;  %v1094_v56 = vsel %vm532_vm0, %v1041_v19, %v1042_v48  ;;  %v962_v28 = vpop.permute.xlu1 %961  ;;  %v5718_v19 = vld [vmem:[#allocation8 + $0x8f8] sm:$0xff] }
 0x191   :  { %v1093_v35 = vsel %vm1080_vm3, %v954_v41, %v1092_v10  ;;  %v1095_v2 = vsel %vm1080_vm3, %v956_v52, %v1094_v56  ;;  %v960_v44 = vpop.permute.xlu0 %959  ;;  %v1044_v7 = vrot.slane %v962_v28, 4  ;;  %v5706_v41 = vld [vmem:[#allocation8 + $0x8f0] sm:$0xff] }
 0x192   :  { %1182 = vst [vmem:[#allocation8 + $0x250] sm:$0xff] %v1093_v35  ;;  %1183 = vst [vmem:[#allocation8 + $0x258] sm:$0xff] %v1095_v2  ;;  %v1043_v32 = vrot.slane %v960_v44, 4  ;;  %1254 = vrot.lane.b32.xlu1 %v5208_v9, %s4959_s28 }
 0x193   :  { %1252 = vrot.lane.b32.xlu0 %v5690_v33, %s4959_s28 }
 0x194   :  { %v1096_v16 = vsel %vm532_vm0, %v1043_v32, %v1044_v7  ;;  %v966_v54 = vpop.permute.xlu1 %965 }
 0x195   :  { %v1097_v24 = vsel %vm1080_vm3, %v960_v44, %v1096_v16  ;;  %v964_v22 = vpop.permute.xlu0 %963  ;;  %v1046_v4 = vrot.slane %v966_v54, 4  ;;  %v5724_v44 = vld [vmem:[#allocation8 + $0xae8] sm:$0xff] }
 0x196   :  { %1184 = vst [vmem:[#allocation8 + $0x440] sm:$0xff] %v1097_v24  ;;  %v1045_v17 = vrot.slane %v964_v22, 4  ;;  %1258 = vrot.lane.b32.xlu1 %v5696_v21, %s4959_s28 }
 0x197   :  { %1256 = vrot.lane.b32.xlu0 %v5700_v29, %s4959_s28 }
 0x198   :  { %v1098_v37 = vsel %vm532_vm0, %v1044_v7, %v1045_v17  ;;  %v970_v36 = vpop.permute.xlu1 %969  ;;  %v5728_v7 = vld [vmem:[#allocation8 + $0xae0] sm:$0xff] }
 0x199   :  { %v1099_v55 = vsel %vm1080_vm3, %v962_v28, %v1098_v37  ;;  %v968_v12 = vpop.permute.xlu0 %967  ;;  %v1048_v38 = vrot.slane %v970_v36, 4 }
 0x19a   :  { %1185 = vst [vmem:[#allocation8 + $0x448] sm:$0xff] %v1099_v55  ;;  %v1047_v63 = vrot.slane %v968_v12, 4  ;;  %1262 = vrot.lane.b32.xlu1 %v5706_v41, %s4959_s28  ;;  %v5734_v55 = vld [vmem:[#allocation8 + $0xaf0] sm:$0xff] }
 0x19b   :  { %1260 = vrot.lane.b32.xlu0 %v5218_v14, %s4959_s28 }
 0x19c   :  { %v1100_v23 = vsel %vm532_vm0, %v1046_v4, %v1047_v63  ;;  %v1102_v39 = vsel %vm532_vm0, %v1047_v63, %v1048_v38  ;;  %v974_v46 = vpop.permute.xlu1 %973 }
 0x19d   :  { %v1101_v26 = vsel %vm1080_vm3, %v966_v54, %v1100_v23  ;;  %v1103_v43 = vsel %vm1080_vm3, %v968_v12, %v1102_v39  ;;  %v972_v52 = vpop.permute.xlu0 %971  ;;  %v1050_v5 = vrot.slane %v974_v46, 4 }
 0x19e   :  { %1186 = vst [vmem:[#allocation8 + $0x450] sm:$0xff] %v1101_v26  ;;  %1187 = vst [vmem:[#allocation8 + $0x458] sm:$0xff] %v1103_v43  ;;  %v1049_v48 = vrot.slane %v972_v52, 4  ;;  %1266 = vrot.lane.b32.xlu1 %v5224_v20, %s4959_s28  ;;  %v5746_v43 = vld [vmem:[#allocation8 + $0xaf8] sm:$0xff] }
 0x19f   :  { %1264 = vrot.lane.b32.xlu0 %v5718_v19, %s4959_s28 }
 0x1a0   :  { %v1104_v10 = vsel %vm532_vm0, %v1049_v48, %v1050_v5  ;;  %v978_v35 = vpop.permute.xlu1 %977 }
 0x1a1   :  { %v1105_v56 = vsel %vm1080_vm3, %v972_v52, %v1104_v10  ;;  %v976_v2 = vpop.permute.xlu0 %975  ;;  %v1052_v22 = vrot.slane %v978_v35, 4 }
 0x1a2   :  { %1188 = vst [vmem:[#allocation8 + $0x640] sm:$0xff] %v1105_v56  ;;  %v1051_v28 = vrot.slane %v976_v2, 4  ;;  %1270 = vrot.lane.b32.xlu1 %v5724_v44, %s4959_s28  ;;  %v5752_v56 = vld [vmem:[#allocation8 + $0xce8] sm:$0xff] }
 0x1a3   :  { %1268 = vrot.lane.b32.xlu0 %v5728_v7, %s4959_s28 }
 0x1a4   :  { %v1106_v32 = vsel %vm532_vm0, %v1050_v5, %v1051_v28  ;;  %v982_v24 = vpop.permute.xlu1 %981 }
 0x1a5   :  { %v1107_v16 = vsel %vm1080_vm3, %v974_v46, %v1106_v32  ;;  %v980_v54 = vpop.permute.xlu0 %979  ;;  %v1054_v17 = vrot.slane %v982_v24, 4 }
 0x1a6   :  { %1189 = vst [vmem:[#allocation8 + $0x648] sm:$0xff] %v1107_v16  ;;  %v1053_v37 = vrot.slane %v980_v54, 4  ;;  %1274 = vrot.lane.b32.xlu1 %v5734_v55, %s4959_s28 }
 0x1a7   :  { %1272 = vrot.lane.b32.xlu0 %v5234_v25, %s4959_s28 }
 0x1a8   :  { %v1108_v36 = vsel %vm532_vm0, %v1052_v22, %v1053_v37  ;;  %v1110_v12 = vsel %vm532_vm0, %v1053_v37, %v1054_v17  ;;  %v986_v63 = vpop.permute.xlu1 %985  ;;  %v5762_v17 = vld [vmem:[#allocation8 + $0xcf0] sm:$0xff] }
 0x1a9   :  { %v1109_v4 = vsel %vm1080_vm3, %v978_v35, %v1108_v36  ;;  %v1111_v38 = vsel %vm1080_vm3, %v980_v54, %v1110_v12  ;;  %v984_v23 = vpop.permute.xlu0 %983  ;;  %v1056_v39 = vrot.slane %v986_v63, 4  ;;  %v5756_v35 = vld [vmem:[#allocation8 + $0xce0] sm:$0xff] }
 0x1aa   :  { %1190 = vst [vmem:[#allocation8 + $0x650] sm:$0xff] %v1109_v4  ;;  %1191 = vst [vmem:[#allocation8 + $0x658] sm:$0xff] %v1111_v38  ;;  %v1055_v26 = vrot.slane %v984_v23, 4  ;;  %1278 = vrot.lane.b32.xlu1 %v5240_v30, %s4959_s28 }
 0x1ab   :  { %1276 = vrot.lane.b32.xlu0 %v5746_v43, %s4959_s28 }
 0x1ac   :  { %v1112_v46 = vsel %vm532_vm0, %v1055_v26, %v1056_v39  ;;  %v990_v5 = vpop.permute.xlu1 %989  ;;  %v5774_v26 = vld [vmem:[#allocation8 + $0xcf8] sm:$0xff] }
 0x1ad   :  { %v1113_v52 = vsel %vm1080_vm3, %v984_v23, %v1112_v46  ;;  %v988_v48 = vpop.permute.xlu0 %987  ;;  %v1058_v24 = vrot.slane %v990_v5, 4 }
 0x1ae   :  { %1192 = vst [vmem:[#allocation8 + $0x840] sm:$0xff] %v1113_v52  ;;  %v1057_v10 = vrot.slane %v988_v48, 4  ;;  %1282 = vrot.lane.b32.xlu1 %v5752_v56, %s4959_s28 }
 0x1af   :  { %1280 = vrot.lane.b32.xlu0 %v5756_v35, %s4959_s28 }
 0x1b0   :  { %v1114_v2 = vsel %vm532_vm0, %v1056_v39, %v1057_v10  ;;  %v994_v32 = vpop.permute.xlu1 %993 }
 0x1b1   :  { %v1115_v28 = vsel %vm1080_vm3, %v986_v63, %v1114_v2  ;;  %v992_v16 = vpop.permute.xlu0 %991  ;;  %v1060_v54 = vrot.slane %v994_v32, 4  ;;  %v5780_v2 = vld [vmem:[#allocation8 + $0xee8] sm:$0xff] }
 0x1b2   :  { %1193 = vst [vmem:[#allocation8 + $0x848] sm:$0xff] %v1115_v28  ;;  %v1059_v22 = vrot.slane %v992_v16, 4  ;;  %1286 = vrot.lane.b32.xlu1 %v5762_v17, %s4959_s28  ;;  %v5784_v28 = vld [vmem:[#allocation8 + $0xee0] sm:$0xff] }
 0x1b3   :  { %1284 = vrot.lane.b32.xlu0 %v5250_v34, %s4959_s28 }
 0x1b4   :  { %v1116_v37 = vsel %vm532_vm0, %v1058_v24, %v1059_v22  ;;  %v1118_v36 = vsel %vm532_vm0, %v1059_v22, %v1060_v54  ;;  %v998_v38 = vpop.permute.xlu1 %997 }
 0x1b5   :  { %v1117_v12 = vsel %vm1080_vm3, %v990_v5, %v1116_v37  ;;  %v1119_v4 = vsel %vm1080_vm3, %v992_v16, %v1118_v36  ;;  %v996_v63 = vpop.permute.xlu0 %995  ;;  %v1062_v23 = vrot.slane %v998_v38, 4 }
 0x1b6   :  { %1194 = vst [vmem:[#allocation8 + $0x850] sm:$0xff] %v1117_v12  ;;  %1195 = vst [vmem:[#allocation8 + $0x858] sm:$0xff] %v1119_v4  ;;  %v1061_v39 = vrot.slane %v996_v63, 4  ;;  %1290 = vrot.lane.b32.xlu1 %v5256_v40, %s4959_s28  ;;  %v5790_v12 = vld [vmem:[#allocation8 + $0xef0] sm:$0xff] }
 0x1b7   :  { %1288 = vrot.lane.b32.xlu0 %v5774_v26, %s4959_s28 }
 0x1b8   :  { %v1120_v46 = vsel %vm532_vm0, %v1061_v39, %v1062_v23  ;;  %v1002_v5 = vpop.permute.xlu1 %1001 }
 0x1b9   :  { %v1121_v52 = vsel %vm1080_vm3, %v996_v63, %v1120_v46  ;;  %v1000_v48 = vpop.permute.xlu0 %999  ;;  %v1064_v22 = vrot.slane %v1002_v5, 4 }
 0x1ba   :  { %1196 = vst [vmem:[#allocation8 + $0xa40] sm:$0xff] %v1121_v52  ;;  %v1063_v10 = vrot.slane %v1000_v48, 4  ;;  %1294 = vrot.lane.b32.xlu1 %v5780_v2, %s4959_s28 }
 0x1bb   :  { %1292 = vrot.lane.b32.xlu0 %v5784_v28, %s4959_s28 }
 0x1bc   :  { %v1122_v32 = vsel %vm532_vm0, %v1062_v23, %v1063_v10  ;;  %v1006_v24 = vpop.permute.xlu1 %1005  ;;  %v5802_v10 = vld [vmem:[#allocation8 + $0xef8] sm:$0xff] }
 0x1bd   :  { %v1123_v16 = vsel %vm1080_vm3, %v998_v38, %v1122_v32  ;;  %v1004_v54 = vpop.permute.xlu0 %1003  ;;  %v1066_v37 = vrot.slane %v1006_v24, 4 }
 0x1be   :  { %1197 = vst [vmem:[#allocation8 + $0xa48] sm:$0xff] %v1123_v16  ;;  %v1065_v36 = vrot.slane %v1004_v54, 4  ;;  %1298 = vrot.lane.b32.xlu1 %v5790_v12, %s4959_s28 }
 0x1bf   :  { %1296 = vrot.lane.b32.xlu0 %v5266_v42, %s4959_s28 }
 0x1c0   :  { %v1124_v4 = vsel %vm532_vm0, %v1064_v22, %v1065_v36  ;;  %v1126_v63 = vsel %vm532_vm0, %v1065_v36, %v1066_v37  ;;  %v1010_v39 = vpop.permute.xlu1 %1009 }
 0x1c1   :  { %v1125_v38 = vsel %vm1080_vm3, %v1002_v5, %v1124_v4  ;;  %v1127_v23 = vsel %vm1080_vm3, %v1004_v54, %v1126_v63  ;;  %v1008_v46 = vpop.permute.xlu0 %1007  ;;  %v1068_v52 = vrot.slane %v1010_v39, 4 }
 0x1c2   :  { %1198 = vst [vmem:[#allocation8 + $0xa50] sm:$0xff] %v1125_v38  ;;  %1199 = vst [vmem:[#allocation8 + $0xa58] sm:$0xff] %v1127_v23  ;;  %v1067_v48 = vrot.slane %v1008_v46, 4  ;;  %1302 = vrot.lane.b32.xlu1 %v5272_v47, %s4959_s28 }
 0x1c3   :  { %1300 = vrot.lane.b32.xlu0 %v5802_v10, %s4959_s28 }
 0x1c4   :  { %v1128_v32 = vsel %vm532_vm0, %v1067_v48, %v1068_v52  ;;  %v1014_v16 = vpop.permute.xlu1 %1013 }
 0x1c5   :  { %v1129_v5 = vsel %vm1080_vm3, %v1008_v46, %v1128_v32  ;;  %v1012_v24 = vpop.permute.xlu0 %1011  ;;  %v1070_v63 = vrot.slane %v1014_v16, 4 }
 0x1c6   :  { %1200 = vst [vmem:[#allocation8 + $0xc40] sm:$0xff] %v1129_v5  ;;  %v1069_v54 = vrot.slane %v1012_v24, 4  ;;  %1483 = vrot.lane.b32.xlu1 %v5584_v49, %s4960_s29 }
 0x1c7   :  { %1481 = vrot.lane.b32.xlu0 %v5588_v58, %s4960_s29 }
 0x1c8   :  { %v1130_v22 = vsel %vm532_vm0, %v1068_v52, %v1069_v54  ;;  %v1018_v36 = vpop.permute.xlu1 %1017 }
 0x1c9   :  { %v1131_v37 = vsel %vm1080_vm3, %v1010_v39, %v1130_v22  ;;  %v1016_v4 = vpop.permute.xlu0 %1015  ;;  %v1072_v38 = vrot.slane %v1018_v36, 4 }
 0x1ca   :  { %1201 = vst [vmem:[#allocation8 + $0xc48] sm:$0xff] %v1131_v37  ;;  %v1071_v23 = vrot.slane %v1016_v4, 4  ;;  %1487 = vrot.lane.b32.xlu1 %v5594_v57, %s4960_s29 }
 0x1cb   :  { %1485 = vrot.lane.b32.xlu0 %v5054_v3, %s4960_s29 }
 0x1cc   :  { %v1132_v46 = vsel %vm532_vm0, %v1070_v63, %v1071_v23  ;;  %v1134_v48 = vsel %vm532_vm0, %v1071_v23, %v1072_v38  ;;  %v1022_v32 = vpop.permute.xlu1 %1021 }
 0x1cd   :  { %v1133_v52 = vsel %vm1080_vm3, %v1014_v16, %v1132_v46  ;;  %v1135_v39 = vsel %vm1080_vm3, %v1016_v4, %v1134_v48  ;;  %v1020_v5 = vpop.permute.xlu0 %1019  ;;  %v1074_v24 = vrot.slane %v1022_v32, 4 }
 0x1ce   :  { %1202 = vst [vmem:[#allocation8 + $0xc50] sm:$0xff] %v1133_v52  ;;  %1203 = vst [vmem:[#allocation8 + $0xc58] sm:$0xff] %v1135_v39  ;;  %v1073_v54 = vrot.slane %v1020_v5, 4  ;;  %1491 = vrot.lane.b32.xlu1 %v5083_v27, %s4960_s29 }
 0x1cf   :  { %1489 = vrot.lane.b32.xlu0 %v5606_v61, %s4960_s29 }
 0x1d0   :  { %v1136_v22 = vsel %vm532_vm0, %v1073_v54, %v1074_v24  ;;  %v1026_v36 = vpop.permute.xlu1 %1025 }
 0x1d1   :  { %v1137_v37 = vsel %vm1080_vm3, %v1020_v5, %v1136_v22  ;;  %v1024_v16 = vpop.permute.xlu0 %1023  ;;  %v1076_v48 = vrot.slane %v1026_v36, 4 }
 0x1d2   :  { %1204 = vst [vmem:[#allocation8 + $0xe40] sm:$0xff] %v1137_v37  ;;  %v1075_v4 = vrot.slane %v1024_v16, 4  ;;  %1495 = vrot.lane.b32.xlu1 %v5612_v31, %s4960_s29 }
 0x1d3   :  { %1493 = vrot.lane.b32.xlu0 %v5616_v0, %s4960_s29 }
 0x1d4   :  { %v1138_v63 = vsel %vm532_vm0, %v1074_v24, %v1075_v4  ;;  %v1030_v23 = vpop.permute.xlu1 %1029 }
 0x1d5   :  { %v1139_v38 = vsel %vm1080_vm3, %v1022_v32, %v1138_v63  ;;  %v1028_v46 = vpop.permute.xlu0 %1027  ;;  %v1078_v52 = vrot.slane %v1030_v23, 4 }
 0x1d6   :  { %1205 = vst [vmem:[#allocation8 + $0xe48] sm:$0xff] %v1139_v38  ;;  %v1077_v39 = vrot.slane %v1028_v46, 4  ;;  %1499 = vrot.lane.b32.xlu1 %v5622_v8, %s4960_s29 }
 0x1d7   :  { %1497 = vrot.lane.b32.xlu0 %v5123_v59, %s4960_s29 }
 0x1d8   :  { %v1140_v5 = vsel %vm532_vm0, %v1076_v48, %v1077_v39  ;;  %v1142_v54 = vsel %vm532_vm0, %v1077_v39, %v1078_v52  ;;  %v1211_v22 = vpop.permute.xlu1 %1210 }
 0x1d9   :  { %v1141_v24 = vsel %vm1080_vm3, %v1026_v36, %v1140_v5  ;;  %v1143_v32 = vsel %vm1080_vm3, %v1028_v46, %v1142_v54  ;;  %v1209_v37 = vpop.permute.xlu0 %1208  ;;  %v1305_v16 = vrot.slane %v1211_v22, 4 }
 0x1da   :  { %1206 = vst [vmem:[#allocation8 + $0xe50] sm:$0xff] %v1141_v24  ;;  %1207 = vst [vmem:[#allocation8 + $0xe58] sm:$0xff] %v1143_v32  ;;  %v1304_v4 = vrot.slane %v1209_v37, 4  ;;  %1503 = vrot.lane.b32.xlu1 %v5143_v15, %s4960_s29 }
 0x1db   :  { %1501 = vrot.lane.b32.xlu0 %v5634_v11, %s4960_s29 }
 0x1dc   :  { %v1352_v63 = vsel %vm532_vm0, %v1304_v4, %v1305_v16  ;;  %v1215_v36 = vpop.permute.xlu1 %1214 }
 0x1dd   :  { %v1354_v38 = vsel %vm1353_vm4, %v1209_v37, %v1352_v63  ;;  %v1213_v23 = vpop.permute.xlu0 %1212  ;;  %v1307_v54 = vrot.slane %v1215_v36, 4 }
 0x1de   :  { %1449 = vst [vmem:[#allocation8 + $0x60] sm:$0xff] %v1354_v38  ;;  %v1306_v46 = vrot.slane %v1213_v23, 4  ;;  %1507 = vrot.lane.b32.xlu1 %v5640_v62, %s4960_s29 }
 0x1df   :  { %1505 = vrot.lane.b32.xlu0 %v5644_v18, %s4960_s29 }
 0x1e0   :  { %v1355_v48 = vsel %vm532_vm0, %v1305_v16, %v1306_v46  ;;  %v1219_v39 = vpop.permute.xlu1 %1218 }
 0x1e1   :  { %v1356_v52 = vsel %vm1353_vm4, %v1211_v22, %v1355_v48  ;;  %v1217_v5 = vpop.permute.xlu0 %1216  ;;  %v1309_v24 = vrot.slane %v1219_v39, 4 }
 0x1e2   :  { %1450 = vst [vmem:[#allocation8 + $0x68] sm:$0xff] %v1356_v52  ;;  %v1308_v32 = vrot.slane %v1217_v5, 4  ;;  %1511 = vrot.lane.b32.xlu1 %v5650_v13, %s4960_s29 }
 0x1e3   :  { %1509 = vrot.lane.b32.xlu0 %v5181_v60, %s4960_s29 }
 0x1e4   :  { %v1357_v37 = vsel %vm532_vm0, %v1307_v54, %v1308_v32  ;;  %v1359_v4 = vsel %vm532_vm0, %v1308_v32, %v1309_v24  ;;  %v1223_v63 = vpop.permute.xlu1 %1222 }
 0x1e5   :  { %v1358_v16 = vsel %vm1353_vm4, %v1215_v36, %v1357_v37  ;;  %v1360_v22 = vsel %vm1353_vm4, %v1217_v5, %v1359_v4  ;;  %v1221_v38 = vpop.permute.xlu0 %1220  ;;  %v1311_v23 = vrot.slane %v1223_v63, 4 }
 0x1e6   :  { %1451 = vst [vmem:[#allocation8 + $0x70] sm:$0xff] %v1358_v16  ;;  %1452 = vst [vmem:[#allocation8 + $0x78] sm:$0xff] %v1360_v22  ;;  %v1310_v46 = vrot.slane %v1221_v38, 4  ;;  %1515 = vrot.lane.b32.xlu1 %v5192_v1, %s4960_s29 }
 0x1e7   :  { %1513 = vrot.lane.b32.xlu0 %v5662_v53, %s4960_s29 }
 0x1e8   :  { %v1361_v48 = vsel %vm532_vm0, %v1310_v46, %v1311_v23  ;;  %v1227_v39 = vpop.permute.xlu1 %1226 }
 0x1e9   :  { %v1362_v52 = vsel %vm1353_vm4, %v1221_v38, %v1361_v48  ;;  %v1225_v36 = vpop.permute.xlu0 %1224  ;;  %v1313_v4 = vrot.slane %v1227_v39, 4 }
 0x1ea   :  { %1453 = vst [vmem:[#allocation8 + $0x260] sm:$0xff] %v1362_v52  ;;  %v1312_v5 = vrot.slane %v1225_v36, 4  ;;  %1519 = vrot.lane.b32.xlu1 %v5668_v50, %s4960_s29 }
 0x1eb   :  { %1517 = vrot.lane.b32.xlu0 %v5672_v45, %s4960_s29 }
 0x1ec   :  { %v1363_v54 = vsel %vm532_vm0, %v1311_v23, %v1312_v5  ;;  %v1231_v32 = vpop.permute.xlu1 %1230 }
 0x1ed   :  { %v1364_v24 = vsel %vm1353_vm4, %v1223_v63, %v1363_v54  ;;  %v1229_v37 = vpop.permute.xlu0 %1228  ;;  %v1315_v16 = vrot.slane %v1231_v32, 4 }
 0x1ee   :  { %1454 = vst [vmem:[#allocation8 + $0x268] sm:$0xff] %v1364_v24  ;;  %v1314_v22 = vrot.slane %v1229_v37, 4  ;;  %1523 = vrot.lane.b32.xlu1 %v5678_v51, %s4960_s29 }
 0x1ef   :  { %1521 = vrot.lane.b32.xlu0 %v5202_v6, %s4960_s29 }
 0x1f0   :  { %v1365_v38 = vsel %vm532_vm0, %v1313_v4, %v1314_v22  ;;  %v1367_v46 = vsel %vm532_vm0, %v1314_v22, %v1315_v16  ;;  %v1235_v48 = vpop.permute.xlu1 %1234 }
 0x1f1   :  { %v1366_v23 = vsel %vm1353_vm4, %v1227_v39, %v1365_v38  ;;  %v1368_v63 = vsel %vm1353_vm4, %v1229_v37, %v1367_v46  ;;  %v1233_v52 = vpop.permute.xlu0 %1232  ;;  %v1317_v36 = vrot.slane %v1235_v48, 4 }
 0x1f2   :  { %1455 = vst [vmem:[#allocation8 + $0x270] sm:$0xff] %v1366_v23  ;;  %1456 = vst [vmem:[#allocation8 + $0x278] sm:$0xff] %v1368_v63  ;;  %v1316_v5 = vrot.slane %v1233_v52, 4  ;;  %1527 = vrot.lane.b32.xlu1 %v5208_v9, %s4960_s29 }
 0x1f3   :  { %1525 = vrot.lane.b32.xlu0 %v5690_v33, %s4960_s29 }
 0x1f4   :  { %v1369_v54 = vsel %vm532_vm0, %v1316_v5, %v1317_v36  ;;  %v1239_v32 = vpop.permute.xlu1 %1238 }
 0x1f5   :  { %v1370_v24 = vsel %vm1353_vm4, %v1233_v52, %v1369_v54  ;;  %v1237_v39 = vpop.permute.xlu0 %1236  ;;  %v1319_v46 = vrot.slane %v1239_v32, 4 }
 0x1f6   :  { %1457 = vst [vmem:[#allocation8 + $0x460] sm:$0xff] %v1370_v24  ;;  %v1318_v37 = vrot.slane %v1237_v39, 4  ;;  %1531 = vrot.lane.b32.xlu1 %v5696_v21, %s4960_s29 }
 0x1f7   :  { %1529 = vrot.lane.b32.xlu0 %v5700_v29, %s4960_s29 }
 0x1f8   :  { %v1371_v4 = vsel %vm532_vm0, %v1317_v36, %v1318_v37  ;;  %v1243_v22 = vpop.permute.xlu1 %1242 }
 0x1f9   :  { %v1372_v16 = vsel %vm1353_vm4, %v1235_v48, %v1371_v4  ;;  %v1241_v38 = vpop.permute.xlu0 %1240  ;;  %v1321_v23 = vrot.slane %v1243_v22, 4 }
 0x1fa   :  { %1458 = vst [vmem:[#allocation8 + $0x468] sm:$0xff] %v1372_v16  ;;  %v1320_v63 = vrot.slane %v1241_v38, 4  ;;  %1535 = vrot.lane.b32.xlu1 %v5706_v41, %s4960_s29 }
 0x1fb   :  { %1533 = vrot.lane.b32.xlu0 %v5218_v14, %s4960_s29 }
 0x1fc   :  { %v1373_v52 = vsel %vm532_vm0, %v1319_v46, %v1320_v63  ;;  %v1375_v5 = vsel %vm532_vm0, %v1320_v63, %v1321_v23  ;;  %v1247_v54 = vpop.permute.xlu1 %1246 }
 0x1fd   :  { %v1374_v36 = vsel %vm1353_vm4, %v1239_v32, %v1373_v52  ;;  %v1376_v48 = vsel %vm1353_vm4, %v1241_v38, %v1375_v5  ;;  %v1245_v24 = vpop.permute.xlu0 %1244  ;;  %v1323_v39 = vrot.slane %v1247_v54, 4 }
 0x1fe   :  { %1459 = vst [vmem:[#allocation8 + $0x470] sm:$0xff] %v1374_v36  ;;  %1460 = vst [vmem:[#allocation8 + $0x478] sm:$0xff] %v1376_v48  ;;  %v1322_v37 = vrot.slane %v1245_v24, 4  ;;  %1539 = vrot.lane.b32.xlu1 %v5224_v20, %s4960_s29 }
 0x1ff   :  { %1537 = vrot.lane.b32.xlu0 %v5718_v19, %s4960_s29 }
 0x200   :  { %v1377_v4 = vsel %vm532_vm0, %v1322_v37, %v1323_v39  ;;  %v1251_v22 = vpop.permute.xlu1 %1250 }
 0x201   :  { %v1378_v16 = vsel %vm1353_vm4, %v1245_v24, %v1377_v4  ;;  %v1249_v32 = vpop.permute.xlu0 %1248  ;;  %v1325_v5 = vrot.slane %v1251_v22, 4 }
 0x202   :  { %1461 = vst [vmem:[#allocation8 + $0x660] sm:$0xff] %v1378_v16  ;;  %v1324_v38 = vrot.slane %v1249_v32, 4  ;;  %1543 = vrot.lane.b32.xlu1 %v5724_v44, %s4960_s29 }
 0x203   :  { %1541 = vrot.lane.b32.xlu0 %v5728_v7, %s4960_s29 }
 0x204   :  { %v1379_v46 = vsel %vm532_vm0, %v1323_v39, %v1324_v38  ;;  %v1255_v63 = vpop.permute.xlu1 %1254 }
 0x205   :  { %v1380_v23 = vsel %vm1353_vm4, %v1247_v54, %v1379_v46  ;;  %v1253_v52 = vpop.permute.xlu0 %1252  ;;  %v1327_v36 = vrot.slane %v1255_v63, 4 }
 0x206   :  { %1462 = vst [vmem:[#allocation8 + $0x668] sm:$0xff] %v1380_v23  ;;  %v1326_v48 = vrot.slane %v1253_v52, 4  ;;  %1547 = vrot.lane.b32.xlu1 %v5734_v55, %s4960_s29 }
 0x207   :  { %1545 = vrot.lane.b32.xlu0 %v5234_v25, %s4960_s29 }
 0x208   :  { %v1381_v24 = vsel %vm532_vm0, %v1325_v5, %v1326_v48  ;;  %v1383_v37 = vsel %vm532_vm0, %v1326_v48, %v1327_v36  ;;  %v1259_v4 = vpop.permute.xlu1 %1258 }
 0x209   :  { %v1382_v39 = vsel %vm1353_vm4, %v1251_v22, %v1381_v24  ;;  %v1384_v54 = vsel %vm1353_vm4, %v1253_v52, %v1383_v37  ;;  %v1257_v16 = vpop.permute.xlu0 %1256  ;;  %v1329_v32 = vrot.slane %v1259_v4, 4 }
 0x20a   :  { %1463 = vst [vmem:[#allocation8 + $0x670] sm:$0xff] %v1382_v39  ;;  %1464 = vst [vmem:[#allocation8 + $0x678] sm:$0xff] %v1384_v54  ;;  %v1328_v38 = vrot.slane %v1257_v16, 4  ;;  %1551 = vrot.lane.b32.xlu1 %v5240_v30, %s4960_s29 }
 0x20b   :  { %1549 = vrot.lane.b32.xlu0 %v5746_v43, %s4960_s29 }
 0x20c   :  { %v1385_v46 = vsel %vm532_vm0, %v1328_v38, %v1329_v32  ;;  %v1263_v63 = vpop.permute.xlu1 %1262 }
 0x20d   :  { %v1386_v23 = vsel %vm1353_vm4, %v1257_v16, %v1385_v46  ;;  %v1261_v22 = vpop.permute.xlu0 %1260  ;;  %v1331_v37 = vrot.slane %v1263_v63, 4 }
 0x20e   :  { %1465 = vst [vmem:[#allocation8 + $0x860] sm:$0xff] %v1386_v23  ;;  %v1330_v52 = vrot.slane %v1261_v22, 4  ;;  %1555 = vrot.lane.b32.xlu1 %v5752_v56, %s4960_s29 }
 0x20f   :  { %1553 = vrot.lane.b32.xlu0 %v5756_v35, %s4960_s29 }
 0x210   :  { %v1387_v5 = vsel %vm532_vm0, %v1329_v32, %v1330_v52  ;;  %v1267_v48 = vpop.permute.xlu1 %1266 }
 0x211   :  { %v1388_v36 = vsel %vm1353_vm4, %v1259_v4, %v1387_v5  ;;  %v1265_v24 = vpop.permute.xlu0 %1264  ;;  %v1333_v39 = vrot.slane %v1267_v48, 4 }
 0x212   :  { %1466 = vst [vmem:[#allocation8 + $0x868] sm:$0xff] %v1388_v36  ;;  %v1332_v54 = vrot.slane %v1265_v24, 4  ;;  %1559 = vrot.lane.b32.xlu1 %v5762_v17, %s4960_s29 }
 0x213   :  { %1557 = vrot.lane.b32.xlu0 %v5250_v34, %s4960_s29 }
 0x214   :  { %v1389_v16 = vsel %vm532_vm0, %v1331_v37, %v1332_v54  ;;  %v1391_v38 = vsel %vm532_vm0, %v1332_v54, %v1333_v39  ;;  %v1271_v46 = vpop.permute.xlu1 %1270 }
 0x215   :  { %v1390_v32 = vsel %vm1353_vm4, %v1263_v63, %v1389_v16  ;;  %v1392_v4 = vsel %vm1353_vm4, %v1265_v24, %v1391_v38  ;;  %v1269_v23 = vpop.permute.xlu0 %1268  ;;  %v1335_v22 = vrot.slane %v1271_v46, 4 }
 0x216   :  { %1467 = vst [vmem:[#allocation8 + $0x870] sm:$0xff] %v1390_v32  ;;  %1468 = vst [vmem:[#allocation8 + $0x878] sm:$0xff] %v1392_v4  ;;  %v1334_v52 = vrot.slane %v1269_v23, 4  ;;  %1563 = vrot.lane.b32.xlu1 %v5256_v40, %s4960_s29 }
 0x217   :  { %1561 = vrot.lane.b32.xlu0 %v5774_v26, %s4960_s29 }
 0x218   :  { %v1393_v5 = vsel %vm532_vm0, %v1334_v52, %v1335_v22  ;;  %v1275_v48 = vpop.permute.xlu1 %1274 }
 0x219   :  { %v1394_v36 = vsel %vm1353_vm4, %v1269_v23, %v1393_v5  ;;  %v1273_v63 = vpop.permute.xlu0 %1272  ;;  %v1337_v38 = vrot.slane %v1275_v48, 4 }
 0x21a   :  { %1469 = vst [vmem:[#allocation8 + $0xa60] sm:$0xff] %v1394_v36  ;;  %v1336_v24 = vrot.slane %v1273_v63, 4  ;;  %1567 = vrot.lane.b32.xlu1 %v5780_v2, %s4960_s29 }
 0x21b   :  { %1565 = vrot.lane.b32.xlu0 %v5784_v28, %s4960_s29 }
 0x21c   :  { %v1395_v37 = vsel %vm532_vm0, %v1335_v22, %v1336_v24  ;;  %v1279_v54 = vpop.permute.xlu1 %1278 }
 0x21d   :  { %v1396_v39 = vsel %vm1353_vm4, %v1271_v46, %v1395_v37  ;;  %v1277_v16 = vpop.permute.xlu0 %1276  ;;  %v1339_v32 = vrot.slane %v1279_v54, 4 }
 0x21e   :  { %1470 = vst [vmem:[#allocation8 + $0xa68] sm:$0xff] %v1396_v39  ;;  %v1338_v4 = vrot.slane %v1277_v16, 4  ;;  %1571 = vrot.lane.b32.xlu1 %v5790_v12, %s4960_s29 }
 0x21f   :  { %1569 = vrot.lane.b32.xlu0 %v5266_v42, %s4960_s29 }
 0x220   :  { %v1397_v23 = vsel %vm532_vm0, %v1337_v38, %v1338_v4  ;;  %v1399_v52 = vsel %vm532_vm0, %v1338_v4, %v1339_v32  ;;  %v1283_v5 = vpop.permute.xlu1 %1282 }
 0x221   :  { %v1398_v22 = vsel %vm1353_vm4, %v1275_v48, %v1397_v23  ;;  %v1400_v46 = vsel %vm1353_vm4, %v1277_v16, %v1399_v52  ;;  %v1281_v36 = vpop.permute.xlu0 %1280  ;;  %v1341_v63 = vrot.slane %v1283_v5, 4 }
 0x222   :  { %1471 = vst [vmem:[#allocation8 + $0xa70] sm:$0xff] %v1398_v22  ;;  %1472 = vst [vmem:[#allocation8 + $0xa78] sm:$0xff] %v1400_v46  ;;  %v1340_v24 = vrot.slane %v1281_v36, 4  ;;  %1575 = vrot.lane.b32.xlu1 %v5272_v47, %s4960_s29 }
 0x223   :  { %1573 = vrot.lane.b32.xlu0 %v5802_v10, %s4960_s29 }
 0x224   :  { %v1401_v37 = vsel %vm532_vm0, %v1340_v24, %v1341_v63  ;;  %v1287_v54 = vpop.permute.xlu1 %1286 }
 0x225   :  { %v1402_v39 = vsel %vm1353_vm4, %v1281_v36, %v1401_v37  ;;  %v1285_v48 = vpop.permute.xlu0 %1284  ;;  %v1343_v52 = vrot.slane %v1287_v54, 4 }
 0x226   :  { %1473 = vst [vmem:[#allocation8 + $0xc60] sm:$0xff] %v1402_v39  ;;  %v1342_v16 = vrot.slane %v1285_v48, 4  ;;  %1756 = vrot.lane.b32.xlu1 %v5584_v49, %s4961_s5 }
 0x227   :  { %1754 = vrot.lane.b32.xlu0 %v5588_v58, %s4961_s5 }
 0x228   :  { %v1403_v38 = vsel %vm532_vm0, %v1341_v63, %v1342_v16  ;;  %v1291_v4 = vpop.permute.xlu1 %1290 }
 0x229   :  { %v1404_v32 = vsel %vm1353_vm4, %v1283_v5, %v1403_v38  ;;  %v1289_v23 = vpop.permute.xlu0 %1288  ;;  %v1345_v22 = vrot.slane %v1291_v4, 4 }
 0x22a   :  { %1474 = vst [vmem:[#allocation8 + $0xc68] sm:$0xff] %v1404_v32  ;;  %v1344_v46 = vrot.slane %v1289_v23, 4  ;;  %1760 = vrot.lane.b32.xlu1 %v5594_v57, %s4961_s5 }
 0x22b   :  { %1758 = vrot.lane.b32.xlu0 %v5054_v3, %s4961_s5 }
 0x22c   :  { %v1405_v49 = vsel %vm532_vm0, %v1343_v52, %v1344_v46  ;;  %v1407_v58 = vsel %vm532_vm0, %v1344_v46, %v1345_v22  ;;  %v1295_v63 = vpop.permute.xlu1 %1294 }
 0x22d   :  { %v1406_v36 = vsel %vm1353_vm4, %v1287_v54, %v1405_v49  ;;  %v1408_v5 = vsel %vm1353_vm4, %v1289_v23, %v1407_v58  ;;  %v1293_v24 = vpop.permute.xlu0 %1292  ;;  %v1347_v37 = vrot.slane %v1295_v63, 4 }
 0x22e   :  { %1475 = vst [vmem:[#allocation8 + $0xc70] sm:$0xff] %v1406_v36  ;;  %1476 = vst [vmem:[#allocation8 + $0xc78] sm:$0xff] %v1408_v5  ;;  %v1346_v39 = vrot.slane %v1293_v24, 4  ;;  %1764 = vrot.lane.b32.xlu1 %v5083_v27, %s4961_s5 }
 0x22f   :  { %1762 = vrot.lane.b32.xlu0 %v5606_v61, %s4961_s5 }
 0x230   :  { %v1409_v57 = vsel %vm532_vm0, %v1346_v39, %v1347_v37  ;;  %v1299_v16 = vpop.permute.xlu1 %1298 }
 0x231   :  { %v1410_v48 = vsel %vm1353_vm4, %v1293_v24, %v1409_v57  ;;  %v1297_v54 = vpop.permute.xlu0 %1296  ;;  %v1349_v52 = vrot.slane %v1299_v16, 4 }
 0x232   :  { %1477 = vst [vmem:[#allocation8 + $0xe60] sm:$0xff] %v1410_v48  ;;  %v1348_v38 = vrot.slane %v1297_v54, 4  ;;  %1768 = vrot.lane.b32.xlu1 %v5612_v31, %s4961_s5 }
 0x233   :  { %1766 = vrot.lane.b32.xlu0 %v5616_v0, %s4961_s5 }
 0x234   :  { %v1411_v32 = vsel %vm532_vm0, %v1347_v37, %v1348_v38  ;;  %v1303_v23 = vpop.permute.xlu1 %1302 }
 0x235   :  { %v1412_v4 = vsel %vm1353_vm4, %v1295_v63, %v1411_v32  ;;  %v1301_v61 = vpop.permute.xlu0 %1300  ;;  %v1351_v22 = vrot.slane %v1303_v23, 4 }
 0x236   :  { %1478 = vst [vmem:[#allocation8 + $0xe68] sm:$0xff] %v1412_v4  ;;  %v1350_v46 = vrot.slane %v1301_v61, 4  ;;  %1772 = vrot.lane.b32.xlu1 %v5622_v8, %s4961_s5 }
 0x237   :  { %1770 = vrot.lane.b32.xlu0 %v5123_v59, %s4961_s5 }
 0x238   :  { %v1413_v31 = vsel %vm532_vm0, %v1349_v52, %v1350_v46  ;;  %v1415_v0 = vsel %vm532_vm0, %v1350_v46, %v1351_v22  ;;  %v1484_v36 = vpop.permute.xlu1 %1483 }
 0x239   :  { %v1414_v49 = vsel %vm1353_vm4, %v1299_v16, %v1413_v31  ;;  %v1416_v58 = vsel %vm1353_vm4, %v1301_v61, %v1415_v0  ;;  %v1482_v5 = vpop.permute.xlu0 %1481  ;;  %v1578_v63 = vrot.slane %v1484_v36, 4 }
 0x23a   :  { %1479 = vst [vmem:[#allocation8 + $0xe70] sm:$0xff] %v1414_v49  ;;  %1480 = vst [vmem:[#allocation8 + $0xe78] sm:$0xff] %v1416_v58  ;;  %v1577_v24 = vrot.slane %v1482_v5, 4  ;;  %1776 = vrot.lane.b32.xlu1 %v5143_v15, %s4961_s5 }
 0x23b   :  { %1774 = vrot.lane.b32.xlu0 %v5634_v11, %s4961_s5 }
 0x23c   :  { %v1625_v8 = vsel %vm532_vm0, %v1577_v24, %v1578_v63  ;;  %v1488_v39 = vpop.permute.xlu1 %1487 }
 0x23d   :  { %v1627_v37 = vsel %vm1626_vm5, %v1482_v5, %v1625_v8  ;;  %v1486_v57 = vpop.permute.xlu0 %1485  ;;  %v1580_v32 = vrot.slane %v1488_v39, 4 }
 0x23e   :  { %1722 = vst [vmem:[#allocation8 + $0x80] sm:$0xff] %v1627_v37  ;;  %v1579_v48 = vrot.slane %v1486_v57, 4  ;;  %1780 = vrot.lane.b32.xlu1 %v5640_v62, %s4961_s5 }
 0x23f   :  { %1778 = vrot.lane.b32.xlu0 %v5644_v18, %s4961_s5 }
 0x240   :  { %v1628_v16 = vsel %vm532_vm0, %v1578_v63, %v1579_v48  ;;  %v1492_v38 = vpop.permute.xlu1 %1491 }
 0x241   :  { %v1629_v54 = vsel %vm1626_vm5, %v1484_v36, %v1628_v16  ;;  %v1490_v11 = vpop.permute.xlu0 %1489  ;;  %v1582_v4 = vrot.slane %v1492_v38, 4 }
 0x242   :  { %1723 = vst [vmem:[#allocation8 + $0x88] sm:$0xff] %v1629_v54  ;;  %v1581_v23 = vrot.slane %v1490_v11, 4  ;;  %1784 = vrot.lane.b32.xlu1 %v5650_v13, %s4961_s5 }
 0x243   :  { %1782 = vrot.lane.b32.xlu0 %v5181_v60, %s4961_s5 }
 0x244   :  { %v1630_v62 = vsel %vm532_vm0, %v1580_v32, %v1581_v23  ;;  %v1632_v18 = vsel %vm532_vm0, %v1581_v23, %v1582_v4  ;;  %v1496_v22 = vpop.permute.xlu1 %1495 }
 0x245   :  { %v1631_v61 = vsel %vm1626_vm5, %v1488_v39, %v1630_v62  ;;  %v1633_v52 = vsel %vm1626_vm5, %v1490_v11, %v1632_v18  ;;  %v1494_v46 = vpop.permute.xlu0 %1493  ;;  %v1584_v31 = vrot.slane %v1496_v22, 4 }
 0x246   :  { %1724 = vst [vmem:[#allocation8 + $0x90] sm:$0xff] %v1631_v61  ;;  %1725 = vst [vmem:[#allocation8 + $0x98] sm:$0xff] %v1633_v52  ;;  %v1583_v0 = vrot.slane %v1494_v46, 4  ;;  %1788 = vrot.lane.b32.xlu1 %v5192_v1, %s4961_s5 }
 0x247   :  { %1786 = vrot.lane.b32.xlu0 %v5662_v53, %s4961_s5 }
 0x248   :  { %v1634_v13 = vsel %vm532_vm0, %v1583_v0, %v1584_v31  ;;  %v1500_v58 = vpop.permute.xlu1 %1499 }
 0x249   :  { %v1635_v49 = vsel %vm1626_vm5, %v1494_v46, %v1634_v13  ;;  %v1498_v36 = vpop.permute.xlu0 %1497  ;;  %v1586_v37 = vrot.slane %v1500_v58, 4 }
 0x24a   :  { %1726 = vst [vmem:[#allocation8 + $0x280] sm:$0xff] %v1635_v49  ;;  %v1585_v5 = vrot.slane %v1498_v36, 4  ;;  %1792 = vrot.lane.b32.xlu1 %v5668_v50, %s4961_s5 }
 0x24b   :  { %1790 = vrot.lane.b32.xlu0 %v5672_v45, %s4961_s5 }
 0x24c   :  { %v1636_v63 = vsel %vm532_vm0, %v1584_v31, %v1585_v5  ;;  %v1504_v8 = vpop.permute.xlu1 %1503 }
 0x24d   :  { %v1637_v24 = vsel %vm1626_vm5, %v1496_v22, %v1636_v63  ;;  %v1502_v53 = vpop.permute.xlu0 %1501  ;;  %v1588_v39 = vrot.slane %v1504_v8, 4 }
 0x24e   :  { %1727 = vst [vmem:[#allocation8 + $0x288] sm:$0xff] %v1637_v24  ;;  %v1587_v57 = vrot.slane %v1502_v53, 4  ;;  %1796 = vrot.lane.b32.xlu1 %v5678_v51, %s4961_s5 }
 0x24f   :  { %1794 = vrot.lane.b32.xlu0 %v5202_v6, %s4961_s5 }
 0x250   :  { %v1638_v50 = vsel %vm532_vm0, %v1586_v37, %v1587_v57  ;;  %v1640_v45 = vsel %vm532_vm0, %v1587_v57, %v1588_v39  ;;  %v1508_v54 = vpop.permute.xlu1 %1507  ;;  %v84_v57 = vld [vmem:[#allocation2] sm:$0xff] }
 0x251   :  { %v1639_v48 = vsel %vm1626_vm5, %v1500_v58, %v1638_v50  ;;  %v1641_v16 = vsel %vm1626_vm5, %v1502_v53, %v1640_v45  ;;  %v1506_v38 = vpop.permute.xlu0 %1505  ;;  %v1590_v11 = vrot.slane %v1508_v54, 4 }
 0x252   :  { %1728 = vst [vmem:[#allocation8 + $0x290] sm:$0xff] %v1639_v48  ;;  %1729 = vst [vmem:[#allocation8 + $0x298] sm:$0xff] %v1641_v16  ;;  %v1589_v32 = vrot.slane %v1506_v38, 4  ;;  %1800 = vrot.lane.b32.xlu1 %v5208_v9, %s4961_s5  ;;  %v4713_v48 = vld [vmem:[#allocation5] sm:$0xff]  ;;  %v4714_v16 = vld [vmem:[#allocation5 + $0x8] sm:$0xff] }
 0x253   :  { %1798 = vrot.lane.b32.xlu0 %v5690_v33, %s4961_s5 }
 0x254   :  { %v1642_v51 = vsel %vm532_vm0, %v1589_v32, %v1590_v11  ;;  %v1512_v23 = vpop.permute.xlu1 %1511 }
 0x255   :  { %v1643_v4 = vsel %vm1626_vm5, %v1506_v38, %v1642_v51  ;;  %v1510_v62 = vpop.permute.xlu0 %1509  ;;  %v1592_v46 = vrot.slane %v1512_v23, 4  ;;  %v4715_v38 = vld [vmem:[#allocation2 + $0x8] sm:$0xff] }
 0x256   :  { %1730 = vst [vmem:[#allocation8 + $0x480] sm:$0xff] %v1643_v4  ;;  %v1591_v18 = vrot.slane %v1510_v62, 4  ;;  %1804 = vrot.lane.b32.xlu1 %v5696_v21, %s4961_s5 }
 0x257   :  { %1802 = vrot.lane.b32.xlu0 %v5700_v29, %s4961_s5 }
 0x258   :  { %v1644_v61 = vsel %vm532_vm0, %v1590_v11, %v1591_v18  ;;  %v1516_v22 = vpop.permute.xlu1 %1515  ;;  %v6076_v11 = vpack.c.bf16 %v4715_v38, %v84_v57 }
 0x259   :  { %v1645_v52 = vsel %vm1626_vm5, %v1508_v54, %v1644_v61  ;;  %v1514_v33 = vpop.permute.xlu0 %1513  ;;  %v1594_v31 = vrot.slane %v1516_v22, 4  ;;  %v6074_v54 = vpack.c.bf16 %v4714_v16, %v4713_v48  ;;  %v4716_v22 = vld [vmem:[#allocation2 + $0x18] sm:$0xff]  ;;  %v90_v48 = vld [vmem:[#allocation2 + $0x30] sm:$0xff] }
 0x25a   :  { %1731 = vst [vmem:[#allocation8 + $0x488] sm:$0xff] %v1645_v52  ;;  %v1593_v0 = vrot.slane %v1514_v33, 4  ;;  %1808 = vrot.lane.b32.xlu1 %v5706_v41, %s4961_s5  ;;  %4380 = vst [vmem:[#allocation8 + $0x1e0] sm:$0xff] %v6076_v11 }
 0x25b   :  { %1806 = vrot.lane.b32.xlu0 %v5218_v14, %s4961_s5  ;;  %4381 = vst [vmem:[#allocation8 + $0x1e8] sm:$0xff] %v6074_v54 }
 0x25c   :  { %v1646_v21 = vsel %vm532_vm0, %v1592_v46, %v1593_v0  ;;  %v1648_v29 = vsel %vm532_vm0, %v1593_v0, %v1594_v31  ;;  %v1520_v58 = vpop.permute.xlu1 %1519 }
 0x25d   :  { %v1647_v13 = vsel %vm1626_vm5, %v1512_v23, %v1646_v21  ;;  %v1649_v49 = vsel %vm1626_vm5, %v1514_v33, %v1648_v29  ;;  %v1518_v36 = vpop.permute.xlu0 %1517  ;;  %v1596_v5 = vrot.slane %v1520_v58, 4  ;;  %v86_v23 = vld [vmem:[#allocation2 + $0x10] sm:$0xff] }
 0x25e   :  { %1732 = vst [vmem:[#allocation8 + $0x490] sm:$0xff] %v1647_v13  ;;  %1733 = vst [vmem:[#allocation8 + $0x498] sm:$0xff] %v1649_v49  ;;  %v1595_v63 = vrot.slane %v1518_v36, 4  ;;  %1812 = vrot.lane.b32.xlu1 %v5224_v20, %s4961_s5  ;;  %v4717_v13 = vld [vmem:[#allocation5 + $0x10] sm:$0xff]  ;;  %v4718_v49 = vld [vmem:[#allocation5 + $0x18] sm:$0xff] }
 0x25f   :  { %1810 = vrot.lane.b32.xlu0 %v5718_v19, %s4961_s5 }
 0x260   :  { %v1650_v41 = vsel %vm532_vm0, %v1595_v63, %v1596_v5  ;;  %v1524_v8 = vpop.permute.xlu1 %1523 }
 0x261   :  { %v1651_v24 = vsel %vm1626_vm5, %v1518_v36, %v1650_v41  ;;  %v1522_v53 = vpop.permute.xlu0 %1521  ;;  %v1598_v32 = vrot.slane %v1524_v8, 4 }
 0x262   :  { %1734 = vst [vmem:[#allocation8 + $0x680] sm:$0xff] %v1651_v24  ;;  %v1597_v37 = vrot.slane %v1522_v53, 4  ;;  %1816 = vrot.lane.b32.xlu1 %v5724_v44, %s4961_s5  ;;  %v4720_v53 = vld [vmem:[#allocation5 + $0x20] sm:$0xff] }
 0x263   :  { %1814 = vrot.lane.b32.xlu0 %v5728_v7, %s4961_s5 }
 0x264   :  { %v1652_v39 = vsel %vm532_vm0, %v1596_v5, %v1597_v37  ;;  %v1528_v19 = vpop.permute.xlu1 %1527  ;;  %v88_v5 = vld [vmem:[#allocation2 + $0x20] sm:$0xff] }
 0x265   :  { %v1653_v50 = vsel %vm1626_vm5, %v1520_v58, %v1652_v39  ;;  %v1526_v45 = vpop.permute.xlu0 %1525  ;;  %v1600_v44 = vrot.slane %v1528_v19, 4  ;;  %v6097_v58 = vpack.c.bf16 %v4718_v49, %v4717_v13  ;;  %v4721_v39 = vld [vmem:[#allocation2 + $0x28] sm:$0xff]  ;;  %v4726_v49 = vld [vmem:[#allocation5 + $0x40] sm:$0xff] }
 0x266   :  { %1735 = vst [vmem:[#allocation8 + $0x688] sm:$0xff] %v1653_v50  ;;  %v1599_v51 = vrot.slane %v1526_v45, 4  ;;  %1820 = vrot.lane.b32.xlu1 %v5734_v55, %s4961_s5  ;;  %v6088_v55 = vpack.c.bf16 %v4716_v22, %v86_v23  ;;  %v6108_v57 = vpack.c.bf16 %v4721_v39, %v88_v5  ;;  %v4724_v22 = vld [vmem:[#allocation5 + $0x38] sm:$0xff]  ;;  %v4725_v13 = vld [vmem:[#allocation5 + $0x48] sm:$0xff] }
 0x267   :  { %1818 = vrot.lane.b32.xlu0 %v5234_v25, %s4961_s5  ;;  %4383 = vst [vmem:[#allocation8 + $0x1f8] sm:$0xff] %v6097_v58 }
 0x268   :  { %v1654_v7 = vsel %vm532_vm0, %v1598_v32, %v1599_v51  ;;  %v1656_v4 = vsel %vm532_vm0, %v1599_v51, %v1600_v44  ;;  %v1532_v61 = vpop.permute.xlu1 %1531  ;;  %4382 = vst [vmem:[#allocation8 + $0x1f0] sm:$0xff] %v6088_v55  ;;  %4384 = vst [vmem:[#allocation8 + $0x3e0] sm:$0xff] %v6108_v57  ;;  %v4722_v51 = vld [vmem:[#allocation2 + $0x38] sm:$0xff] }
 0x269   :  { %v1655_v62 = vsel %vm1626_vm5, %v1524_v8, %v1654_v7  ;;  %v1657_v18 = vsel %vm1626_vm5, %v1526_v45, %v1656_v4  ;;  %v1530_v52 = vpop.permute.xlu0 %1529  ;;  %v1602_v33 = vrot.slane %v1532_v61, 4  ;;  %v4719_v8 = vld [vmem:[#allocation5 + $0x28] sm:$0xff] }
 0x26a   :  { %1736 = vst [vmem:[#allocation8 + $0x690] sm:$0xff] %v1655_v62  ;;  %1737 = vst [vmem:[#allocation8 + $0x698] sm:$0xff] %v1657_v18  ;;  %v1601_v46 = vrot.slane %v1530_v52, 4  ;;  %1824 = vrot.lane.b32.xlu1 %v5240_v30, %s4961_s5  ;;  %v6106_v37 = vpack.c.bf16 %v4719_v8, %v4720_v53  ;;  %v94_v8 = vld [vmem:[#allocation2 + $0x50] sm:$0xff] }
 0x26b   :  { %1822 = vrot.lane.b32.xlu0 %v5746_v43, %s4961_s5 }
 0x26c   :  { %v1658_v31 = vsel %vm532_vm0, %v1601_v46, %v1602_v33  ;;  %v1536_v21 = vpop.permute.xlu1 %1535  ;;  %4385 = vst [vmem:[#allocation8 + $0x3e8] sm:$0xff] %v6106_v37 }
 0x26d   :  { %v1659_v0 = vsel %vm1626_vm5, %v1530_v52, %v1658_v31  ;;  %v1534_v29 = vpop.permute.xlu0 %1533  ;;  %v4723_v52 = vld [vmem:[#allocation5 + $0x30] sm:$0xff]  ;;  %v92_v31 = vld [vmem:[#allocation2 + $0x40] sm:$0xff] }
 0x26e   :  { %1738 = vst [vmem:[#allocation8 + $0x880] sm:$0xff] %v1659_v0  ;;  %v1603_v36 = vrot.slane %v1534_v29, 4  ;;  %1828 = vrot.lane.b32.xlu1 %v5752_v56, %s4961_s5  ;;  %v1604_v56 = vrot.slane %v1536_v21, 4 }
 0x26f   :  { %1826 = vrot.lane.b32.xlu0 %v5756_v35, %s4961_s5 }
 0x270   :  { %v1660_v43 = vsel %vm532_vm0, %v1602_v33, %v1603_v36  ;;  %v1540_v41 = vpop.permute.xlu1 %1539  ;;  %v6129_v33 = vpack.c.bf16 %v4724_v22, %v4723_v52  ;;  %v6138_v36 = vpack.c.bf16 %v4725_v13, %v4726_v49 }
 0x271   :  { %v1661_v63 = vsel %vm1626_vm5, %v1532_v61, %v1660_v43  ;;  %v1538_v24 = vpop.permute.xlu0 %1537  ;;  %v1606_v50 = vrot.slane %v1540_v41, 4  ;;  %v4727_v43 = vld [vmem:[#allocation2 + $0x48] sm:$0xff] }
 0x272   :  { %1739 = vst [vmem:[#allocation8 + $0x888] sm:$0xff] %v1661_v63  ;;  %v1605_v35 = vrot.slane %v1538_v24, 4  ;;  %1832 = vrot.lane.b32.xlu1 %v5762_v17, %s4961_s5  ;;  %v6120_v17 = vpack.c.bf16 %v4722_v51, %v90_v48  ;;  %4387 = vst [vmem:[#allocation8 + $0x3f8] sm:$0xff] %v6129_v33  ;;  %v6140_v5 = vpack.c.bf16 %v4727_v43, %v92_v31  ;;  %v4730_v51 = vld [vmem:[#allocation5 + $0x58] sm:$0xff]  ;;  %v4736_v43 = vld [vmem:[#allocation8 + $0xf0] sm:$0xff] }
 0x273   :  { %1830 = vrot.lane.b32.xlu0 %v5250_v34, %s4961_s5  ;;  %4389 = vst [vmem:[#allocation8 + $0x5e8] sm:$0xff] %v6138_v36 }
 0x274   :  { %v1662_v19 = vsel %vm532_vm0, %v1604_v56, %v1605_v35  ;;  %v1664_v45 = vsel %vm532_vm0, %v1605_v35, %v1606_v50  ;;  %v1544_v32 = vpop.permute.xlu1 %1543  ;;  %4386 = vst [vmem:[#allocation8 + $0x3f0] sm:$0xff] %v6120_v17  ;;  %4388 = vst [vmem:[#allocation8 + $0x5e0] sm:$0xff] %v6140_v5  ;;  %v4728_v35 = vld [vmem:[#allocation2 + $0x58] sm:$0xff] }
 0x275   :  { %v1663_v16 = vsel %vm1626_vm5, %v1536_v21, %v1662_v19  ;;  %v1665_v38 = vsel %vm1626_vm5, %v1538_v24, %v1664_v45  ;;  %v1542_v44 = vpop.permute.xlu0 %1541  ;;  %v1608_v7 = vrot.slane %v1544_v32, 4 }
 0x276   :  { %1740 = vst [vmem:[#allocation8 + $0x890] sm:$0xff] %v1663_v16  ;;  %1741 = vst [vmem:[#allocation8 + $0x898] sm:$0xff] %v1665_v38  ;;  %v1607_v4 = vrot.slane %v1542_v44, 4  ;;  %1836 = vrot.lane.b32.xlu1 %v5256_v40, %s4961_s5 }
 0x277   :  { %1834 = vrot.lane.b32.xlu0 %v5774_v26, %s4961_s5 }
 0x278   :  { %v1666_v23 = vsel %vm532_vm0, %v1607_v4, %v1608_v7  ;;  %v1548_v18 = vpop.permute.xlu1 %1547 }
 0x279   :  { %v1667_v62 = vsel %vm1626_vm5, %v1542_v44, %v1666_v23  ;;  %v1546_v61 = vpop.permute.xlu0 %1545  ;;  %v4729_v44 = vld [vmem:[#allocation5 + $0x50] sm:$0xff]  ;;  %v4731_v23 = vld [vmem:[#allocation8 + $0xe8] sm:$0xff] }
 0x27a   :  { %1742 = vst [vmem:[#allocation8 + $0xa80] sm:$0xff] %v1667_v62  ;;  %v1609_v46 = vrot.slane %v1546_v61, 4  ;;  %1840 = vrot.lane.b32.xlu1 %v5780_v2, %s4961_s5  ;;  %v1610_v2 = vrot.slane %v1548_v18, 4  ;;  %v4732_v62 = vld [vmem:[#allocation8 + $0xe0] sm:$0xff] }
 0x27b   :  { %1838 = vrot.lane.b32.xlu0 %v5784_v28, %s4961_s5 }
 0x27c   :  { %v1668_v26 = vsel %vm532_vm0, %v1608_v7, %v1609_v46  ;;  %v1552_v21 = vpop.permute.xlu1 %1551  ;;  %v6161_v7 = vpack.c.bf16 %v4730_v51, %v4729_v44  ;;  %v4733_v46 = vld [vmem:[#allocation5 + $0x68] sm:$0xff] }
 0x27d   :  { %v1669_v0 = vsel %vm1626_vm5, %v1544_v32, %v1668_v26  ;;  %v1550_v29 = vpop.permute.xlu0 %1549  ;;  %v1612_v63 = vrot.slane %v1552_v21, 4  ;;  %v4734_v26 = vld [vmem:[#allocation5 + $0x60] sm:$0xff] }
 0x27e   :  { %1743 = vst [vmem:[#allocation8 + $0xa88] sm:$0xff] %v1669_v0  ;;  %v1611_v28 = vrot.slane %v1550_v29, 4  ;;  %1844 = vrot.lane.b32.xlu1 %v5790_v12, %s4961_s5  ;;  %v6152_v12 = vpack.c.bf16 %v4728_v35, %v94_v8  ;;  %4391 = vst [vmem:[#allocation8 + $0x5f8] sm:$0xff] %v6161_v7  ;;  %v6168_v31 = vpack.c.bf16 %v4733_v46, %v4734_v26  ;;  %v4735_v0 = vld [vmem:[#allocation2 + $0x68] sm:$0xff]  ;;  %v4738_v35 = vld [vmem:[#allocation8 + $0xf8] sm:$0xff] }
 0x27f   :  { %1842 = vrot.lane.b32.xlu0 %v5266_v42, %s4961_s5  ;;  %v4745_v26 = vld [vmem:[#allocation2 + $0x88] sm:$0xff] }
 0x280   :  { %v1670_v41 = vsel %vm532_vm0, %v1610_v2, %v1611_v28  ;;  %v1672_v24 = vsel %vm532_vm0, %v1611_v28, %v1612_v63  ;;  %v1556_v56 = vpop.permute.xlu1 %1555  ;;  %4390 = vst [vmem:[#allocation8 + $0x5f0] sm:$0xff] %v6152_v12  ;;  %4393 = vst [vmem:[#allocation8 + $0x7e8] sm:$0xff] %v6168_v31  ;;  %v98_v28 = vld [vmem:[#allocation2 + $0x70] sm:$0xff] }
 0x281   :  { %v1671_v53 = vsel %vm1626_vm5, %v1548_v18, %v1670_v41  ;;  %v1673_v39 = vsel %vm1626_vm5, %v1550_v29, %v1672_v24  ;;  %v1554_v50 = vpop.permute.xlu0 %1553  ;;  %v1614_v19 = vrot.slane %v1556_v56, 4  ;;  %v96_v18 = vld [vmem:[#allocation2 + $0x60] sm:$0xff] }
 0x282   :  { %1744 = vst [vmem:[#allocation8 + $0xa90] sm:$0xff] %v1671_v53  ;;  %1745 = vst [vmem:[#allocation8 + $0xa98] sm:$0xff] %v1673_v39  ;;  %v1613_v45 = vrot.slane %v1554_v50, 4  ;;  %1848 = vrot.lane.b32.xlu1 %v5272_v47, %s4961_s5  ;;  %v6170_v21 = vpack.c.bf16 %v4735_v0, %v96_v18  ;;  %v4737_v39 = vld [vmem:[#allocation2 + $0x78] sm:$0xff] }
 0x283   :  { %1846 = vrot.lane.b32.xlu0 %v5802_v10, %s4961_s5 }
 0x284   :  { %v1674_v48 = vsel %vm532_vm0, %v1613_v45, %v1614_v19  ;;  %v1560_v38 = vpop.permute.xlu1 %1559  ;;  %4392 = vst [vmem:[#allocation8 + $0x7e0] sm:$0xff] %v6170_v21 }
 0x285   :  { %v1675_v16 = vsel %vm1626_vm5, %v1554_v50, %v1674_v48  ;;  %v1558_v32 = vpop.permute.xlu0 %1557  ;;  %v1616_v29 = vrot.slane %v1560_v38, 4 }
 0x286   :  { %1746 = vst [vmem:[#allocation8 + $0xc80] sm:$0xff] %v1675_v16  ;;  %v1615_v4 = vrot.slane %v1558_v32, 4  ;;  %2029 = vrot.lane.b32.xlu1 %v4731_v23, %s4962_s6  ;;  %v4740_v32 = vld [vmem:[#allocation5 + $0x78] sm:$0xff] }
 0x287   :  { %2027 = vrot.lane.b32.xlu0 %v4732_v62, %s4962_s6  ;;  %v100_v62 = vld [vmem:[#allocation2 + $0x80] sm:$0xff] }
 0x288   :  { %v1676_v10 = vsel %vm532_vm0, %v1614_v19, %v1615_v4  ;;  %v1564_v52 = vpop.permute.xlu1 %1563  ;;  %v4741_v4 = vld [vmem:[#allocation8 + $0x2e8] sm:$0xff]  ;;  %v6198_v0 = vpack.c.bf16 %v4745_v26, %v100_v62  ;;  %v104_v62 = vld [vmem:[#allocation2 + $0xa0] sm:$0xff] }
 0x289   :  { %v1677_v61 = vsel %vm1626_vm5, %v1556_v56, %v1676_v10  ;;  %v1562_v22 = vpop.permute.xlu0 %1561  ;;  %v1618_v13 = vrot.slane %v1564_v52, 4  ;;  %v6181_v56 = vpack.c.bf16 %v4737_v39, %v98_v28  ;;  %v4743_v52 = vld [vmem:[#allocation5 + $0x88] sm:$0xff]  ;;  %v102_v28 = vld [vmem:[#allocation2 + $0x90] sm:$0xff]  ;;  %v4747_v39 = vld [vmem:[#allocation2 + $0x98] sm:$0xff] }
 0x28a   :  { %1747 = vst [vmem:[#allocation8 + $0xc88] sm:$0xff] %v1677_v61  ;;  %v1617_v49 = vrot.slane %v1562_v22, 4  ;;  %2033 = vrot.lane.b32.xlu1 %v4736_v43, %s4962_s6  ;;  %v4746_v43 = vld [vmem:[#allocation8 + $0x2f0] sm:$0xff]  ;;  %4396 = vst [vmem:[#allocation8 + $0x9e0] sm:$0xff] %v6198_v0 }
 0x28b   :  { %2031 = vrot.lane.b32.xlu0 %v5054_v3, %s4962_s6  ;;  %4394 = vst [vmem:[#allocation8 + $0x7f0] sm:$0xff] %v6181_v56 }
 0x28c   :  { %v1678_v2 = vsel %vm532_vm0, %v1616_v29, %v1617_v49  ;;  %v1680_v63 = vsel %vm532_vm0, %v1617_v49, %v1618_v13  ;;  %v1568_v8 = vpop.permute.xlu1 %1567 }
 0x28d   :  { %v1679_v41 = vsel %vm1626_vm5, %v1560_v38, %v1678_v2  ;;  %v1681_v24 = vsel %vm1626_vm5, %v1562_v22, %v1680_v63  ;;  %v1566_v53 = vpop.permute.xlu0 %1565  ;;  %v1620_v3 = vrot.slane %v1568_v8, 4  ;;  %v4739_v38 = vld [vmem:[#allocation5 + $0x70] sm:$0xff]  ;;  %v4744_v22 = vld [vmem:[#allocation5 + $0x80] sm:$0xff] }
 0x28e   :  { %1748 = vst [vmem:[#allocation8 + $0xc90] sm:$0xff] %v1679_v41  ;;  %1749 = vst [vmem:[#allocation8 + $0xc98] sm:$0xff] %v1681_v24  ;;  %v1619_v50 = vrot.slane %v1566_v53, 4  ;;  %2037 = vrot.lane.b32.xlu1 %v5083_v27, %s4962_s6  ;;  %v6189_v44 = vpack.c.bf16 %v4740_v32, %v4739_v38  ;;  %v4742_v27 = vld [vmem:[#allocation8 + $0x2e0] sm:$0xff]  ;;  %v6196_v46 = vpack.c.bf16 %v4743_v52, %v4744_v22  ;;  %v4749_v38 = vld [vmem:[#allocation5 + $0x90] sm:$0xff] }
 0x28f   :  { %2035 = vrot.lane.b32.xlu0 %v4738_v35, %s4962_s6  ;;  %v4748_v35 = vld [vmem:[#allocation8 + $0x2f8] sm:$0xff]  ;;  %v4753_v52 = vld [vmem:[#allocation5 + $0xa8] sm:$0xff]  ;;  %v4754_v22 = vld [vmem:[#allocation5 + $0xa0] sm:$0xff] }
 0x290   :  { %v1682_v19 = vsel %vm532_vm0, %v1619_v50, %v1620_v3  ;;  %v1572_v48 = vpop.permute.xlu1 %1571  ;;  %4395 = vst [vmem:[#allocation8 + $0x7f8] sm:$0xff] %v6189_v44  ;;  %4397 = vst [vmem:[#allocation8 + $0x9e8] sm:$0xff] %v6196_v46  ;;  %v4750_v32 = vld [vmem:[#allocation5 + $0x98] sm:$0xff]  ;;  %v6224_v26 = vpack.c.bf16 %v4753_v52, %v4754_v22 }
 0x291   :  { %v1683_v45 = vsel %vm1626_vm5, %v1566_v53, %v1682_v19  ;;  %v1570_v16 = vpop.permute.xlu0 %1569  ;;  %v1622_v29 = vrot.slane %v1572_v48, 4 }
 0x292   :  { %1750 = vst [vmem:[#allocation8 + $0xe80] sm:$0xff] %v1683_v45  ;;  %v1621_v51 = vrot.slane %v1570_v16, 4  ;;  %2041 = vrot.lane.b32.xlu1 %v4741_v4, %s4962_s6  ;;  %4401 = vst [vmem:[#allocation8 + $0xbe8] sm:$0xff] %v6224_v26 }
 0x293   :  { %2039 = vrot.lane.b32.xlu0 %v4742_v27, %s4962_s6  ;;  %v4751_v27 = vld [vmem:[#allocation8 + $0x4e8] sm:$0xff] }
 0x294   :  { %v1684_v23 = vsel %vm532_vm0, %v1620_v3, %v1621_v51  ;;  %v1576_v18 = vpop.permute.xlu1 %1575  ;;  %v6209_v3 = vpack.c.bf16 %v4747_v39, %v102_v28  ;;  %v6217_v51 = vpack.c.bf16 %v4750_v32, %v4749_v38 }
 0x295   :  { %v1685_v10 = vsel %vm1626_vm5, %v1568_v8, %v1684_v23  ;;  %v1574_v61 = vpop.permute.xlu0 %1573  ;;  %v1624_v13 = vrot.slane %v1576_v18, 4 }
 0x296   :  { %1751 = vst [vmem:[#allocation8 + $0xe88] sm:$0xff] %v1685_v10  ;;  %v1623_v49 = vrot.slane %v1574_v61, 4  ;;  %2045 = vrot.lane.b32.xlu1 %v4746_v43, %s4962_s6  ;;  %4398 = vst [vmem:[#allocation8 + $0x9f0] sm:$0xff] %v6209_v3 }
 0x297   :  { %2043 = vrot.lane.b32.xlu0 %v5123_v59, %s4962_s6  ;;  %4399 = vst [vmem:[#allocation8 + $0x9f8] sm:$0xff] %v6217_v51 }
 0x298   :  { %v1686_v2 = vsel %vm532_vm0, %v1622_v29, %v1623_v49  ;;  %v1688_v63 = vsel %vm532_vm0, %v1623_v49, %v1624_v13  ;;  %v1757_v8 = vpop.permute.xlu1 %1756  ;;  %v4755_v29 = vld [vmem:[#allocation2 + $0xa8] sm:$0xff] }
 0x299   :  { %v1687_v41 = vsel %vm1626_vm5, %v1572_v48, %v1686_v2  ;;  %v1689_v24 = vsel %vm1626_vm5, %v1574_v61, %v1688_v63  ;;  %v1755_v53 = vpop.permute.xlu0 %1754  ;;  %v1851_v59 = vrot.slane %v1757_v8, 4  ;;  %v6226_v13 = vpack.c.bf16 %v4755_v29, %v104_v62  ;;  %v4756_v63 = vld [vmem:[#allocation8 + $0x4f0] sm:$0xff]  ;;  %v4761_v62 = vld [vmem:[#allocation8 + $0x6e8] sm:$0xff] }
 0x29a   :  { %1752 = vst [vmem:[#allocation8 + $0xe90] sm:$0xff] %v1687_v41  ;;  %1753 = vst [vmem:[#allocation8 + $0xe98] sm:$0xff] %v1689_v24  ;;  %v1850_v50 = vrot.slane %v1755_v53, 4  ;;  %2049 = vrot.lane.b32.xlu1 %v5143_v15, %s4962_s6  ;;  %v4752_v15 = vld [vmem:[#allocation8 + $0x4e0] sm:$0xff]  ;;  %v106_v24 = vld [vmem:[#allocation2 + $0xb0] sm:$0xff] }
 0x29b   :  { %2047 = vrot.lane.b32.xlu0 %v4748_v35, %s4962_s6  ;;  %4400 = vst [vmem:[#allocation8 + $0xbe0] sm:$0xff] %v6226_v13  ;;  %v4763_v29 = vld [vmem:[#allocation5 + $0xc8] sm:$0xff] }
 0x29c   :  { %v1898_v19 = vsel %vm532_vm0, %v1850_v50, %v1851_v59  ;;  %v1761_v48 = vpop.permute.xlu1 %1760  ;;  %v4757_v50 = vld [vmem:[#allocation2 + $0xb8] sm:$0xff] }
 0x29d   :  { %v1900_v45 = vsel %vm1899_vm6, %v1755_v53, %v1898_v19  ;;  %v1759_v16 = vpop.permute.xlu0 %1758  ;;  %v1853_v49 = vrot.slane %v1761_v48, 4  ;;  %v6237_v35 = vpack.c.bf16 %v4757_v50, %v106_v24 }
 0x29e   :  { %1995 = vst [vmem:[#allocation8 + $0xa0] sm:$0xff] %v1900_v45  ;;  %v1852_v4 = vrot.slane %v1759_v16, 4  ;;  %2053 = vrot.lane.b32.xlu1 %v4751_v27, %s4962_s6  ;;  %v4758_v45 = vld [vmem:[#allocation8 + $0x4f8] sm:$0xff] }
 0x29f   :  { %2051 = vrot.lane.b32.xlu0 %v4752_v15, %s4962_s6  ;;  %4402 = vst [vmem:[#allocation8 + $0xbf0] sm:$0xff] %v6237_v35  ;;  %v4760_v27 = vld [vmem:[#allocation5 + $0xb8] sm:$0xff] }
 0x2a0   :  { %v1901_v23 = vsel %vm532_vm0, %v1851_v59, %v1852_v4  ;;  %v1765_v18 = vpop.permute.xlu1 %1764  ;;  %v4759_v4 = vld [vmem:[#allocation5 + $0xb0] sm:$0xff] }
 0x2a1   :  { %v1902_v10 = vsel %vm1899_vm6, %v1757_v8, %v1901_v23  ;;  %v1763_v61 = vpop.permute.xlu0 %1762  ;;  %v1855_v43 = vrot.slane %v1765_v18, 4  ;;  %v6245_v15 = vpack.c.bf16 %v4760_v27, %v4759_v4  ;;  %v108_v18 = vld [vmem:[#allocation2 + $0xc0] sm:$0xff]  ;;  %v4768_v4 = vld [vmem:[#allocation8 + $0x6f8] sm:$0xff] }
 0x2a2   :  { %1996 = vst [vmem:[#allocation8 + $0xa8] sm:$0xff] %v1902_v10  ;;  %v1854_v2 = vrot.slane %v1763_v61, 4  ;;  %2057 = vrot.lane.b32.xlu1 %v4756_v63, %s4962_s6 }
 0x2a3   :  { %2055 = vrot.lane.b32.xlu0 %v5181_v60, %s4962_s6  ;;  %4403 = vst [vmem:[#allocation8 + $0xbf8] sm:$0xff] %v6245_v15 }
 0x2a4   :  { %v1903_v28 = vsel %vm532_vm0, %v1853_v49, %v1854_v2  ;;  %v1905_v41 = vsel %vm532_vm0, %v1854_v2, %v1855_v43  ;;  %v1769_v39 = vpop.permute.xlu1 %1768  ;;  %v4764_v49 = vld [vmem:[#allocation5 + $0xc0] sm:$0xff]  ;;  %v4765_v2 = vld [vmem:[#allocation2 + $0xc8] sm:$0xff] }
 0x2a5   :  { %v1904_v8 = vsel %vm1899_vm6, %v1761_v48, %v1903_v28  ;;  %v1906_v53 = vsel %vm1899_vm6, %v1763_v61, %v1905_v41  ;;  %v1767_v59 = vpop.permute.xlu0 %1766  ;;  %v1857_v60 = vrot.slane %v1769_v39, 4  ;;  %v6252_v43 = vpack.c.bf16 %v4763_v29, %v4764_v49  ;;  %v112_v29 = vld [vmem:[#allocation2 + $0xe0] sm:$0xff] }
 0x2a6   :  { %1997 = vst [vmem:[#allocation8 + $0xb0] sm:$0xff] %v1904_v8  ;;  %1998 = vst [vmem:[#allocation8 + $0xb8] sm:$0xff] %v1906_v53  ;;  %v1856_v19 = vrot.slane %v1767_v59, 4  ;;  %2061 = vrot.lane.b32.xlu1 %v5192_v1, %s4962_s6  ;;  %v4762_v1 = vld [vmem:[#allocation8 + $0x6e0] sm:$0xff]  ;;  %v6254_v63 = vpack.c.bf16 %v4765_v2, %v108_v18  ;;  %v4766_v8 = vld [vmem:[#allocation8 + $0x6f0] sm:$0xff] }
 0x2a7   :  { %2059 = vrot.lane.b32.xlu0 %v4758_v45, %s4962_s6  ;;  %4405 = vst [vmem:[#allocation8 + $0xde8] sm:$0xff] %v6252_v43 }
 0x2a8   :  { %v1907_v48 = vsel %vm532_vm0, %v1856_v19, %v1857_v60  ;;  %v1773_v38 = vpop.permute.xlu1 %1772  ;;  %4404 = vst [vmem:[#allocation8 + $0xde0] sm:$0xff] %v6254_v63 }
 0x2a9   :  { %v1908_v16 = vsel %vm1899_vm6, %v1767_v59, %v1907_v48  ;;  %v1771_v32 = vpop.permute.xlu0 %1770  ;;  %v1859_v28 = vrot.slane %v1773_v38, 4  ;;  %v110_v59 = vld [vmem:[#allocation2 + $0xd0] sm:$0xff]  ;;  %v4767_v48 = vld [vmem:[#allocation2 + $0xd8] sm:$0xff] }
 0x2aa   :  { %1999 = vst [vmem:[#allocation8 + $0x2a0] sm:$0xff] %v1908_v16  ;;  %v1858_v23 = vrot.slane %v1771_v32, 4  ;;  %2065 = vrot.lane.b32.xlu1 %v4761_v62, %s4962_s6  ;;  %v6265_v16 = vpack.c.bf16 %v4767_v48, %v110_v59 }
 0x2ab   :  { %2063 = vrot.lane.b32.xlu0 %v4762_v1, %s4962_s6  ;;  %v4769_v1 = vld [vmem:[#allocation5 + $0xd0] sm:$0xff] }
 0x2ac   :  { %v1909_v10 = vsel %vm532_vm0, %v1857_v60, %v1858_v23  ;;  %v1777_v52 = vpop.permute.xlu1 %1776  ;;  %4406 = vst [vmem:[#allocation8 + $0xdf0] sm:$0xff] %v6265_v16 }
 0x2ad   :  { %v1910_v61 = vsel %vm1899_vm6, %v1769_v39, %v1909_v10  ;;  %v1775_v22 = vpop.permute.xlu0 %1774  ;;  %v1861_v41 = vrot.slane %v1777_v52, 4  ;;  %v4770_v10 = vld [vmem:[#allocation5 + $0xd8] sm:$0xff]  ;;  %v4771_v52 = vld [vmem:[#allocation8 + $0x8e8] sm:$0xff] }
 0x2ae   :  { %2000 = vst [vmem:[#allocation8 + $0x2a8] sm:$0xff] %v1910_v61  ;;  %v1860_v24 = vrot.slane %v1775_v22, 4  ;;  %2069 = vrot.lane.b32.xlu1 %v4766_v8, %s4962_s6  ;;  %v6273_v18 = vpack.c.bf16 %v4770_v10, %v4769_v1 }
 0x2af   :  { %2067 = vrot.lane.b32.xlu0 %v5202_v6, %s4962_s6 }
 0x2b0   :  { %v1911_v53 = vsel %vm532_vm0, %v1859_v28, %v1860_v24  ;;  %v1913_v39 = vsel %vm532_vm0, %v1860_v24, %v1861_v41  ;;  %v1781_v19 = vpop.permute.xlu1 %1780  ;;  %4407 = vst [vmem:[#allocation8 + $0xdf8] sm:$0xff] %v6273_v18  ;;  %v4773_v41 = vld [vmem:[#allocation5 + $0xe8] sm:$0xff]  ;;  %v4774_v24 = vld [vmem:[#allocation5 + $0xe0] sm:$0xff] }
 0x2b1   :  { %v1912_v50 = vsel %vm1899_vm6, %v1773_v38, %v1911_v53  ;;  %v1914_v60 = vsel %vm1899_vm6, %v1775_v22, %v1913_v39  ;;  %v1779_v45 = vpop.permute.xlu0 %1778  ;;  %v1863_v6 = vrot.slane %v1781_v19, 4  ;;  %v6280_v8 = vpack.c.bf16 %v4773_v41, %v4774_v24  ;;  %v4775_v53 = vld [vmem:[#allocation2 + $0xe8] sm:$0xff] }
 0x2b2   :  { %2001 = vst [vmem:[#allocation8 + $0x2b0] sm:$0xff] %v1912_v50  ;;  %2002 = vst [vmem:[#allocation8 + $0x2b8] sm:$0xff] %v1914_v60  ;;  %v1862_v32 = vrot.slane %v1779_v45, 4  ;;  %2073 = vrot.lane.b32.xlu1 %v5208_v9, %s4962_s6  ;;  %v4772_v9 = vld [vmem:[#allocation8 + $0x8e0] sm:$0xff]  ;;  %v6282_v39 = vpack.c.bf16 %v4775_v53, %v112_v29  ;;  %v4779_v29 = vld [vmem:[#allocation5 + $0xf0] sm:$0xff] }
 0x2b3   :  { %2071 = vrot.lane.b32.xlu0 %v4768_v4, %s4962_s6  ;;  %4409 = vst [vmem:[#allocation8 + $0xfe8] sm:$0xff] %v6280_v8  ;;  %v4781_v41 = vld [vmem:[#allocation8 + $0xae8] sm:$0xff] }
 0x2b4   :  { %v1915_v38 = vsel %vm532_vm0, %v1862_v32, %v1863_v6  ;;  %v1785_v23 = vpop.permute.xlu1 %1784  ;;  %4408 = vst [vmem:[#allocation8 + $0xfe0] sm:$0xff] %v6282_v39 }
 0x2b5   :  { %v1916_v27 = vsel %vm1899_vm6, %v1779_v45, %v1915_v38  ;;  %v1783_v62 = vpop.permute.xlu0 %1782  ;;  %v1865_v59 = vrot.slane %v1785_v23, 4  ;;  %v4776_v45 = vld [vmem:[#allocation8 + $0x8f0] sm:$0xff] }
 0x2b6   :  { %2003 = vst [vmem:[#allocation8 + $0x4a0] sm:$0xff] %v1916_v27  ;;  %v1864_v61 = vrot.slane %v1783_v62, 4  ;;  %2077 = vrot.lane.b32.xlu1 %v4771_v52, %s4962_s6  ;;  %v4777_v62 = vld [vmem:[#allocation2 + $0xf8] sm:$0xff] }
 0x2b7   :  { %2075 = vrot.lane.b32.xlu0 %v4772_v9, %s4962_s6 }
 0x2b8   :  { %v1917_v22 = vsel %vm532_vm0, %v1863_v6, %v1864_v61  ;;  %v1789_v2 = vpop.permute.xlu1 %1788  ;;  %v114_v6 = vld [vmem:[#allocation2 + $0xf0] sm:$0xff]  ;;  %v4778_v61 = vld [vmem:[#allocation8 + $0x8f8] sm:$0xff] }
 0x2b9   :  { %v1918_v49 = vsel %vm1899_vm6, %v1781_v19, %v1917_v22  ;;  %v1787_v28 = vpop.permute.xlu0 %1786  ;;  %v1867_v50 = vrot.slane %v1789_v2, 4  ;;  %v6293_v1 = vpack.c.bf16 %v4777_v62, %v114_v6 }
 0x2ba   :  { %2004 = vst [vmem:[#allocation8 + $0x4a8] sm:$0xff] %v1918_v49  ;;  %v1866_v60 = vrot.slane %v1787_v28, 4  ;;  %2081 = vrot.lane.b32.xlu1 %v4776_v45, %s4962_s6  ;;  %v4780_v49 = vld [vmem:[#allocation5 + $0xf8] sm:$0xff] }
 0x2bb   :  { %2079 = vrot.lane.b32.xlu0 %v5218_v14, %s4962_s6  ;;  %4410 = vst [vmem:[#allocation8 + $0xff0] sm:$0xff] %v6293_v1  ;;  %v6301_v2 = vpack.c.bf16 %v4780_v49, %v4779_v29  ;;  %v4785_v29 = vld [vmem:[#allocation8 + $0xce8] sm:$0xff]  ;;  %v4786_v49 = vld [vmem:[#allocation8 + $0xce0] sm:$0xff] }
 0x2bc   :  { %v1919_v19 = vsel %vm532_vm0, %v1865_v59, %v1866_v60  ;;  %v1921_v48 = vsel %vm532_vm0, %v1866_v60, %v1867_v50  ;;  %v1793_v38 = vpop.permute.xlu1 %1792 }
 0x2bd   :  { %v1920_v32 = vsel %vm1899_vm6, %v1785_v23, %v1919_v19  ;;  %v1922_v4 = vsel %vm1899_vm6, %v1787_v28, %v1921_v48  ;;  %v1791_v27 = vpop.permute.xlu0 %1790  ;;  %v1869_v14 = vrot.slane %v1793_v38, 4  ;;  %4411 = vst [vmem:[#allocation8 + $0xff8] sm:$0xff] %v6301_v2  ;;  %v4783_v48 = vld [vmem:[#allocation8 + $0xaf0] sm:$0xff] }
 0x2be   :  { %2005 = vst [vmem:[#allocation8 + $0x4b0] sm:$0xff] %v1920_v32  ;;  %2006 = vst [vmem:[#allocation8 + $0x4b8] sm:$0xff] %v1922_v4  ;;  %v1868_v10 = vrot.slane %v1791_v27, 4  ;;  %2085 = vrot.lane.b32.xlu1 %v5224_v20, %s4962_s6  ;;  %v4782_v20 = vld [vmem:[#allocation8 + $0xae0] sm:$0xff] }
 0x2bf   :  { %2083 = vrot.lane.b32.xlu0 %v4778_v61, %s4962_s6  ;;  %v4784_v61 = vld [vmem:[#allocation8 + $0xaf8] sm:$0xff] }
 0x2c0   :  { %v1923_v23 = vsel %vm532_vm0, %v1868_v10, %v1869_v14  ;;  %v1797_v9 = vpop.permute.xlu1 %1796 }
 0x2c1   :  { %v1924_v52 = vsel %vm1899_vm6, %v1791_v27, %v1923_v23  ;;  %v1795_v22 = vpop.permute.xlu0 %1794  ;;  %v1871_v60 = vrot.slane %v1797_v9, 4 }
 0x2c2   :  { %2007 = vst [vmem:[#allocation8 + $0x6a0] sm:$0xff] %v1924_v52  ;;  %v1870_v28 = vrot.slane %v1795_v22, 4  ;;  %2089 = vrot.lane.b32.xlu1 %v4781_v41, %s4962_s6 }
 0x2c3   :  { %2087 = vrot.lane.b32.xlu0 %v4782_v20, %s4962_s6 }
 0x2c4   :  { %v1925_v24 = vsel %vm532_vm0, %v1869_v14, %v1870_v28  ;;  %v1801_v59 = vpop.permute.xlu1 %1800 }
 0x2c5   :  { %v1926_v53 = vsel %vm1899_vm6, %v1793_v38, %v1925_v24  ;;  %v1799_v50 = vpop.permute.xlu0 %1798  ;;  %v1873_v45 = vrot.slane %v1801_v59, 4 }
 0x2c6   :  { %2008 = vst [vmem:[#allocation8 + $0x6a8] sm:$0xff] %v1926_v53  ;;  %v1872_v19 = vrot.slane %v1799_v50, 4  ;;  %2093 = vrot.lane.b32.xlu1 %v4783_v48, %s4962_s6 }
 0x2c7   :  { %2091 = vrot.lane.b32.xlu0 %v5234_v25, %s4962_s6 }
 0x2c8   :  { %v1927_v6 = vsel %vm532_vm0, %v1871_v60, %v1872_v19  ;;  %v1929_v32 = vsel %vm532_vm0, %v1872_v19, %v1873_v45  ;;  %v1805_v27 = vpop.permute.xlu1 %1804 }
 0x2c9   :  { %v1928_v4 = vsel %vm1899_vm6, %v1797_v9, %v1927_v6  ;;  %v1930_v38 = vsel %vm1899_vm6, %v1799_v50, %v1929_v32  ;;  %v1803_v62 = vpop.permute.xlu0 %1802  ;;  %v1875_v14 = vrot.slane %v1805_v27, 4  ;;  %v4787_v50 = vld [vmem:[#allocation8 + $0xcf0] sm:$0xff] }
 0x2ca   :  { %2009 = vst [vmem:[#allocation8 + $0x6b0] sm:$0xff] %v1928_v4  ;;  %2010 = vst [vmem:[#allocation8 + $0x6b8] sm:$0xff] %v1930_v38  ;;  %v1874_v10 = vrot.slane %v1803_v62, 4  ;;  %2097 = vrot.lane.b32.xlu1 %v5240_v30, %s4962_s6 }
 0x2cb   :  { %2095 = vrot.lane.b32.xlu0 %v4784_v61, %s4962_s6 }
 0x2cc   :  { %v1931_v25 = vsel %vm532_vm0, %v1874_v10, %v1875_v14  ;;  %v1809_v52 = vpop.permute.xlu1 %1808 }
 0x2cd   :  { %v1932_v23 = vsel %vm1899_vm6, %v1803_v62, %v1931_v25  ;;  %v1807_v9 = vpop.permute.xlu0 %1806  ;;  %v1877_v24 = vrot.slane %v1809_v52, 4  ;;  %v4789_v25 = vld [vmem:[#allocation8 + $0xee8] sm:$0xff] }
 0x2ce   :  { %2011 = vst [vmem:[#allocation8 + $0x8a0] sm:$0xff] %v1932_v23  ;;  %v1876_v22 = vrot.slane %v1807_v9, 4  ;;  %2101 = vrot.lane.b32.xlu1 %v4785_v29, %s4962_s6  ;;  %v4790_v23 = vld [vmem:[#allocation8 + $0xee0] sm:$0xff] }
 0x2cf   :  { %2099 = vrot.lane.b32.xlu0 %v4786_v49, %s4962_s6 }
 0x2d0   :  { %v1933_v28 = vsel %vm532_vm0, %v1875_v14, %v1876_v22  ;;  %v1813_v41 = vpop.permute.xlu1 %1812 }
 0x2d1   :  { %v1934_v30 = vsel %vm1899_vm6, %v1805_v27, %v1933_v28  ;;  %v1811_v20 = vpop.permute.xlu0 %1810  ;;  %v1879_v53 = vrot.slane %v1813_v41, 4  ;;  %v4788_v27 = vld [vmem:[#allocation8 + $0xcf8] sm:$0xff] }
 0x2d2   :  { %2012 = vst [vmem:[#allocation8 + $0x8a8] sm:$0xff] %v1934_v30  ;;  %v1878_v59 = vrot.slane %v1811_v20, 4  ;;  %2105 = vrot.lane.b32.xlu1 %v4787_v50, %s4962_s6  ;;  %v4791_v30 = vld [vmem:[#allocation8 + $0xef0] sm:$0xff] }
 0x2d3   :  { %2103 = vrot.lane.b32.xlu0 %v5250_v34, %s4962_s6 }
 0x2d4   :  { %v1935_v60 = vsel %vm532_vm0, %v1877_v24, %v1878_v59  ;;  %v1937_v45 = vsel %vm532_vm0, %v1878_v59, %v1879_v53  ;;  %v1817_v6 = vpop.permute.xlu1 %1816 }
 0x2d5   :  { %v1936_v19 = vsel %vm1899_vm6, %v1809_v52, %v1935_v60  ;;  %v1938_v48 = vsel %vm1899_vm6, %v1811_v20, %v1937_v45  ;;  %v1815_v32 = vpop.permute.xlu0 %1814  ;;  %v1881_v4 = vrot.slane %v1817_v6, 4 }
 0x2d6   :  { %2013 = vst [vmem:[#allocation8 + $0x8b0] sm:$0xff] %v1936_v19  ;;  %2014 = vst [vmem:[#allocation8 + $0x8b8] sm:$0xff] %v1938_v48  ;;  %v1880_v38 = vrot.slane %v1815_v32, 4  ;;  %2109 = vrot.lane.b32.xlu1 %v5256_v40, %s4962_s6  ;;  %v4792_v19 = vld [vmem:[#allocation8 + $0xef8] sm:$0xff] }
 0x2d7   :  { %2107 = vrot.lane.b32.xlu0 %v4788_v27, %s4962_s6 }
 0x2d8   :  { %v1939_v34 = vsel %vm532_vm0, %v1880_v38, %v1881_v4  ;;  %v1821_v14 = vpop.permute.xlu1 %1820  ;;  %v4793_v38 = vld [vmem:[#allocation7] sm:$0xff] }
 0x2d9   :  { %v1940_v62 = vsel %vm1899_vm6, %v1815_v32, %v1939_v34  ;;  %v1819_v10 = vpop.permute.xlu0 %1818  ;;  %v1883_v29 = vrot.slane %v1821_v14, 4  ;;  %v6356_v27 = vpack.c.bf16 %v4793_v38, %v4793_v38 }
 0x2da   :  { %2015 = vst [vmem:[#allocation8 + $0xaa0] sm:$0xff] %v1940_v62  ;;  %v1882_v61 = vrot.slane %v1819_v10, 4  ;;  %2113 = vrot.lane.b32.xlu1 %v4789_v25, %s4962_s6 }
 0x2db   :  { %2111 = vrot.lane.b32.xlu0 %v4790_v23, %s4962_s6 }
 0x2dc   :  { %v1941_v52 = vsel %vm532_vm0, %v1881_v4, %v1882_v61  ;;  %v1825_v9 = vpop.permute.xlu1 %1824 }
 0x2dd   :  { %v1942_v40 = vsel %vm1899_vm6, %v1817_v6, %v1941_v52  ;;  %v1823_v22 = vpop.permute.xlu0 %1822  ;;  %v1885_v49 = vrot.slane %v1825_v9, 4 }
 0x2de   :  { %2016 = vst [vmem:[#allocation8 + $0xaa8] sm:$0xff] %v1942_v40  ;;  %v1884_v28 = vrot.slane %v1823_v22, 4  ;;  %2117 = vrot.lane.b32.xlu1 %v4791_v30, %s4962_s6 }
 0x2df   :  { %2115 = vrot.lane.b32.xlu0 %v5266_v42, %s4962_s6 }
 0x2e0   :  { %v1943_v41 = vsel %vm532_vm0, %v1883_v29, %v1884_v28  ;;  %v1945_v20 = vsel %vm532_vm0, %v1884_v28, %v1885_v49  ;;  %v1829_v59 = vpop.permute.xlu1 %1828 }
 0x2e1   :  { %v1944_v24 = vsel %vm1899_vm6, %v1821_v14, %v1943_v41  ;;  %v1946_v53 = vsel %vm1899_vm6, %v1823_v22, %v1945_v20  ;;  %v1827_v50 = vpop.permute.xlu0 %1826  ;;  %v1887_v60 = vrot.slane %v1829_v59, 4 }
 0x2e2   :  { %2017 = vst [vmem:[#allocation8 + $0xab0] sm:$0xff] %v1944_v24  ;;  %2018 = vst [vmem:[#allocation8 + $0xab8] sm:$0xff] %v1946_v53  ;;  %v1886_v45 = vrot.slane %v1827_v50, 4  ;;  %2121 = vrot.lane.b32.xlu1 %v5272_v47, %s4962_s6  ;;  %v4795_v53 = vld [vmem:[#allocation7 + $0x20] sm:$0xff] }
 0x2e3   :  { %2119 = vrot.lane.b32.xlu0 %v4792_v19, %s4962_s6 }
 0x2e4   :  { %v1947_v42 = vsel %vm532_vm0, %v1886_v45, %v1887_v60  ;;  %v1833_v6 = vpop.permute.xlu1 %1832 }
 0x2e5   :  { %v1948_v48 = vsel %vm1899_vm6, %v1827_v50, %v1947_v42  ;;  %v1831_v32 = vpop.permute.xlu0 %1830  ;;  %v1889_v10 = vrot.slane %v1833_v6, 4 }
 0x2e6   :  { %2019 = vst [vmem:[#allocation8 + $0xca0] sm:$0xff] %v1948_v48  ;;  %v1888_v4 = vrot.slane %v1831_v32, 4  ;;  %2446 = vrot.lane.b32.xlu1 %v6074_v54, %s4955_s30  ;;  %v4794_v54 = vld [vmem:[#allocation7 + $0x10] sm:$0xff] }
 0x2e7   :  { %2444 = vrot.lane.b32.xlu0 %v6076_v11, %s4955_s30  ;;  %v6364_v11 = vpack.c.bf16 %v4794_v54, %v4794_v54 }
 0x2e8   :  { %v1949_v47 = vsel %vm532_vm0, %v1887_v60, %v1888_v4  ;;  %v1837_v62 = vpop.permute.xlu1 %1836 }
 0x2e9   :  { %v1950_v34 = vsel %vm1899_vm6, %v1829_v59, %v1949_v47  ;;  %v1835_v14 = vpop.permute.xlu0 %1834  ;;  %v1891_v61 = vrot.slane %v1837_v62, 4  ;;  %v6380_v59 = vpack.c.bf16 %v4795_v53, %v4795_v53 }
 0x2ea   :  { %2020 = vst [vmem:[#allocation8 + $0xca8] sm:$0xff] %v1950_v34  ;;  %v1890_v25 = vrot.slane %v1835_v14, 4  ;;  %2450 = vrot.lane.b32.xlu1 %v6088_v55, %s4955_s30 }
 0x2eb   :  { %2448 = vrot.lane.b32.xlu0 %v6356_v27, %s4955_s30 }
 0x2ec   :  { %v1951_v23 = vsel %vm532_vm0, %v1889_v10, %v1890_v25  ;;  %v1953_v52 = vsel %vm532_vm0, %v1890_v25, %v1891_v61  ;;  %v1841_v22 = vpop.permute.xlu1 %1840 }
 0x2ed   :  { %v1952_v40 = vsel %vm1899_vm6, %v1833_v6, %v1951_v23  ;;  %v1954_v9 = vsel %vm1899_vm6, %v1835_v14, %v1953_v52  ;;  %v1839_v29 = vpop.permute.xlu0 %1838  ;;  %v1893_v49 = vrot.slane %v1841_v22, 4  ;;  %v4797_v23 = vld [vmem:[#allocation7 + $0x40] sm:$0xff] }
 0x2ee   :  { %2021 = vst [vmem:[#allocation8 + $0xcb0] sm:$0xff] %v1952_v40  ;;  %2022 = vst [vmem:[#allocation8 + $0xcb8] sm:$0xff] %v1954_v9  ;;  %v1892_v55 = vrot.slane %v1839_v29, 4  ;;  %2454 = vrot.lane.b32.xlu1 %v6364_v11, %s4955_s30  ;;  %v6404_v52 = vpack.c.bf16 %v4797_v23, %v4797_v23 }
 0x2ef   :  { %2452 = vrot.lane.b32.xlu0 %v6097_v58, %s4955_s30 }
 0x2f0   :  { %v1955_v28 = vsel %vm532_vm0, %v1892_v55, %v1893_v49  ;;  %v1845_v41 = vpop.permute.xlu1 %1844 }
 0x2f1   :  { %v1956_v30 = vsel %vm1899_vm6, %v1839_v29, %v1955_v28  ;;  %v1843_v20 = vpop.permute.xlu0 %1842  ;;  %v1895_v19 = vrot.slane %v1845_v41, 4 }
 0x2f2   :  { %2023 = vst [vmem:[#allocation8 + $0xea0] sm:$0xff] %v1956_v30  ;;  %v1894_v24 = vrot.slane %v1843_v20, 4  ;;  %2458 = vrot.lane.b32.xlu1 %v6106_v37, %s4955_s30  ;;  %v4796_v37 = vld [vmem:[#allocation7 + $0x30] sm:$0xff] }
 0x2f3   :  { %2456 = vrot.lane.b32.xlu0 %v6108_v57, %s4955_s30  ;;  %v6388_v57 = vpack.c.bf16 %v4796_v37, %v4796_v37 }
 0x2f4   :  { %v1957_v50 = vsel %vm532_vm0, %v1893_v49, %v1894_v24  ;;  %v1849_v60 = vpop.permute.xlu1 %1848 }
 0x2f5   :  { %v1958_v58 = vsel %vm1899_vm6, %v1841_v22, %v1957_v50  ;;  %v1847_v45 = vpop.permute.xlu0 %1846  ;;  %v1897_v42 = vrot.slane %v1849_v60, 4 }
 0x2f6   :  { %2024 = vst [vmem:[#allocation8 + $0xea8] sm:$0xff] %v1958_v58  ;;  %v1896_v48 = vrot.slane %v1847_v45, 4  ;;  %2462 = vrot.lane.b32.xlu1 %v6120_v17, %s4955_s30 }
 0x2f7   :  { %2460 = vrot.lane.b32.xlu0 %v6380_v59, %s4955_s30 }
 0x2f8   :  { %v1959_v6 = vsel %vm532_vm0, %v1895_v19, %v1896_v48  ;;  %v1961_v32 = vsel %vm532_vm0, %v1896_v48, %v1897_v42  ;;  %v2030_v47 = vpop.permute.xlu1 %2029  ;;  %v4799_v48 = vld [vmem:[#allocation7 + $0x60] sm:$0xff] }
 0x2f9   :  { %v1960_v4 = vsel %vm1899_vm6, %v1845_v41, %v1959_v6  ;;  %v1962_v38 = vsel %vm1899_vm6, %v1847_v45, %v1961_v32  ;;  %v2028_v34 = vpop.permute.xlu0 %2027  ;;  %v2124_v62 = vrot.slane %v2030_v47, 4  ;;  %v6428_v37 = vpack.c.bf16 %v4799_v48, %v4799_v48 }
 0x2fa   :  { %2025 = vst [vmem:[#allocation8 + $0xeb0] sm:$0xff] %v1960_v4  ;;  %2026 = vst [vmem:[#allocation8 + $0xeb8] sm:$0xff] %v1962_v38  ;;  %v2123_v17 = vrot.slane %v2028_v34, 4  ;;  %2466 = vrot.lane.b32.xlu1 %v6388_v57, %s4955_s30 }
 0x2fb   :  { %2464 = vrot.lane.b32.xlu0 %v6129_v33, %s4955_s30 }
 0x2fc   :  { %v2171_v14 = vsel %vm532_vm0, %v2123_v17, %v2124_v62  ;;  %v2034_v61 = vpop.permute.xlu1 %2033 }
 0x2fd   :  { %v2173_v10 = vsel %vm2172_vm7, %v2028_v34, %v2171_v14  ;;  %v2032_v25 = vpop.permute.xlu0 %2031  ;;  %v2126_v29 = vrot.slane %v2034_v61, 4 }
 0x2fe   :  { %2268 = vst [vmem:[#allocation8 + $0xc0] sm:$0xff] %v2173_v10  ;;  %v2125_v54 = vrot.slane %v2032_v25, 4  ;;  %2470 = vrot.lane.b32.xlu1 %v6138_v36, %s4955_s30  ;;  %v4798_v36 = vld [vmem:[#allocation7 + $0x50] sm:$0xff] }
 0x2ff   :  { %2468 = vrot.lane.b32.xlu0 %v6140_v5, %s4955_s30  ;;  %v6412_v5 = vpack.c.bf16 %v4798_v36, %v4798_v36 }
 0x300   :  { %v2174_v40 = vsel %vm532_vm0, %v2124_v62, %v2125_v54  ;;  %v2038_v9 = vpop.permute.xlu1 %2037 }
 0x301   :  { %v2175_v33 = vsel %vm2172_vm7, %v2030_v47, %v2174_v40  ;;  %v2036_v22 = vpop.permute.xlu0 %2035  ;;  %v2128_v49 = vrot.slane %v2038_v9, 4 }
 0x302   :  { %2269 = vst [vmem:[#allocation8 + $0xc8] sm:$0xff] %v2175_v33  ;;  %v2127_v55 = vrot.slane %v2036_v22, 4  ;;  %2474 = vrot.lane.b32.xlu1 %v6152_v12, %s4955_s30 }
 0x303   :  { %2472 = vrot.lane.b32.xlu0 %v6404_v52, %s4955_s30 }
 0x304   :  { %v2176_v28 = vsel %vm532_vm0, %v2126_v29, %v2127_v55  ;;  %v2178_v30 = vsel %vm532_vm0, %v2127_v55, %v2128_v49  ;;  %v2042_v24 = vpop.permute.xlu1 %2041  ;;  %v4801_v29 = vld [vmem:[#allocation7 + $0x80] sm:$0xff] }
 0x305   :  { %v2177_v41 = vsel %vm2172_vm7, %v2034_v61, %v2176_v28  ;;  %v2179_v20 = vsel %vm2172_vm7, %v2036_v22, %v2178_v30  ;;  %v2040_v53 = vpop.permute.xlu0 %2039  ;;  %v2130_v50 = vrot.slane %v2042_v24, 4  ;;  %v6452_v49 = vpack.c.bf16 %v4801_v29, %v4801_v29 }
 0x306   :  { %2270 = vst [vmem:[#allocation8 + $0xd0] sm:$0xff] %v2177_v41  ;;  %2271 = vst [vmem:[#allocation8 + $0xd8] sm:$0xff] %v2179_v20  ;;  %v2129_v12 = vrot.slane %v2040_v53, 4  ;;  %2478 = vrot.lane.b32.xlu1 %v6412_v5, %s4955_s30 }
 0x307   :  { %2476 = vrot.lane.b32.xlu0 %v6161_v7, %s4955_s30 }
 0x308   :  { %v2180_v58 = vsel %vm532_vm0, %v2129_v12, %v2130_v50  ;;  %v2046_v45 = vpop.permute.xlu1 %2045 }
 0x309   :  { %v2181_v60 = vsel %vm2172_vm7, %v2040_v53, %v2180_v58  ;;  %v2044_v19 = vpop.permute.xlu0 %2043  ;;  %v2132_v38 = vrot.slane %v2046_v45, 4 }
 0x30a   :  { %2272 = vst [vmem:[#allocation8 + $0x2c0] sm:$0xff] %v2181_v60  ;;  %v2131_v42 = vrot.slane %v2044_v19, 4  ;;  %2482 = vrot.lane.b32.xlu1 %v6168_v31, %s4955_s30  ;;  %v4800_v31 = vld [vmem:[#allocation7 + $0x70] sm:$0xff] }
 0x30b   :  { %2480 = vrot.lane.b32.xlu0 %v6170_v21, %s4955_s30  ;;  %v6436_v21 = vpack.c.bf16 %v4800_v31, %v4800_v31 }
 0x30c   :  { %v2182_v6 = vsel %vm532_vm0, %v2130_v50, %v2131_v42  ;;  %v2050_v32 = vpop.permute.xlu1 %2049 }
 0x30d   :  { %v2183_v7 = vsel %vm2172_vm7, %v2042_v24, %v2182_v6  ;;  %v2048_v4 = vpop.permute.xlu0 %2047  ;;  %v2134_v47 = vrot.slane %v2050_v32, 4  ;;  %v4803_v32 = vld [vmem:[#allocation7 + $0xa0] sm:$0xff] }
 0x30e   :  { %2273 = vst [vmem:[#allocation8 + $0x2c8] sm:$0xff] %v2183_v7  ;;  %v2133_v34 = vrot.slane %v2048_v4, 4  ;;  %2486 = vrot.lane.b32.xlu1 %v6181_v56, %s4955_s30 }
 0x30f   :  { %2484 = vrot.lane.b32.xlu0 %v6428_v37, %s4955_s30 }
 0x310   :  { %v2184_v62 = vsel %vm532_vm0, %v2132_v38, %v2133_v34  ;;  %v2186_v17 = vsel %vm532_vm0, %v2133_v34, %v2134_v47  ;;  %v2054_v61 = vpop.permute.xlu1 %2053 }
 0x311   :  { %v2185_v14 = vsel %vm2172_vm7, %v2046_v45, %v2184_v62  ;;  %v2187_v10 = vsel %vm2172_vm7, %v2048_v4, %v2186_v17  ;;  %v2052_v25 = vpop.permute.xlu0 %2051  ;;  %v2136_v54 = vrot.slane %v2054_v61, 4  ;;  %v6476_v4 = vpack.c.bf16 %v4803_v32, %v4803_v32 }
 0x312   :  { %2274 = vst [vmem:[#allocation8 + $0x2d0] sm:$0xff] %v2185_v14  ;;  %2275 = vst [vmem:[#allocation8 + $0x2d8] sm:$0xff] %v2187_v10  ;;  %v2135_v56 = vrot.slane %v2052_v25, 4  ;;  %2490 = vrot.lane.b32.xlu1 %v6436_v21, %s4955_s30 }
 0x313   :  { %2488 = vrot.lane.b32.xlu0 %v6189_v44, %s4955_s30 }
 0x314   :  { %v2188_v23 = vsel %vm532_vm0, %v2135_v56, %v2136_v54  ;;  %v2058_v33 = vpop.permute.xlu1 %2057 }
 0x315   :  { %v2189_v40 = vsel %vm2172_vm7, %v2052_v25, %v2188_v23  ;;  %v2056_v9 = vpop.permute.xlu0 %2055  ;;  %v2138_v30 = vrot.slane %v2058_v33, 4 }
 0x316   :  { %2276 = vst [vmem:[#allocation8 + $0x4c0] sm:$0xff] %v2189_v40  ;;  %v2137_v22 = vrot.slane %v2056_v9, 4  ;;  %2494 = vrot.lane.b32.xlu1 %v6196_v46, %s4955_s30  ;;  %v4802_v46 = vld [vmem:[#allocation7 + $0x90] sm:$0xff] }
 0x317   :  { %2492 = vrot.lane.b32.xlu0 %v6198_v0, %s4955_s30  ;;  %v6460_v0 = vpack.c.bf16 %v4802_v46, %v4802_v46 }
 0x318   :  { %v2190_v55 = vsel %vm532_vm0, %v2136_v54, %v2137_v22  ;;  %v2062_v36 = vpop.permute.xlu1 %2061 }
 0x319   :  { %v2191_v44 = vsel %vm2172_vm7, %v2054_v61, %v2190_v55  ;;  %v2060_v28 = vpop.permute.xlu0 %2059  ;;  %v2140_v41 = vrot.slane %v2062_v36, 4  ;;  %v4805_v55 = vld [vmem:[#allocation7 + $0xc0] sm:$0xff] }
 0x31a   :  { %2277 = vst [vmem:[#allocation8 + $0x4c8] sm:$0xff] %v2191_v44  ;;  %v2139_v20 = vrot.slane %v2060_v28, 4  ;;  %2498 = vrot.lane.b32.xlu1 %v6209_v3, %s4955_s30  ;;  %v6500_v44 = vpack.c.bf16 %v4805_v55, %v4805_v55 }
 0x31b   :  { %2496 = vrot.lane.b32.xlu0 %v6452_v49, %s4955_s30 }
 0x31c   :  { %v2192_v24 = vsel %vm532_vm0, %v2138_v30, %v2139_v20  ;;  %v2194_v53 = vsel %vm532_vm0, %v2139_v20, %v2140_v41  ;;  %v2066_v58 = vpop.permute.xlu1 %2065 }
 0x31d   :  { %v2193_v50 = vsel %vm2172_vm7, %v2058_v33, %v2192_v24  ;;  %v2195_v12 = vsel %vm2172_vm7, %v2060_v28, %v2194_v53  ;;  %v2064_v60 = vpop.permute.xlu0 %2063  ;;  %v2142_v45 = vrot.slane %v2066_v58, 4 }
 0x31e   :  { %2278 = vst [vmem:[#allocation8 + $0x4d0] sm:$0xff] %v2193_v50  ;;  %2279 = vst [vmem:[#allocation8 + $0x4d8] sm:$0xff] %v2195_v12  ;;  %v2141_v3 = vrot.slane %v2064_v60, 4  ;;  %2502 = vrot.lane.b32.xlu1 %v6460_v0, %s4955_s30 }
 0x31f   :  { %2500 = vrot.lane.b32.xlu0 %v6217_v51, %s4955_s30 }
 0x320   :  { %v2196_v19 = vsel %vm532_vm0, %v2141_v3, %v2142_v45  ;;  %v2070_v48 = vpop.permute.xlu1 %2069 }
 0x321   :  { %v2197_v42 = vsel %vm2172_vm7, %v2064_v60, %v2196_v19  ;;  %v2068_v6 = vpop.permute.xlu0 %2067  ;;  %v2144_v31 = vrot.slane %v2070_v48, 4 }
 0x322   :  { %2280 = vst [vmem:[#allocation8 + $0x6c0] sm:$0xff] %v2197_v42  ;;  %v2143_v7 = vrot.slane %v2068_v6, 4  ;;  %2506 = vrot.lane.b32.xlu1 %v6224_v26, %s4955_s30  ;;  %v4804_v26 = vld [vmem:[#allocation7 + $0xb0] sm:$0xff] }
 0x323   :  { %2504 = vrot.lane.b32.xlu0 %v6226_v13, %s4955_s30  ;;  %v6484_v13 = vpack.c.bf16 %v4804_v26, %v4804_v26 }
 0x324   :  { %v2198_v38 = vsel %vm532_vm0, %v2142_v45, %v2143_v7  ;;  %v2074_v47 = vpop.permute.xlu1 %2073  ;;  %v4807_v7 = vld [vmem:[#allocation7 + $0xe0] sm:$0xff] }
 0x325   :  { %v2199_v51 = vsel %vm2172_vm7, %v2066_v58, %v2198_v38  ;;  %v2072_v34 = vpop.permute.xlu0 %2071  ;;  %v2146_v62 = vrot.slane %v2074_v47, 4  ;;  %v6524_v32 = vpack.c.bf16 %v4807_v7, %v4807_v7 }
 0x326   :  { %2281 = vst [vmem:[#allocation8 + $0x6c8] sm:$0xff] %v2199_v51  ;;  %v2145_v17 = vrot.slane %v2072_v34, 4  ;;  %2510 = vrot.lane.b32.xlu1 %v6237_v35, %s4955_s30 }
 0x327   :  { %2508 = vrot.lane.b32.xlu0 %v6476_v4, %s4955_s30 }
 0x328   :  { %v2200_v14 = vsel %vm532_vm0, %v2144_v31, %v2145_v17  ;;  %v2202_v10 = vsel %vm532_vm0, %v2145_v17, %v2146_v62  ;;  %v2078_v54 = vpop.permute.xlu1 %2077 }
 0x329   :  { %v2201_v61 = vsel %vm2172_vm7, %v2070_v48, %v2200_v14  ;;  %v2203_v25 = vsel %vm2172_vm7, %v2072_v34, %v2202_v10  ;;  %v2076_v56 = vpop.permute.xlu0 %2075  ;;  %v2148_v23 = vrot.slane %v2078_v54, 4 }
 0x32a   :  { %2282 = vst [vmem:[#allocation8 + $0x6d0] sm:$0xff] %v2201_v61  ;;  %2283 = vst [vmem:[#allocation8 + $0x6d8] sm:$0xff] %v2203_v25  ;;  %v2147_v35 = vrot.slane %v2076_v56, 4  ;;  %2514 = vrot.lane.b32.xlu1 %v6484_v13, %s4955_s30 }
 0x32b   :  { %2512 = vrot.lane.b32.xlu0 %v6245_v15, %s4955_s30 }
 0x32c   :  { %v2204_v40 = vsel %vm532_vm0, %v2147_v35, %v2148_v23  ;;  %v2082_v9 = vpop.permute.xlu1 %2081 }
 0x32d   :  { %v2205_v33 = vsel %vm2172_vm7, %v2076_v56, %v2204_v40  ;;  %v2080_v22 = vpop.permute.xlu0 %2079  ;;  %v2150_v41 = vrot.slane %v2082_v9, 4 }
 0x32e   :  { %2284 = vst [vmem:[#allocation8 + $0x8c0] sm:$0xff] %v2205_v33  ;;  %v2149_v29 = vrot.slane %v2080_v22, 4  ;;  %2518 = vrot.lane.b32.xlu1 %v6252_v43, %s4955_s30  ;;  %v4806_v43 = vld [vmem:[#allocation7 + $0xd0] sm:$0xff]  ;;  %v6548_v22 = vld [vmem:[#allocation8 + $0x1e0] sm:$0xff] }
 0x32f   :  { %2516 = vrot.lane.b32.xlu0 %v6254_v63, %s4955_s30  ;;  %v6508_v63 = vpack.c.bf16 %v4806_v43, %v4806_v43 }
 0x330   :  { %v2206_v36 = vsel %vm532_vm0, %v2148_v23, %v2149_v29  ;;  %v2086_v28 = vpop.permute.xlu1 %2085 }
 0x331   :  { %v2207_v15 = vsel %vm2172_vm7, %v2078_v54, %v2206_v36  ;;  %v2084_v30 = vpop.permute.xlu0 %2083  ;;  %v2152_v20 = vrot.slane %v2086_v28, 4 }
 0x332   :  { %2285 = vst [vmem:[#allocation8 + $0x8c8] sm:$0xff] %v2207_v15  ;;  %v2151_v46 = vrot.slane %v2084_v30, 4  ;;  %2522 = vrot.lane.b32.xlu1 %v6265_v16, %s4955_s30 }
 0x333   :  { %2520 = vrot.lane.b32.xlu0 %v6500_v44, %s4955_s30 }
 0x334   :  { %v2208_v24 = vsel %vm532_vm0, %v2150_v41, %v2151_v46  ;;  %v2210_v53 = vsel %vm532_vm0, %v2151_v46, %v2152_v20  ;;  %v2090_v58 = vpop.permute.xlu1 %2089  ;;  %v6554_v41 = vld [vmem:[#allocation8 + $0x1f0] sm:$0xff] }
 0x335   :  { %v2209_v50 = vsel %vm2172_vm7, %v2082_v9, %v2208_v24  ;;  %v2211_v12 = vsel %vm2172_vm7, %v2084_v30, %v2210_v53  ;;  %v2088_v60 = vpop.permute.xlu0 %2087  ;;  %v2154_v45 = vrot.slane %v2090_v58, 4  ;;  %v6544_v9 = vld [vmem:[#allocation8 + $0x1e8] sm:$0xff] }
 0x336   :  { %2286 = vst [vmem:[#allocation8 + $0x8d0] sm:$0xff] %v2209_v50  ;;  %2287 = vst [vmem:[#allocation8 + $0x8d8] sm:$0xff] %v2211_v12  ;;  %v2153_v16 = vrot.slane %v2088_v60, 4  ;;  %2526 = vrot.lane.b32.xlu1 %v6508_v63, %s4955_s30 }
 0x337   :  { %2524 = vrot.lane.b32.xlu0 %v6273_v18, %s4955_s30 }
 0x338   :  { %v2212_v3 = vsel %vm532_vm0, %v2153_v16, %v2154_v45  ;;  %v2094_v42 = vpop.permute.xlu1 %2093 }
 0x339   :  { %v2213_v19 = vsel %vm2172_vm7, %v2088_v60, %v2212_v3  ;;  %v2092_v48 = vpop.permute.xlu0 %2091  ;;  %v2156_v34 = vrot.slane %v2094_v42, 4  ;;  %v6566_v60 = vld [vmem:[#allocation8 + $0x1f8] sm:$0xff] }
 0x33a   :  { %2288 = vst [vmem:[#allocation8 + $0xac0] sm:$0xff] %v2213_v19  ;;  %v2155_v6 = vrot.slane %v2092_v48, 4  ;;  %2530 = vrot.lane.b32.xlu1 %v6280_v8, %s4955_s30  ;;  %v4808_v8 = vld [vmem:[#allocation7 + $0xf0] sm:$0xff]  ;;  %v6572_v48 = vld [vmem:[#allocation8 + $0x3e8] sm:$0xff] }
 0x33b   :  { %2528 = vrot.lane.b32.xlu0 %v6282_v39, %s4955_s30  ;;  %v6532_v39 = vpack.c.bf16 %v4808_v8, %v4808_v8 }
 0x33c   :  { %v2214_v38 = vsel %vm532_vm0, %v2154_v45, %v2155_v6  ;;  %v2098_v51 = vpop.permute.xlu1 %2097  ;;  %v6576_v6 = vld [vmem:[#allocation8 + $0x3e0] sm:$0xff] }
 0x33d   :  { %v2215_v18 = vsel %vm2172_vm7, %v2090_v58, %v2214_v38  ;;  %v2096_v47 = vpop.permute.xlu0 %2095  ;;  %v2158_v31 = vrot.slane %v2098_v51, 4 }
 0x33e   :  { %2289 = vst [vmem:[#allocation8 + $0xac8] sm:$0xff] %v2215_v18  ;;  %v2157_v62 = vrot.slane %v2096_v47, 4  ;;  %2534 = vrot.lane.b32.xlu1 %v6293_v1, %s4955_s30 }
 0x33f   :  { %2532 = vrot.lane.b32.xlu0 %v6524_v32, %s4955_s30 }
 0x340   :  { %v2216_v17 = vsel %vm532_vm0, %v2156_v34, %v2157_v62  ;;  %v2218_v26 = vsel %vm532_vm0, %v2157_v62, %v2158_v31  ;;  %v2102_v61 = vpop.permute.xlu1 %2101  ;;  %v6582_v62 = vld [vmem:[#allocation8 + $0x3f0] sm:$0xff] }
 0x341   :  { %v2217_v14 = vsel %vm2172_vm7, %v2094_v42, %v2216_v17  ;;  %v2219_v10 = vsel %vm2172_vm7, %v2096_v47, %v2218_v26  ;;  %v2100_v25 = vpop.permute.xlu0 %2099  ;;  %v2160_v54 = vrot.slane %v2102_v61, 4 }
 0x342   :  { %2290 = vst [vmem:[#allocation8 + $0xad0] sm:$0xff] %v2217_v14  ;;  %2291 = vst [vmem:[#allocation8 + $0xad8] sm:$0xff] %v2219_v10  ;;  %v2159_v1 = vrot.slane %v2100_v25, 4  ;;  %2538 = vrot.lane.b32.xlu1 %v6532_v39, %s4955_s30 }
 0x343   :  { %2536 = vrot.lane.b32.xlu0 %v6301_v2, %s4955_s30 }
 0x344   :  { %v2220_v56 = vsel %vm532_vm0, %v2159_v1, %v2160_v54  ;;  %v2106_v35 = vpop.permute.xlu1 %2105  ;;  %v6594_v1 = vld [vmem:[#allocation8 + $0x3f8] sm:$0xff] }
 0x345   :  { %v2221_v23 = vsel %vm2172_vm7, %v2100_v25, %v2220_v56  ;;  %v2104_v40 = vpop.permute.xlu0 %2103  ;;  %v2162_v15 = vrot.slane %v2106_v35, 4 }
 0x346   :  { %2292 = vst [vmem:[#allocation8 + $0xcc0] sm:$0xff] %v2221_v23  ;;  %v2161_v33 = vrot.slane %v2104_v40, 4  ;;  %2718 = vrot.lane.b32.xlu1 %v6544_v9, %s4957_s2 }
 0x347   :  { %2716 = vrot.lane.b32.xlu0 %v6548_v22, %s4957_s2 }
 0x348   :  { %v2222_v2 = vsel %vm532_vm0, %v2160_v54, %v2161_v33  ;;  %v2110_v55 = vpop.permute.xlu1 %2109 }
 0x349   :  { %v2223_v29 = vsel %vm2172_vm7, %v2102_v61, %v2222_v2  ;;  %v2108_v36 = vpop.permute.xlu0 %2107  ;;  %v2164_v28 = vrot.slane %v2110_v55, 4  ;;  %v6600_v2 = vld [vmem:[#allocation8 + $0x5e8] sm:$0xff] }
 0x34a   :  { %2293 = vst [vmem:[#allocation8 + $0xcc8] sm:$0xff] %v2223_v29  ;;  %v2163_v30 = vrot.slane %v2108_v36, 4  ;;  %2722 = vrot.lane.b32.xlu1 %v6554_v41, %s4957_s2  ;;  %v6604_v29 = vld [vmem:[#allocation8 + $0x5e0] sm:$0xff] }
 0x34b   :  { %2720 = vrot.lane.b32.xlu0 %v6356_v27, %s4957_s2 }
 0x34c   :  { %v2224_v20 = vsel %vm532_vm0, %v2162_v15, %v2163_v30  ;;  %v2226_v46 = vsel %vm532_vm0, %v2163_v30, %v2164_v28  ;;  %v2114_v53 = vpop.permute.xlu1 %2113 }
 0x34d   :  { %v2225_v43 = vsel %vm2172_vm7, %v2106_v35, %v2224_v20  ;;  %v2227_v24 = vsel %vm2172_vm7, %v2108_v36, %v2226_v46  ;;  %v2112_v50 = vpop.permute.xlu0 %2111  ;;  %v2166_v12 = vrot.slane %v2114_v53, 4 }
 0x34e   :  { %2294 = vst [vmem:[#allocation8 + $0xcd0] sm:$0xff] %v2225_v43  ;;  %2295 = vst [vmem:[#allocation8 + $0xcd8] sm:$0xff] %v2227_v24  ;;  %v2165_v58 = vrot.slane %v2112_v50, 4  ;;  %2726 = vrot.lane.b32.xlu1 %v6364_v11, %s4957_s2  ;;  %v6610_v43 = vld [vmem:[#allocation8 + $0x5f0] sm:$0xff] }
 0x34f   :  { %2724 = vrot.lane.b32.xlu0 %v6566_v60, %s4957_s2 }
 0x350   :  { %v2228_v45 = vsel %vm532_vm0, %v2165_v58, %v2166_v12  ;;  %v2118_v3 = vpop.permute.xlu1 %2117 }
 0x351   :  { %v2229_v16 = vsel %vm2172_vm7, %v2112_v50, %v2228_v45  ;;  %v2116_v19 = vpop.permute.xlu0 %2115  ;;  %v2168_v47 = vrot.slane %v2118_v3, 4 }
 0x352   :  { %2296 = vst [vmem:[#allocation8 + $0xec0] sm:$0xff] %v2229_v16  ;;  %v2167_v42 = vrot.slane %v2116_v19, 4  ;;  %2730 = vrot.lane.b32.xlu1 %v6572_v48, %s4957_s2  ;;  %v6622_v19 = vld [vmem:[#allocation8 + $0x5f8] sm:$0xff] }
 0x353   :  { %2728 = vrot.lane.b32.xlu0 %v6576_v6, %s4957_s2 }
 0x354   :  { %v2230_v7 = vsel %vm532_vm0, %v2166_v12, %v2167_v42  ;;  %v2122_v18 = vpop.permute.xlu1 %2121 }
 0x355   :  { %v2231_v38 = vsel %vm2172_vm7, %v2114_v53, %v2230_v7  ;;  %v2120_v51 = vpop.permute.xlu0 %2119  ;;  %v2170_v34 = vrot.slane %v2122_v18, 4 }
 0x356   :  { %2297 = vst [vmem:[#allocation8 + $0xec8] sm:$0xff] %v2231_v38  ;;  %v2169_v31 = vrot.slane %v2120_v51, 4  ;;  %2734 = vrot.lane.b32.xlu1 %v6582_v62, %s4957_s2 }
 0x357   :  { %2732 = vrot.lane.b32.xlu0 %v6380_v59, %s4957_s2 }
 0x358   :  { %v2232_v8 = vsel %vm532_vm0, %v2168_v47, %v2169_v31  ;;  %v2234_v17 = vsel %vm532_vm0, %v2169_v31, %v2170_v34  ;;  %v2447_v10 = vpop.permute.xlu1 %2446  ;;  %v6628_v47 = vld [vmem:[#allocation8 + $0x7e8] sm:$0xff]  ;;  %v6632_v34 = vld [vmem:[#allocation8 + $0x7e0] sm:$0xff] }
 0x359   :  { %v2233_v26 = vsel %vm2172_vm7, %v2118_v3, %v2232_v8  ;;  %v2235_v14 = vsel %vm2172_vm7, %v2120_v51, %v2234_v17  ;;  %v2445_v61 = vpop.permute.xlu0 %2444  ;;  %v2541_v25 = vrot.slane %v2447_v10, 4 }
 0x35a   :  { %2298 = vst [vmem:[#allocation8 + $0xed0] sm:$0xff] %v2233_v26  ;;  %2299 = vst [vmem:[#allocation8 + $0xed8] sm:$0xff] %v2235_v14  ;;  %v2540_v54 = vrot.slane %v2445_v61, 4  ;;  %2738 = vrot.lane.b32.xlu1 %v6388_v57, %s4957_s2 }
 0x35b   :  { %2736 = vrot.lane.b32.xlu0 %v6594_v1, %s4957_s2 }
 0x35c   :  { %v2588_v56 = vsel %vm532_vm0, %v2540_v54, %v2541_v25  ;;  %v2451_v35 = vpop.permute.xlu1 %2450 }
 0x35d   :  { %v2589_v23 = vsel %vm534_vm1, %v2445_v61, %v2588_v56  ;;  %v2449_v40 = vpop.permute.xlu0 %2448  ;;  %v2543_v30 = vrot.slane %v2451_v35, 4 }
 0x35e   :  { %2684 = vst [vmem:[#allocation8 + $0x100] sm:$0xff] %v2589_v23  ;;  %v2542_v33 = vrot.slane %v2449_v40, 4  ;;  %2742 = vrot.lane.b32.xlu1 %v6600_v2, %s4957_s2 }
 0x35f   :  { %2740 = vrot.lane.b32.xlu0 %v6604_v29, %s4957_s2 }
 0x360   :  { %v2590_v55 = vsel %vm532_vm0, %v2541_v25, %v2542_v33  ;;  %v2455_v15 = vpop.permute.xlu1 %2454  ;;  %v6638_v25 = vld [vmem:[#allocation8 + $0x7f0] sm:$0xff] }
 0x361   :  { %v2591_v36 = vsel %vm534_vm1, %v2447_v10, %v2590_v55  ;;  %v2453_v28 = vpop.permute.xlu0 %2452  ;;  %v2545_v20 = vrot.slane %v2455_v15, 4  ;;  %v6650_v15 = vld [vmem:[#allocation8 + $0x7f8] sm:$0xff] }
 0x362   :  { %2685 = vst [vmem:[#allocation8 + $0x108] sm:$0xff] %v2591_v36  ;;  %v2544_v46 = vrot.slane %v2453_v28, 4  ;;  %2746 = vrot.lane.b32.xlu1 %v6610_v43, %s4957_s2 }
 0x363   :  { %2744 = vrot.lane.b32.xlu0 %v6404_v52, %s4957_s2 }
 0x364   :  { %v2592_v24 = vsel %vm532_vm0, %v2543_v30, %v2544_v46  ;;  %v2594_v53 = vsel %vm532_vm0, %v2544_v46, %v2545_v20  ;;  %v2459_v58 = vpop.permute.xlu1 %2458 }
 0x365   :  { %v2593_v50 = vsel %vm534_vm1, %v2451_v35, %v2592_v24  ;;  %v2595_v12 = vsel %vm534_vm1, %v2453_v28, %v2594_v53  ;;  %v2457_v45 = vpop.permute.xlu0 %2456  ;;  %v2547_v16 = vrot.slane %v2459_v58, 4  ;;  %v6656_v53 = vld [vmem:[#allocation8 + $0x9e8] sm:$0xff] }
 0x366   :  { %2686 = vst [vmem:[#allocation8 + $0x110] sm:$0xff] %v2593_v50  ;;  %2687 = vst [vmem:[#allocation8 + $0x118] sm:$0xff] %v2595_v12  ;;  %v2546_v3 = vrot.slane %v2457_v45, 4  ;;  %2750 = vrot.lane.b32.xlu1 %v6412_v5, %s4957_s2  ;;  %v6660_v50 = vld [vmem:[#allocation8 + $0x9e0] sm:$0xff] }
 0x367   :  { %2748 = vrot.lane.b32.xlu0 %v6622_v19, %s4957_s2 }
 0x368   :  { %v2596_v42 = vsel %vm532_vm0, %v2546_v3, %v2547_v16  ;;  %v2463_v38 = vpop.permute.xlu1 %2462 }
 0x369   :  { %v2597_v7 = vsel %vm534_vm1, %v2457_v45, %v2596_v42  ;;  %v2461_v18 = vpop.permute.xlu0 %2460  ;;  %v2549_v14 = vrot.slane %v2463_v38, 4 }
 0x36a   :  { %2688 = vst [vmem:[#allocation8 + $0x300] sm:$0xff] %v2597_v7  ;;  %v2548_v51 = vrot.slane %v2461_v18, 4  ;;  %2754 = vrot.lane.b32.xlu1 %v6628_v47, %s4957_s2 }
 0x36b   :  { %2752 = vrot.lane.b32.xlu0 %v6632_v34, %s4957_s2 }
 0x36c   :  { %v2598_v31 = vsel %vm532_vm0, %v2547_v16, %v2548_v51  ;;  %v2467_v17 = vpop.permute.xlu1 %2466 }
 0x36d   :  { %v2599_v8 = vsel %vm534_vm1, %v2459_v58, %v2598_v31  ;;  %v2465_v26 = vpop.permute.xlu0 %2464  ;;  %v2551_v10 = vrot.slane %v2467_v17, 4 }
 0x36e   :  { %2689 = vst [vmem:[#allocation8 + $0x308] sm:$0xff] %v2599_v8  ;;  %v2550_v61 = vrot.slane %v2465_v26, 4  ;;  %2758 = vrot.lane.b32.xlu1 %v6638_v25, %s4957_s2 }
 0x36f   :  { %2756 = vrot.lane.b32.xlu0 %v6428_v37, %s4957_s2 }
 0x370   :  { %v2600_v54 = vsel %vm532_vm0, %v2549_v14, %v2550_v61  ;;  %v2602_v56 = vsel %vm532_vm0, %v2550_v61, %v2551_v10  ;;  %v2471_v40 = vpop.permute.xlu1 %2470  ;;  %v6678_v61 = vld [vmem:[#allocation8 + $0x9f8] sm:$0xff] }
 0x371   :  { %v2601_v23 = vsel %vm534_vm1, %v2463_v38, %v2600_v54  ;;  %v2603_v35 = vsel %vm534_vm1, %v2465_v26, %v2602_v56  ;;  %v2469_v33 = vpop.permute.xlu0 %2468  ;;  %v2553_v55 = vrot.slane %v2471_v40, 4  ;;  %v6666_v38 = vld [vmem:[#allocation8 + $0x9f0] sm:$0xff] }
 0x372   :  { %2690 = vst [vmem:[#allocation8 + $0x310] sm:$0xff] %v2601_v23  ;;  %2691 = vst [vmem:[#allocation8 + $0x318] sm:$0xff] %v2603_v35  ;;  %v2552_v36 = vrot.slane %v2469_v33, 4  ;;  %2762 = vrot.lane.b32.xlu1 %v6436_v21, %s4957_s2 }
 0x373   :  { %2760 = vrot.lane.b32.xlu0 %v6650_v15, %s4957_s2 }
 0x374   :  { %v2604_v28 = vsel %vm532_vm0, %v2552_v36, %v2553_v55  ;;  %v2475_v20 = vpop.permute.xlu1 %2474 }
 0x375   :  { %v2605_v30 = vsel %vm534_vm1, %v2469_v33, %v2604_v28  ;;  %v2473_v46 = vpop.permute.xlu0 %2472  ;;  %v2555_v3 = vrot.slane %v2475_v20, 4  ;;  %v6684_v33 = vld [vmem:[#allocation8 + $0xbe8] sm:$0xff] }
 0x376   :  { %2692 = vst [vmem:[#allocation8 + $0x500] sm:$0xff] %v2605_v30  ;;  %v2554_v24 = vrot.slane %v2473_v46, 4  ;;  %2766 = vrot.lane.b32.xlu1 %v6656_v53, %s4957_s2 }
 0x377   :  { %2764 = vrot.lane.b32.xlu0 %v6660_v50, %s4957_s2 }
 0x378   :  { %v2606_v12 = vsel %vm532_vm0, %v2553_v55, %v2554_v24  ;;  %v2479_v45 = vpop.permute.xlu1 %2478  ;;  %v6688_v55 = vld [vmem:[#allocation8 + $0xbe0] sm:$0xff] }
 0x379   :  { %v2607_v58 = vsel %vm534_vm1, %v2471_v40, %v2606_v12  ;;  %v2477_v16 = vpop.permute.xlu0 %2476  ;;  %v2557_v42 = vrot.slane %v2479_v45, 4 }
 0x37a   :  { %2693 = vst [vmem:[#allocation8 + $0x508] sm:$0xff] %v2607_v58  ;;  %v2556_v7 = vrot.slane %v2477_v16, 4  ;;  %2770 = vrot.lane.b32.xlu1 %v6666_v38, %s4957_s2  ;;  %v6694_v58 = vld [vmem:[#allocation8 + $0xbf0] sm:$0xff] }
 0x37b   :  { %2768 = vrot.lane.b32.xlu0 %v6452_v49, %s4957_s2 }
 0x37c   :  { %v2608_v18 = vsel %vm532_vm0, %v2555_v3, %v2556_v7  ;;  %v2610_v51 = vsel %vm532_vm0, %v2556_v7, %v2557_v42  ;;  %v2483_v17 = vpop.permute.xlu1 %2482 }
 0x37d   :  { %v2609_v31 = vsel %vm534_vm1, %v2475_v20, %v2608_v18  ;;  %v2611_v8 = vsel %vm534_vm1, %v2477_v16, %v2610_v51  ;;  %v2481_v26 = vpop.permute.xlu0 %2480  ;;  %v2559_v14 = vrot.slane %v2483_v17, 4 }
 0x37e   :  { %2694 = vst [vmem:[#allocation8 + $0x510] sm:$0xff] %v2609_v31  ;;  %2695 = vst [vmem:[#allocation8 + $0x518] sm:$0xff] %v2611_v8  ;;  %v2558_v10 = vrot.slane %v2481_v26, 4  ;;  %2774 = vrot.lane.b32.xlu1 %v6460_v0, %s4957_s2  ;;  %v6706_v8 = vld [vmem:[#allocation8 + $0xbf8] sm:$0xff] }
 0x37f   :  { %2772 = vrot.lane.b32.xlu0 %v6678_v61, %s4957_s2 }
 0x380   :  { %v2612_v54 = vsel %vm532_vm0, %v2558_v10, %v2559_v14  ;;  %v2487_v23 = vpop.permute.xlu1 %2486 }
 0x381   :  { %v2613_v56 = vsel %vm534_vm1, %v2481_v26, %v2612_v54  ;;  %v2485_v35 = vpop.permute.xlu0 %2484  ;;  %v2561_v46 = vrot.slane %v2487_v23, 4 }
 0x382   :  { %2696 = vst [vmem:[#allocation8 + $0x700] sm:$0xff] %v2613_v56  ;;  %v2560_v40 = vrot.slane %v2485_v35, 4  ;;  %2778 = vrot.lane.b32.xlu1 %v6684_v33, %s4957_s2  ;;  %v6712_v56 = vld [vmem:[#allocation8 + $0xde8] sm:$0xff] }
 0x383   :  { %2776 = vrot.lane.b32.xlu0 %v6688_v55, %s4957_s2 }
 0x384   :  { %v2614_v36 = vsel %vm532_vm0, %v2559_v14, %v2560_v40  ;;  %v2491_v30 = vpop.permute.xlu1 %2490 }
 0x385   :  { %v2615_v28 = vsel %vm534_vm1, %v2483_v17, %v2614_v36  ;;  %v2489_v20 = vpop.permute.xlu0 %2488  ;;  %v2563_v24 = vrot.slane %v2491_v30, 4 }
 0x386   :  { %2697 = vst [vmem:[#allocation8 + $0x708] sm:$0xff] %v2615_v28  ;;  %v2562_v12 = vrot.slane %v2489_v20, 4  ;;  %2782 = vrot.lane.b32.xlu1 %v6694_v58, %s4957_s2 }
 0x387   :  { %2780 = vrot.lane.b32.xlu0 %v6476_v4, %s4957_s2 }
 0x388   :  { %v2616_v45 = vsel %vm532_vm0, %v2561_v46, %v2562_v12  ;;  %v2618_v16 = vsel %vm532_vm0, %v2562_v12, %v2563_v24  ;;  %v2495_v7 = vpop.permute.xlu1 %2494  ;;  %v6722_v24 = vld [vmem:[#allocation8 + $0xdf0] sm:$0xff] }
 0x389   :  { %v2617_v3 = vsel %vm534_vm1, %v2487_v23, %v2616_v45  ;;  %v2619_v42 = vsel %vm534_vm1, %v2489_v20, %v2618_v16  ;;  %v2493_v18 = vpop.permute.xlu0 %2492  ;;  %v2565_v51 = vrot.slane %v2495_v7, 4  ;;  %v6716_v23 = vld [vmem:[#allocation8 + $0xde0] sm:$0xff] }
 0x38a   :  { %2698 = vst [vmem:[#allocation8 + $0x710] sm:$0xff] %v2617_v3  ;;  %2699 = vst [vmem:[#allocation8 + $0x718] sm:$0xff] %v2619_v42  ;;  %v2564_v31 = vrot.slane %v2493_v18, 4  ;;  %2786 = vrot.lane.b32.xlu1 %v6484_v13, %s4957_s2 }
 0x38b   :  { %2784 = vrot.lane.b32.xlu0 %v6706_v8, %s4957_s2 }
 0x38c   :  { %v2620_v17 = vsel %vm532_vm0, %v2564_v31, %v2565_v51  ;;  %v2499_v14 = vpop.permute.xlu1 %2498  ;;  %v6734_v31 = vld [vmem:[#allocation8 + $0xdf8] sm:$0xff] }
 0x38d   :  { %v2621_v26 = vsel %vm534_vm1, %v2493_v18, %v2620_v17  ;;  %v2497_v10 = vpop.permute.xlu0 %2496  ;;  %v2567_v30 = vrot.slane %v2499_v14, 4 }
 0x38e   :  { %2700 = vst [vmem:[#allocation8 + $0x900] sm:$0xff] %v2621_v26  ;;  %v2566_v54 = vrot.slane %v2497_v10, 4  ;;  %2790 = vrot.lane.b32.xlu1 %v6712_v56, %s4957_s2 }
 0x38f   :  { %2788 = vrot.lane.b32.xlu0 %v6716_v23, %s4957_s2 }
 0x390   :  { %v2622_v35 = vsel %vm532_vm0, %v2565_v51, %v2566_v54  ;;  %v2503_v36 = vpop.permute.xlu1 %2502 }
 0x391   :  { %v2623_v40 = vsel %vm534_vm1, %v2495_v7, %v2622_v35  ;;  %v2501_v28 = vpop.permute.xlu0 %2500  ;;  %v2569_v20 = vrot.slane %v2503_v36, 4  ;;  %v6740_v35 = vld [vmem:[#allocation8 + $0xfe8] sm:$0xff] }
 0x392   :  { %2701 = vst [vmem:[#allocation8 + $0x908] sm:$0xff] %v2623_v40  ;;  %v2568_v46 = vrot.slane %v2501_v28, 4  ;;  %2794 = vrot.lane.b32.xlu1 %v6722_v24, %s4957_s2  ;;  %v6744_v40 = vld [vmem:[#allocation8 + $0xfe0] sm:$0xff] }
 0x393   :  { %2792 = vrot.lane.b32.xlu0 %v6500_v44, %s4957_s2 }
 0x394   :  { %v2624_v12 = vsel %vm532_vm0, %v2567_v30, %v2568_v46  ;;  %v2626_v45 = vsel %vm532_vm0, %v2568_v46, %v2569_v20  ;;  %v2507_v42 = vpop.permute.xlu1 %2506 }
 0x395   :  { %v2625_v16 = vsel %vm534_vm1, %v2499_v14, %v2624_v12  ;;  %v2627_v3 = vsel %vm534_vm1, %v2501_v28, %v2626_v45  ;;  %v2505_v7 = vpop.permute.xlu0 %2504  ;;  %v2571_v18 = vrot.slane %v2507_v42, 4 }
 0x396   :  { %2702 = vst [vmem:[#allocation8 + $0x910] sm:$0xff] %v2625_v16  ;;  %2703 = vst [vmem:[#allocation8 + $0x918] sm:$0xff] %v2627_v3  ;;  %v2570_v51 = vrot.slane %v2505_v7, 4  ;;  %2798 = vrot.lane.b32.xlu1 %v6508_v63, %s4957_s2  ;;  %v6750_v16 = vld [vmem:[#allocation8 + $0xff0] sm:$0xff] }
 0x397   :  { %2796 = vrot.lane.b32.xlu0 %v6734_v31, %s4957_s2 }
 0x398   :  { %v2628_v17 = vsel %vm532_vm0, %v2570_v51, %v2571_v18  ;;  %v2511_v14 = vpop.permute.xlu1 %2510 }
 0x399   :  { %v2629_v26 = vsel %vm534_vm1, %v2505_v7, %v2628_v17  ;;  %v2509_v10 = vpop.permute.xlu0 %2508  ;;  %v2573_v46 = vrot.slane %v2511_v14, 4 }
 0x39a   :  { %2704 = vst [vmem:[#allocation8 + $0xb00] sm:$0xff] %v2629_v26  ;;  %v2572_v54 = vrot.slane %v2509_v10, 4  ;;  %2802 = vrot.lane.b32.xlu1 %v6740_v35, %s4957_s2 }
 0x39b   :  { %2800 = vrot.lane.b32.xlu0 %v6744_v40, %s4957_s2 }
 0x39c   :  { %v2630_v36 = vsel %vm532_vm0, %v2571_v18, %v2572_v54  ;;  %v2515_v30 = vpop.permute.xlu1 %2514  ;;  %v6762_v54 = vld [vmem:[#allocation8 + $0xff8] sm:$0xff] }
 0x39d   :  { %v2631_v28 = vsel %vm534_vm1, %v2507_v42, %v2630_v36  ;;  %v2513_v20 = vpop.permute.xlu0 %2512  ;;  %v2575_v12 = vrot.slane %v2515_v30, 4 }
 0x39e   :  { %2705 = vst [vmem:[#allocation8 + $0xb08] sm:$0xff] %v2631_v28  ;;  %v2574_v45 = vrot.slane %v2513_v20, 4  ;;  %2806 = vrot.lane.b32.xlu1 %v6750_v16, %s4957_s2 }
 0x39f   :  { %2804 = vrot.lane.b32.xlu0 %v6524_v32, %s4957_s2 }
 0x3a0   :  { %v2632_v3 = vsel %vm532_vm0, %v2573_v46, %v2574_v45  ;;  %v2634_v7 = vsel %vm532_vm0, %v2574_v45, %v2575_v12  ;;  %v2519_v51 = vpop.permute.xlu1 %2518 }
 0x3a1   :  { %v2633_v42 = vsel %vm534_vm1, %v2511_v14, %v2632_v3  ;;  %v2635_v18 = vsel %vm534_vm1, %v2513_v20, %v2634_v7  ;;  %v2517_v17 = vpop.permute.xlu0 %2516  ;;  %v2577_v26 = vrot.slane %v2519_v51, 4 }
 0x3a2   :  { %2706 = vst [vmem:[#allocation8 + $0xb10] sm:$0xff] %v2633_v42  ;;  %2707 = vst [vmem:[#allocation8 + $0xb18] sm:$0xff] %v2635_v18  ;;  %v2576_v10 = vrot.slane %v2517_v17, 4  ;;  %2810 = vrot.lane.b32.xlu1 %v6532_v39, %s4957_s2 }
 0x3a3   :  { %2808 = vrot.lane.b32.xlu0 %v6762_v54, %s4957_s2 }
 0x3a4   :  { %v2636_v36 = vsel %vm532_vm0, %v2576_v10, %v2577_v26  ;;  %v2523_v28 = vpop.permute.xlu1 %2522 }
 0x3a5   :  { %v2637_v14 = vsel %vm534_vm1, %v2517_v17, %v2636_v36  ;;  %v2521_v30 = vpop.permute.xlu0 %2520  ;;  %v2579_v7 = vrot.slane %v2523_v28, 4 }
 0x3a6   :  { %2708 = vst [vmem:[#allocation8 + $0xd00] sm:$0xff] %v2637_v14  ;;  %v2578_v20 = vrot.slane %v2521_v30, 4  ;;  %2990 = vrot.lane.b32.xlu1 %v6544_v9, %s4958_s18 }
 0x3a7   :  { %2988 = vrot.lane.b32.xlu0 %v6548_v22, %s4958_s18 }
 0x3a8   :  { %v2638_v46 = vsel %vm532_vm0, %v2577_v26, %v2578_v20  ;;  %v2527_v45 = vpop.permute.xlu1 %2526 }
 0x3a9   :  { %v2639_v12 = vsel %vm534_vm1, %v2519_v51, %v2638_v46  ;;  %v2525_v3 = vpop.permute.xlu0 %2524  ;;  %v2581_v42 = vrot.slane %v2527_v45, 4 }
 0x3aa   :  { %2709 = vst [vmem:[#allocation8 + $0xd08] sm:$0xff] %v2639_v12  ;;  %v2580_v18 = vrot.slane %v2525_v3, 4  ;;  %2994 = vrot.lane.b32.xlu1 %v6554_v41, %s4958_s18 }
 0x3ab   :  { %2992 = vrot.lane.b32.xlu0 %v6356_v27, %s4958_s18 }
 0x3ac   :  { %v2640_v17 = vsel %vm532_vm0, %v2579_v7, %v2580_v18  ;;  %v2642_v10 = vsel %vm532_vm0, %v2580_v18, %v2581_v42  ;;  %v2531_v36 = vpop.permute.xlu1 %2530 }
 0x3ad   :  { %v2641_v26 = vsel %vm534_vm1, %v2523_v28, %v2640_v17  ;;  %v2643_v51 = vsel %vm534_vm1, %v2525_v3, %v2642_v10  ;;  %v2529_v14 = vpop.permute.xlu0 %2528  ;;  %v2583_v30 = vrot.slane %v2531_v36, 4 }
 0x3ae   :  { %2710 = vst [vmem:[#allocation8 + $0xd10] sm:$0xff] %v2641_v26  ;;  %2711 = vst [vmem:[#allocation8 + $0xd18] sm:$0xff] %v2643_v51  ;;  %v2582_v20 = vrot.slane %v2529_v14, 4  ;;  %2998 = vrot.lane.b32.xlu1 %v6364_v11, %s4958_s18 }
 0x3af   :  { %2996 = vrot.lane.b32.xlu0 %v6566_v60, %s4958_s18 }
 0x3b0   :  { %v2644_v46 = vsel %vm532_vm0, %v2582_v20, %v2583_v30  ;;  %v2535_v45 = vpop.permute.xlu1 %2534 }
 0x3b1   :  { %v2645_v12 = vsel %vm534_vm1, %v2529_v14, %v2644_v46  ;;  %v2533_v28 = vpop.permute.xlu0 %2532  ;;  %v2585_v10 = vrot.slane %v2535_v45, 4 }
 0x3b2   :  { %2712 = vst [vmem:[#allocation8 + $0xf00] sm:$0xff] %v2645_v12  ;;  %v2584_v3 = vrot.slane %v2533_v28, 4  ;;  %3002 = vrot.lane.b32.xlu1 %v6572_v48, %s4958_s18 }
 0x3b3   :  { %3000 = vrot.lane.b32.xlu0 %v6576_v6, %s4958_s18 }
 0x3b4   :  { %v2646_v7 = vsel %vm532_vm0, %v2583_v30, %v2584_v3  ;;  %v2539_v18 = vpop.permute.xlu1 %2538 }
 0x3b5   :  { %v2647_v42 = vsel %vm534_vm1, %v2531_v36, %v2646_v7  ;;  %v2537_v17 = vpop.permute.xlu0 %2536  ;;  %v2587_v26 = vrot.slane %v2539_v18, 4 }
 0x3b6   :  { %2713 = vst [vmem:[#allocation8 + $0xf08] sm:$0xff] %v2647_v42  ;;  %v2586_v51 = vrot.slane %v2537_v17, 4  ;;  %3006 = vrot.lane.b32.xlu1 %v6582_v62, %s4958_s18 }
 0x3b7   :  { %3004 = vrot.lane.b32.xlu0 %v6380_v59, %s4958_s18 }
 0x3b8   :  { %v2648_v14 = vsel %vm532_vm0, %v2585_v10, %v2586_v51  ;;  %v2650_v20 = vsel %vm532_vm0, %v2586_v51, %v2587_v26  ;;  %v2719_v46 = vpop.permute.xlu1 %2718 }
 0x3b9   :  { %v2649_v30 = vsel %vm534_vm1, %v2535_v45, %v2648_v14  ;;  %v2651_v36 = vsel %vm534_vm1, %v2537_v17, %v2650_v20  ;;  %v2717_v12 = vpop.permute.xlu0 %2716  ;;  %v2813_v28 = vrot.slane %v2719_v46, 4 }
 0x3ba   :  { %2714 = vst [vmem:[#allocation8 + $0xf10] sm:$0xff] %v2649_v30  ;;  %2715 = vst [vmem:[#allocation8 + $0xf18] sm:$0xff] %v2651_v36  ;;  %v2812_v3 = vrot.slane %v2717_v12, 4  ;;  %3010 = vrot.lane.b32.xlu1 %v6388_v57, %s4958_s18 }
 0x3bb   :  { %3008 = vrot.lane.b32.xlu0 %v6594_v1, %s4958_s18 }
 0x3bc   :  { %v2860_v7 = vsel %vm532_vm0, %v2812_v3, %v2813_v28  ;;  %v2723_v18 = vpop.permute.xlu1 %2722 }
 0x3bd   :  { %v2861_v42 = vsel %vm807_vm2, %v2717_v12, %v2860_v7  ;;  %v2721_v45 = vpop.permute.xlu0 %2720  ;;  %v2815_v20 = vrot.slane %v2723_v18, 4 }
 0x3be   :  { %2956 = vst [vmem:[#allocation8 + $0x120] sm:$0xff] %v2861_v42  ;;  %v2814_v17 = vrot.slane %v2721_v45, 4  ;;  %3014 = vrot.lane.b32.xlu1 %v6600_v2, %s4958_s18 }
 0x3bf   :  { %3012 = vrot.lane.b32.xlu0 %v6604_v29, %s4958_s18 }
 0x3c0   :  { %v2862_v10 = vsel %vm532_vm0, %v2813_v28, %v2814_v17  ;;  %v2727_v51 = vpop.permute.xlu1 %2726 }
 0x3c1   :  { %v2863_v26 = vsel %vm807_vm2, %v2719_v46, %v2862_v10  ;;  %v2725_v14 = vpop.permute.xlu0 %2724  ;;  %v2817_v30 = vrot.slane %v2727_v51, 4 }
 0x3c2   :  { %2957 = vst [vmem:[#allocation8 + $0x128] sm:$0xff] %v2863_v26  ;;  %v2816_v36 = vrot.slane %v2725_v14, 4  ;;  %3018 = vrot.lane.b32.xlu1 %v6610_v43, %s4958_s18 }
 0x3c3   :  { %3016 = vrot.lane.b32.xlu0 %v6404_v52, %s4958_s18 }
 0x3c4   :  { %v2864_v12 = vsel %vm532_vm0, %v2815_v20, %v2816_v36  ;;  %v2866_v3 = vsel %vm532_vm0, %v2816_v36, %v2817_v30  ;;  %v2731_v7 = vpop.permute.xlu1 %2730 }
 0x3c5   :  { %v2865_v28 = vsel %vm807_vm2, %v2723_v18, %v2864_v12  ;;  %v2867_v46 = vsel %vm807_vm2, %v2725_v14, %v2866_v3  ;;  %v2729_v42 = vpop.permute.xlu0 %2728  ;;  %v2819_v45 = vrot.slane %v2731_v7, 4 }
 0x3c6   :  { %2958 = vst [vmem:[#allocation8 + $0x130] sm:$0xff] %v2865_v28  ;;  %2959 = vst [vmem:[#allocation8 + $0x138] sm:$0xff] %v2867_v46  ;;  %v2818_v17 = vrot.slane %v2729_v42, 4  ;;  %3022 = vrot.lane.b32.xlu1 %v6412_v5, %s4958_s18 }
 0x3c7   :  { %3020 = vrot.lane.b32.xlu0 %v6622_v19, %s4958_s18 }
 0x3c8   :  { %v2868_v10 = vsel %vm532_vm0, %v2818_v17, %v2819_v45  ;;  %v2735_v51 = vpop.permute.xlu1 %2734 }
 0x3c9   :  { %v2869_v26 = vsel %vm807_vm2, %v2729_v42, %v2868_v10  ;;  %v2733_v18 = vpop.permute.xlu0 %2732  ;;  %v2821_v3 = vrot.slane %v2735_v51, 4 }
 0x3ca   :  { %2960 = vst [vmem:[#allocation8 + $0x320] sm:$0xff] %v2869_v26  ;;  %v2820_v14 = vrot.slane %v2733_v18, 4  ;;  %3026 = vrot.lane.b32.xlu1 %v6628_v47, %s4958_s18 }
 0x3cb   :  { %3024 = vrot.lane.b32.xlu0 %v6632_v34, %s4958_s18 }
 0x3cc   :  { %v2870_v20 = vsel %vm532_vm0, %v2819_v45, %v2820_v14  ;;  %v2739_v36 = vpop.permute.xlu1 %2738 }
 0x3cd   :  { %v2871_v30 = vsel %vm807_vm2, %v2731_v7, %v2870_v20  ;;  %v2737_v12 = vpop.permute.xlu0 %2736  ;;  %v2823_v28 = vrot.slane %v2739_v36, 4 }
 0x3ce   :  { %2961 = vst [vmem:[#allocation8 + $0x328] sm:$0xff] %v2871_v30  ;;  %v2822_v46 = vrot.slane %v2737_v12, 4  ;;  %3030 = vrot.lane.b32.xlu1 %v6638_v25, %s4958_s18 }
 0x3cf   :  { %3028 = vrot.lane.b32.xlu0 %v6428_v37, %s4958_s18 }
 0x3d0   :  { %v2872_v42 = vsel %vm532_vm0, %v2821_v3, %v2822_v46  ;;  %v2874_v17 = vsel %vm532_vm0, %v2822_v46, %v2823_v28  ;;  %v2743_v10 = vpop.permute.xlu1 %2742 }
 0x3d1   :  { %v2873_v45 = vsel %vm807_vm2, %v2735_v51, %v2872_v42  ;;  %v2875_v7 = vsel %vm807_vm2, %v2737_v12, %v2874_v17  ;;  %v2741_v26 = vpop.permute.xlu0 %2740  ;;  %v2825_v18 = vrot.slane %v2743_v10, 4 }
 0x3d2   :  { %2962 = vst [vmem:[#allocation8 + $0x330] sm:$0xff] %v2873_v45  ;;  %2963 = vst [vmem:[#allocation8 + $0x338] sm:$0xff] %v2875_v7  ;;  %v2824_v14 = vrot.slane %v2741_v26, 4  ;;  %3034 = vrot.lane.b32.xlu1 %v6436_v21, %s4958_s18 }
 0x3d3   :  { %3032 = vrot.lane.b32.xlu0 %v6650_v15, %s4958_s18 }
 0x3d4   :  { %v2876_v20 = vsel %vm532_vm0, %v2824_v14, %v2825_v18  ;;  %v2747_v36 = vpop.permute.xlu1 %2746 }
 0x3d5   :  { %v2877_v30 = vsel %vm807_vm2, %v2741_v26, %v2876_v20  ;;  %v2745_v51 = vpop.permute.xlu0 %2744  ;;  %v2827_v17 = vrot.slane %v2747_v36, 4 }
 0x3d6   :  { %2964 = vst [vmem:[#allocation8 + $0x520] sm:$0xff] %v2877_v30  ;;  %v2826_v12 = vrot.slane %v2745_v51, 4  ;;  %3038 = vrot.lane.b32.xlu1 %v6656_v53, %s4958_s18 }
 0x3d7   :  { %3036 = vrot.lane.b32.xlu0 %v6660_v50, %s4958_s18 }
 0x3d8   :  { %v2878_v3 = vsel %vm532_vm0, %v2825_v18, %v2826_v12  ;;  %v2751_v46 = vpop.permute.xlu1 %2750 }
 0x3d9   :  { %v2879_v28 = vsel %vm807_vm2, %v2743_v10, %v2878_v3  ;;  %v2749_v42 = vpop.permute.xlu0 %2748  ;;  %v2829_v45 = vrot.slane %v2751_v46, 4 }
 0x3da   :  { %2965 = vst [vmem:[#allocation8 + $0x528] sm:$0xff] %v2879_v28  ;;  %v2828_v7 = vrot.slane %v2749_v42, 4  ;;  %3042 = vrot.lane.b32.xlu1 %v6666_v38, %s4958_s18 }
 0x3db   :  { %3040 = vrot.lane.b32.xlu0 %v6452_v49, %s4958_s18 }
 0x3dc   :  { %v2880_v26 = vsel %vm532_vm0, %v2827_v17, %v2828_v7  ;;  %v2882_v14 = vsel %vm532_vm0, %v2828_v7, %v2829_v45  ;;  %v2755_v20 = vpop.permute.xlu1 %2754 }
 0x3dd   :  { %v2881_v18 = vsel %vm807_vm2, %v2747_v36, %v2880_v26  ;;  %v2883_v10 = vsel %vm807_vm2, %v2749_v42, %v2882_v14  ;;  %v2753_v30 = vpop.permute.xlu0 %2752  ;;  %v2831_v51 = vrot.slane %v2755_v20, 4 }
 0x3de   :  { %2966 = vst [vmem:[#allocation8 + $0x530] sm:$0xff] %v2881_v18  ;;  %2967 = vst [vmem:[#allocation8 + $0x538] sm:$0xff] %v2883_v10  ;;  %v2830_v12 = vrot.slane %v2753_v30, 4  ;;  %3046 = vrot.lane.b32.xlu1 %v6460_v0, %s4958_s18 }
 0x3df   :  { %3044 = vrot.lane.b32.xlu0 %v6678_v61, %s4958_s18 }
 0x3e0   :  { %v2884_v3 = vsel %vm532_vm0, %v2830_v12, %v2831_v51  ;;  %v2759_v46 = vpop.permute.xlu1 %2758 }
 0x3e1   :  { %v2885_v28 = vsel %vm807_vm2, %v2753_v30, %v2884_v3  ;;  %v2757_v36 = vpop.permute.xlu0 %2756  ;;  %v2833_v14 = vrot.slane %v2759_v46, 4 }
 0x3e2   :  { %2968 = vst [vmem:[#allocation8 + $0x720] sm:$0xff] %v2885_v28  ;;  %v2832_v42 = vrot.slane %v2757_v36, 4  ;;  %3050 = vrot.lane.b32.xlu1 %v6684_v33, %s4958_s18 }
 0x3e3   :  { %3048 = vrot.lane.b32.xlu0 %v6688_v55, %s4958_s18 }
 0x3e4   :  { %v2886_v17 = vsel %vm532_vm0, %v2831_v51, %v2832_v42  ;;  %v2763_v7 = vpop.permute.xlu1 %2762 }
 0x3e5   :  { %v2887_v45 = vsel %vm807_vm2, %v2755_v20, %v2886_v17  ;;  %v2761_v26 = vpop.permute.xlu0 %2760  ;;  %v2835_v18 = vrot.slane %v2763_v7, 4 }
 0x3e6   :  { %2969 = vst [vmem:[#allocation8 + $0x728] sm:$0xff] %v2887_v45  ;;  %v2834_v10 = vrot.slane %v2761_v26, 4  ;;  %3054 = vrot.lane.b32.xlu1 %v6694_v58, %s4958_s18 }
 0x3e7   :  { %3052 = vrot.lane.b32.xlu0 %v6476_v4, %s4958_s18 }
 0x3e8   :  { %v2888_v30 = vsel %vm532_vm0, %v2833_v14, %v2834_v10  ;;  %v2890_v12 = vsel %vm532_vm0, %v2834_v10, %v2835_v18  ;;  %v2767_v3 = vpop.permute.xlu1 %2766 }
 0x3e9   :  { %v2889_v51 = vsel %vm807_vm2, %v2759_v46, %v2888_v30  ;;  %v2891_v20 = vsel %vm807_vm2, %v2761_v26, %v2890_v12  ;;  %v2765_v28 = vpop.permute.xlu0 %2764  ;;  %v2837_v36 = vrot.slane %v2767_v3, 4 }
 0x3ea   :  { %2970 = vst [vmem:[#allocation8 + $0x730] sm:$0xff] %v2889_v51  ;;  %2971 = vst [vmem:[#allocation8 + $0x738] sm:$0xff] %v2891_v20  ;;  %v2836_v42 = vrot.slane %v2765_v28, 4  ;;  %3058 = vrot.lane.b32.xlu1 %v6484_v13, %s4958_s18 }
 0x3eb   :  { %3056 = vrot.lane.b32.xlu0 %v6706_v8, %s4958_s18 }
 0x3ec   :  { %v2892_v17 = vsel %vm532_vm0, %v2836_v42, %v2837_v36  ;;  %v2771_v7 = vpop.permute.xlu1 %2770 }
 0x3ed   :  { %v2893_v45 = vsel %vm807_vm2, %v2765_v28, %v2892_v17  ;;  %v2769_v46 = vpop.permute.xlu0 %2768  ;;  %v2839_v12 = vrot.slane %v2771_v7, 4 }
 0x3ee   :  { %2972 = vst [vmem:[#allocation8 + $0x920] sm:$0xff] %v2893_v45  ;;  %v2838_v26 = vrot.slane %v2769_v46, 4  ;;  %3062 = vrot.lane.b32.xlu1 %v6712_v56, %s4958_s18 }
 0x3ef   :  { %3060 = vrot.lane.b32.xlu0 %v6716_v23, %s4958_s18 }
 0x3f0   :  { %v2894_v14 = vsel %vm532_vm0, %v2837_v36, %v2838_v26  ;;  %v2775_v10 = vpop.permute.xlu1 %2774 }
 0x3f1   :  { %v2895_v18 = vsel %vm807_vm2, %v2767_v3, %v2894_v14  ;;  %v2773_v30 = vpop.permute.xlu0 %2772  ;;  %v2841_v51 = vrot.slane %v2775_v10, 4 }
 0x3f2   :  { %2973 = vst [vmem:[#allocation8 + $0x928] sm:$0xff] %v2895_v18  ;;  %v2840_v20 = vrot.slane %v2773_v30, 4  ;;  %3066 = vrot.lane.b32.xlu1 %v6722_v24, %s4958_s18 }
 0x3f3   :  { %3064 = vrot.lane.b32.xlu0 %v6500_v44, %s4958_s18 }
 0x3f4   :  { %v2896_v28 = vsel %vm532_vm0, %v2839_v12, %v2840_v20  ;;  %v2898_v42 = vsel %vm532_vm0, %v2840_v20, %v2841_v51  ;;  %v2779_v17 = vpop.permute.xlu1 %2778 }
 0x3f5   :  { %v2897_v36 = vsel %vm807_vm2, %v2771_v7, %v2896_v28  ;;  %v2899_v3 = vsel %vm807_vm2, %v2773_v30, %v2898_v42  ;;  %v2777_v45 = vpop.permute.xlu0 %2776  ;;  %v2843_v46 = vrot.slane %v2779_v17, 4 }
 0x3f6   :  { %2974 = vst [vmem:[#allocation8 + $0x930] sm:$0xff] %v2897_v36  ;;  %2975 = vst [vmem:[#allocation8 + $0x938] sm:$0xff] %v2899_v3  ;;  %v2842_v26 = vrot.slane %v2777_v45, 4  ;;  %3070 = vrot.lane.b32.xlu1 %v6508_v63, %s4958_s18 }
 0x3f7   :  { %3068 = vrot.lane.b32.xlu0 %v6734_v31, %s4958_s18 }
 0x3f8   :  { %v2900_v14 = vsel %vm532_vm0, %v2842_v26, %v2843_v46  ;;  %v2783_v10 = vpop.permute.xlu1 %2782 }
 0x3f9   :  { %v2901_v18 = vsel %vm807_vm2, %v2777_v45, %v2900_v14  ;;  %v2781_v7 = vpop.permute.xlu0 %2780  ;;  %v2845_v42 = vrot.slane %v2783_v10, 4 }
 0x3fa   :  { %2976 = vst [vmem:[#allocation8 + $0xb20] sm:$0xff] %v2901_v18  ;;  %v2844_v30 = vrot.slane %v2781_v7, 4  ;;  %3074 = vrot.lane.b32.xlu1 %v6740_v35, %s4958_s18 }
 0x3fb   :  { %3072 = vrot.lane.b32.xlu0 %v6744_v40, %s4958_s18 }
 0x3fc   :  { %v2902_v12 = vsel %vm532_vm0, %v2843_v46, %v2844_v30  ;;  %v2787_v20 = vpop.permute.xlu1 %2786 }
 0x3fd   :  { %v2903_v51 = vsel %vm807_vm2, %v2779_v17, %v2902_v12  ;;  %v2785_v28 = vpop.permute.xlu0 %2784  ;;  %v2847_v36 = vrot.slane %v2787_v20, 4 }
 0x3fe   :  { %2977 = vst [vmem:[#allocation8 + $0xb28] sm:$0xff] %v2903_v51  ;;  %v2846_v3 = vrot.slane %v2785_v28, 4  ;;  %3078 = vrot.lane.b32.xlu1 %v6750_v16, %s4958_s18 }
 0x3ff   :  { %3076 = vrot.lane.b32.xlu0 %v6524_v32, %s4958_s18 }
 0x400   :  { %v2904_v45 = vsel %vm532_vm0, %v2845_v42, %v2846_v3  ;;  %v2906_v26 = vsel %vm532_vm0, %v2846_v3, %v2847_v36  ;;  %v2791_v14 = vpop.permute.xlu1 %2790 }
 0x401   :  { %v2905_v46 = vsel %vm807_vm2, %v2783_v10, %v2904_v45  ;;  %v2907_v17 = vsel %vm807_vm2, %v2785_v28, %v2906_v26  ;;  %v2789_v18 = vpop.permute.xlu0 %2788  ;;  %v2849_v7 = vrot.slane %v2791_v14, 4 }
 0x402   :  { %2978 = vst [vmem:[#allocation8 + $0xb30] sm:$0xff] %v2905_v46  ;;  %2979 = vst [vmem:[#allocation8 + $0xb38] sm:$0xff] %v2907_v17  ;;  %v2848_v30 = vrot.slane %v2789_v18, 4  ;;  %3082 = vrot.lane.b32.xlu1 %v6532_v39, %s4958_s18 }
 0x403   :  { %3080 = vrot.lane.b32.xlu0 %v6762_v54, %s4958_s18 }
 0x404   :  { %v2908_v12 = vsel %vm532_vm0, %v2848_v30, %v2849_v7  ;;  %v2795_v20 = vpop.permute.xlu1 %2794 }
 0x405   :  { %v2909_v51 = vsel %vm807_vm2, %v2789_v18, %v2908_v12  ;;  %v2793_v10 = vpop.permute.xlu0 %2792  ;;  %v2851_v26 = vrot.slane %v2795_v20, 4 }
 0x406   :  { %2980 = vst [vmem:[#allocation8 + $0xd20] sm:$0xff] %v2909_v51  ;;  %v2850_v28 = vrot.slane %v2793_v10, 4  ;;  %3262 = vrot.lane.b32.xlu1 %v6544_v9, %s4959_s28 }
 0x407   :  { %3260 = vrot.lane.b32.xlu0 %v6548_v22, %s4959_s28 }
 0x408   :  { %v2910_v42 = vsel %vm532_vm0, %v2849_v7, %v2850_v28  ;;  %v2799_v3 = vpop.permute.xlu1 %2798 }
 0x409   :  { %v2911_v36 = vsel %vm807_vm2, %v2791_v14, %v2910_v42  ;;  %v2797_v45 = vpop.permute.xlu0 %2796  ;;  %v2853_v46 = vrot.slane %v2799_v3, 4 }
 0x40a   :  { %2981 = vst [vmem:[#allocation8 + $0xd28] sm:$0xff] %v2911_v36  ;;  %v2852_v17 = vrot.slane %v2797_v45, 4  ;;  %3266 = vrot.lane.b32.xlu1 %v6554_v41, %s4959_s28 }
 0x40b   :  { %3264 = vrot.lane.b32.xlu0 %v6356_v27, %s4959_s28 }
 0x40c   :  { %v2912_v9 = vsel %vm532_vm0, %v2851_v26, %v2852_v17  ;;  %v2914_v22 = vsel %vm532_vm0, %v2852_v17, %v2853_v46  ;;  %v2803_v7 = vpop.permute.xlu1 %2802 }
 0x40d   :  { %v2913_v18 = vsel %vm807_vm2, %v2795_v20, %v2912_v9  ;;  %v2915_v14 = vsel %vm807_vm2, %v2797_v45, %v2914_v22  ;;  %v2801_v30 = vpop.permute.xlu0 %2800  ;;  %v2855_v12 = vrot.slane %v2803_v7, 4 }
 0x40e   :  { %2982 = vst [vmem:[#allocation8 + $0xd30] sm:$0xff] %v2913_v18  ;;  %2983 = vst [vmem:[#allocation8 + $0xd38] sm:$0xff] %v2915_v14  ;;  %v2854_v51 = vrot.slane %v2801_v30, 4  ;;  %3270 = vrot.lane.b32.xlu1 %v6364_v11, %s4959_s28 }
 0x40f   :  { %3268 = vrot.lane.b32.xlu0 %v6566_v60, %s4959_s28 }
 0x410   :  { %v2916_v41 = vsel %vm532_vm0, %v2854_v51, %v2855_v12  ;;  %v2807_v28 = vpop.permute.xlu1 %2806 }
 0x411   :  { %v2917_v10 = vsel %vm807_vm2, %v2801_v30, %v2916_v41  ;;  %v2805_v20 = vpop.permute.xlu0 %2804  ;;  %v2857_v26 = vrot.slane %v2807_v28, 4 }
 0x412   :  { %2984 = vst [vmem:[#allocation8 + $0xf20] sm:$0xff] %v2917_v10  ;;  %v2856_v42 = vrot.slane %v2805_v20, 4  ;;  %3274 = vrot.lane.b32.xlu1 %v6572_v48, %s4959_s28 }
 0x413   :  { %3272 = vrot.lane.b32.xlu0 %v6576_v6, %s4959_s28 }
 0x414   :  { %v2918_v36 = vsel %vm532_vm0, %v2855_v12, %v2856_v42  ;;  %v2811_v45 = vpop.permute.xlu1 %2810 }
 0x415   :  { %v2919_v3 = vsel %vm807_vm2, %v2803_v7, %v2918_v36  ;;  %v2809_v60 = vpop.permute.xlu0 %2808  ;;  %v2859_v46 = vrot.slane %v2811_v45, 4 }
 0x416   :  { %2985 = vst [vmem:[#allocation8 + $0xf28] sm:$0xff] %v2919_v3  ;;  %v2858_v17 = vrot.slane %v2809_v60, 4  ;;  %3278 = vrot.lane.b32.xlu1 %v6582_v62, %s4959_s28 }
 0x417   :  { %3276 = vrot.lane.b32.xlu0 %v6380_v59, %s4959_s28 }
 0x418   :  { %v2920_v48 = vsel %vm532_vm0, %v2857_v26, %v2858_v17  ;;  %v2922_v6 = vsel %vm532_vm0, %v2858_v17, %v2859_v46  ;;  %v2991_v18 = vpop.permute.xlu1 %2990 }
 0x419   :  { %v2921_v9 = vsel %vm807_vm2, %v2807_v28, %v2920_v48  ;;  %v2923_v22 = vsel %vm807_vm2, %v2809_v60, %v2922_v6  ;;  %v2989_v14 = vpop.permute.xlu0 %2988  ;;  %v3085_v7 = vrot.slane %v2991_v18, 4 }
 0x41a   :  { %2986 = vst [vmem:[#allocation8 + $0xf30] sm:$0xff] %v2921_v9  ;;  %2987 = vst [vmem:[#allocation8 + $0xf38] sm:$0xff] %v2923_v22  ;;  %v3084_v30 = vrot.slane %v2989_v14, 4  ;;  %3282 = vrot.lane.b32.xlu1 %v6388_v57, %s4959_s28 }
 0x41b   :  { %3280 = vrot.lane.b32.xlu0 %v6594_v1, %s4959_s28 }
 0x41c   :  { %v3132_v62 = vsel %vm532_vm0, %v3084_v30, %v3085_v7  ;;  %v2995_v51 = vpop.permute.xlu1 %2994 }
 0x41d   :  { %v3133_v12 = vsel %vm1080_vm3, %v2989_v14, %v3132_v62  ;;  %v2993_v41 = vpop.permute.xlu0 %2992  ;;  %v3087_v36 = vrot.slane %v2995_v51, 4 }
 0x41e   :  { %3228 = vst [vmem:[#allocation8 + $0x140] sm:$0xff] %v3133_v12  ;;  %v3086_v10 = vrot.slane %v2993_v41, 4  ;;  %3286 = vrot.lane.b32.xlu1 %v6600_v2, %s4959_s28 }
 0x41f   :  { %3284 = vrot.lane.b32.xlu0 %v6604_v29, %s4959_s28 }
 0x420   :  { %v3134_v28 = vsel %vm532_vm0, %v3085_v7, %v3086_v10  ;;  %v2999_v42 = vpop.permute.xlu1 %2998 }
 0x421   :  { %v3135_v20 = vsel %vm1080_vm3, %v2991_v18, %v3134_v28  ;;  %v2997_v1 = vpop.permute.xlu0 %2996  ;;  %v3089_v3 = vrot.slane %v2999_v42, 4 }
 0x422   :  { %3229 = vst [vmem:[#allocation8 + $0x148] sm:$0xff] %v3135_v20  ;;  %v3088_v45 = vrot.slane %v2997_v1, 4  ;;  %3290 = vrot.lane.b32.xlu1 %v6610_v43, %s4959_s28 }
 0x423   :  { %3288 = vrot.lane.b32.xlu0 %v6404_v52, %s4959_s28 }
 0x424   :  { %v3136_v2 = vsel %vm532_vm0, %v3087_v36, %v3088_v45  ;;  %v3138_v29 = vsel %vm532_vm0, %v3088_v45, %v3089_v3  ;;  %v3003_v46 = vpop.permute.xlu1 %3002 }
 0x425   :  { %v3137_v60 = vsel %vm1080_vm3, %v2995_v51, %v3136_v2  ;;  %v3139_v26 = vsel %vm1080_vm3, %v2997_v1, %v3138_v29  ;;  %v3001_v17 = vpop.permute.xlu0 %3000  ;;  %v3091_v48 = vrot.slane %v3003_v46, 4 }
 0x426   :  { %3230 = vst [vmem:[#allocation8 + $0x150] sm:$0xff] %v3137_v60  ;;  %3231 = vst [vmem:[#allocation8 + $0x158] sm:$0xff] %v3139_v26  ;;  %v3090_v6 = vrot.slane %v3001_v17, 4  ;;  %3294 = vrot.lane.b32.xlu1 %v6412_v5, %s4959_s28 }
 0x427   :  { %3292 = vrot.lane.b32.xlu0 %v6622_v19, %s4959_s28 }
 0x428   :  { %v3140_v43 = vsel %vm532_vm0, %v3090_v6, %v3091_v48  ;;  %v3007_v22 = vpop.permute.xlu1 %3006 }
 0x429   :  { %v3141_v9 = vsel %vm1080_vm3, %v3001_v17, %v3140_v43  ;;  %v3005_v18 = vpop.permute.xlu0 %3004  ;;  %v3093_v12 = vrot.slane %v3007_v22, 4 }
 0x42a   :  { %3232 = vst [vmem:[#allocation8 + $0x340] sm:$0xff] %v3141_v9  ;;  %v3092_v14 = vrot.slane %v3005_v18, 4  ;;  %3298 = vrot.lane.b32.xlu1 %v6628_v47, %s4959_s28 }
 0x42b   :  { %3296 = vrot.lane.b32.xlu0 %v6632_v34, %s4959_s28 }
 0x42c   :  { %v3142_v7 = vsel %vm532_vm0, %v3091_v48, %v3092_v14  ;;  %v3011_v62 = vpop.permute.xlu1 %3010 }
 0x42d   :  { %v3143_v30 = vsel %vm1080_vm3, %v3003_v46, %v3142_v7  ;;  %v3009_v19 = vpop.permute.xlu0 %3008  ;;  %v3095_v51 = vrot.slane %v3011_v62, 4 }
 0x42e   :  { %3233 = vst [vmem:[#allocation8 + $0x348] sm:$0xff] %v3143_v30  ;;  %v3094_v41 = vrot.slane %v3009_v19, 4  ;;  %3302 = vrot.lane.b32.xlu1 %v6638_v25, %s4959_s28 }
 0x42f   :  { %3300 = vrot.lane.b32.xlu0 %v6428_v37, %s4959_s28 }
 0x430   :  { %v3144_v47 = vsel %vm532_vm0, %v3093_v12, %v3094_v41  ;;  %v3146_v34 = vsel %vm532_vm0, %v3094_v41, %v3095_v51  ;;  %v3015_v20 = vpop.permute.xlu1 %3014 }
 0x431   :  { %v3145_v10 = vsel %vm1080_vm3, %v3007_v22, %v3144_v47  ;;  %v3147_v28 = vsel %vm1080_vm3, %v3009_v19, %v3146_v34  ;;  %v3013_v42 = vpop.permute.xlu0 %3012  ;;  %v3097_v1 = vrot.slane %v3015_v20, 4 }
 0x432   :  { %3234 = vst [vmem:[#allocation8 + $0x350] sm:$0xff] %v3145_v10  ;;  %3235 = vst [vmem:[#allocation8 + $0x358] sm:$0xff] %v3147_v28  ;;  %v3096_v36 = vrot.slane %v3013_v42, 4  ;;  %3306 = vrot.lane.b32.xlu1 %v6436_v21, %s4959_s28 }
 0x433   :  { %3304 = vrot.lane.b32.xlu0 %v6650_v15, %s4959_s28 }
 0x434   :  { %v3148_v25 = vsel %vm532_vm0, %v3096_v36, %v3097_v1  ;;  %v3019_v45 = vpop.permute.xlu1 %3018 }
 0x435   :  { %v3149_v3 = vsel %vm1080_vm3, %v3013_v42, %v3148_v25  ;;  %v3017_v2 = vpop.permute.xlu0 %3016  ;;  %v3099_v17 = vrot.slane %v3019_v45, 4 }
 0x436   :  { %3236 = vst [vmem:[#allocation8 + $0x540] sm:$0xff] %v3149_v3  ;;  %v3098_v29 = vrot.slane %v3017_v2, 4  ;;  %3310 = vrot.lane.b32.xlu1 %v6656_v53, %s4959_s28 }
 0x437   :  { %3308 = vrot.lane.b32.xlu0 %v6660_v50, %s4959_s28 }
 0x438   :  { %v3150_v60 = vsel %vm532_vm0, %v3097_v1, %v3098_v29  ;;  %v3023_v46 = vpop.permute.xlu1 %3022 }
 0x439   :  { %v3151_v26 = vsel %vm1080_vm3, %v3015_v20, %v3150_v60  ;;  %v3021_v15 = vpop.permute.xlu0 %3020  ;;  %v3101_v48 = vrot.slane %v3023_v46, 4 }
 0x43a   :  { %3237 = vst [vmem:[#allocation8 + $0x548] sm:$0xff] %v3151_v26  ;;  %v3100_v6 = vrot.slane %v3021_v15, 4  ;;  %3314 = vrot.lane.b32.xlu1 %v6666_v38, %s4959_s28 }
 0x43b   :  { %3312 = vrot.lane.b32.xlu0 %v6452_v49, %s4959_s28 }
 0x43c   :  { %v3152_v53 = vsel %vm532_vm0, %v3099_v17, %v3100_v6  ;;  %v3154_v50 = vsel %vm532_vm0, %v3100_v6, %v3101_v48  ;;  %v3027_v22 = vpop.permute.xlu1 %3026 }
 0x43d   :  { %v3153_v43 = vsel %vm1080_vm3, %v3019_v45, %v3152_v53  ;;  %v3155_v9 = vsel %vm1080_vm3, %v3021_v15, %v3154_v50  ;;  %v3025_v18 = vpop.permute.xlu0 %3024  ;;  %v3103_v14 = vrot.slane %v3027_v22, 4 }
 0x43e   :  { %3238 = vst [vmem:[#allocation8 + $0x550] sm:$0xff] %v3153_v43  ;;  %3239 = vst [vmem:[#allocation8 + $0x558] sm:$0xff] %v3155_v9  ;;  %v3102_v7 = vrot.slane %v3025_v18, 4  ;;  %3318 = vrot.lane.b32.xlu1 %v6460_v0, %s4959_s28 }
 0x43f   :  { %3316 = vrot.lane.b32.xlu0 %v6678_v61, %s4959_s28 }
 0x440   :  { %v3156_v38 = vsel %vm532_vm0, %v3102_v7, %v3103_v14  ;;  %v3031_v62 = vpop.permute.xlu1 %3030 }
 0x441   :  { %v3157_v30 = vsel %vm1080_vm3, %v3025_v18, %v3156_v38  ;;  %v3029_v19 = vpop.permute.xlu0 %3028  ;;  %v3105_v34 = vrot.slane %v3031_v62, 4 }
 0x442   :  { %3240 = vst [vmem:[#allocation8 + $0x740] sm:$0xff] %v3157_v30  ;;  %v3104_v12 = vrot.slane %v3029_v19, 4  ;;  %3322 = vrot.lane.b32.xlu1 %v6684_v33, %s4959_s28 }
 0x443   :  { %3320 = vrot.lane.b32.xlu0 %v6688_v55, %s4959_s28 }
 0x444   :  { %v3158_v51 = vsel %vm532_vm0, %v3103_v14, %v3104_v12  ;;  %v3035_v47 = vpop.permute.xlu1 %3034 }
 0x445   :  { %v3159_v41 = vsel %vm1080_vm3, %v3027_v22, %v3158_v51  ;;  %v3033_v61 = vpop.permute.xlu0 %3032  ;;  %v3107_v10 = vrot.slane %v3035_v47, 4 }
 0x446   :  { %3241 = vst [vmem:[#allocation8 + $0x748] sm:$0xff] %v3159_v41  ;;  %v3106_v28 = vrot.slane %v3033_v61, 4  ;;  %3326 = vrot.lane.b32.xlu1 %v6694_v58, %s4959_s28 }
 0x447   :  { %3324 = vrot.lane.b32.xlu0 %v6476_v4, %s4959_s28 }
 0x448   :  { %v3160_v33 = vsel %vm532_vm0, %v3105_v34, %v3106_v28  ;;  %v3162_v55 = vsel %vm532_vm0, %v3106_v28, %v3107_v10  ;;  %v3039_v1 = vpop.permute.xlu1 %3038 }
 0x449   :  { %v3161_v20 = vsel %vm1080_vm3, %v3031_v62, %v3160_v33  ;;  %v3163_v42 = vsel %vm1080_vm3, %v3033_v61, %v3162_v55  ;;  %v3037_v36 = vpop.permute.xlu0 %3036  ;;  %v3109_v25 = vrot.slane %v3039_v1, 4 }
 0x44a   :  { %3242 = vst [vmem:[#allocation8 + $0x750] sm:$0xff] %v3161_v20  ;;  %3243 = vst [vmem:[#allocation8 + $0x758] sm:$0xff] %v3163_v42  ;;  %v3108_v3 = vrot.slane %v3037_v36, 4  ;;  %3330 = vrot.lane.b32.xlu1 %v6484_v13, %s4959_s28 }
 0x44b   :  { %3328 = vrot.lane.b32.xlu0 %v6706_v8, %s4959_s28 }
 0x44c   :  { %v3164_v58 = vsel %vm532_vm0, %v3108_v3, %v3109_v25  ;;  %v3043_v2 = vpop.permute.xlu1 %3042  ;;  %v7092_v3 = vld [vmem:[#allocation8 + $0x1e0] sm:$0xff] }
 0x44d   :  { %v3165_v45 = vsel %vm1080_vm3, %v3037_v36, %v3164_v58  ;;  %v3041_v29 = vpop.permute.xlu0 %3040  ;;  %v3111_v17 = vrot.slane %v3043_v2, 4 }
 0x44e   :  { %3244 = vst [vmem:[#allocation8 + $0x940] sm:$0xff] %v3165_v45  ;;  %v3110_v60 = vrot.slane %v3041_v29, 4  ;;  %3334 = vrot.lane.b32.xlu1 %v6712_v56, %s4959_s28 }
 0x44f   :  { %3332 = vrot.lane.b32.xlu0 %v6716_v23, %s4959_s28 }
 0x450   :  { %v3166_v26 = vsel %vm532_vm0, %v3109_v25, %v3110_v60  ;;  %v3047_v15 = vpop.permute.xlu1 %3046  ;;  %v7088_v25 = vld [vmem:[#allocation8 + $0x1e8] sm:$0xff] }
 0x451   :  { %v3167_v46 = vsel %vm1080_vm3, %v3039_v1, %v3166_v26  ;;  %v3045_v8 = vpop.permute.xlu0 %3044  ;;  %v3113_v48 = vrot.slane %v3047_v15, 4 }
 0x452   :  { %3245 = vst [vmem:[#allocation8 + $0x948] sm:$0xff] %v3167_v46  ;;  %v3112_v6 = vrot.slane %v3045_v8, 4  ;;  %3338 = vrot.lane.b32.xlu1 %v6722_v24, %s4959_s28  ;;  %v7098_v46 = vld [vmem:[#allocation8 + $0x1f0] sm:$0xff] }
 0x453   :  { %3336 = vrot.lane.b32.xlu0 %v6500_v44, %s4959_s28 }
 0x454   :  { %v3168_v56 = vsel %vm532_vm0, %v3111_v17, %v3112_v6  ;;  %v3170_v23 = vsel %vm532_vm0, %v3112_v6, %v3113_v48  ;;  %v3051_v43 = vpop.permute.xlu1 %3050 }
 0x455   :  { %v3169_v53 = vsel %vm1080_vm3, %v3043_v2, %v3168_v56  ;;  %v3171_v50 = vsel %vm1080_vm3, %v3045_v8, %v3170_v23  ;;  %v3049_v9 = vpop.permute.xlu0 %3048  ;;  %v3115_v22 = vrot.slane %v3051_v43, 4 }
 0x456   :  { %3246 = vst [vmem:[#allocation8 + $0x950] sm:$0xff] %v3169_v53  ;;  %3247 = vst [vmem:[#allocation8 + $0x958] sm:$0xff] %v3171_v50  ;;  %v3114_v18 = vrot.slane %v3049_v9, 4  ;;  %3342 = vrot.lane.b32.xlu1 %v6508_v63, %s4959_s28  ;;  %v7110_v50 = vld [vmem:[#allocation8 + $0x1f8] sm:$0xff] }
 0x457   :  { %3340 = vrot.lane.b32.xlu0 %v6734_v31, %s4959_s28 }
 0x458   :  { %v3172_v24 = vsel %vm532_vm0, %v3114_v18, %v3115_v22  ;;  %v3055_v7 = vpop.permute.xlu1 %3054 }
 0x459   :  { %v3173_v14 = vsel %vm1080_vm3, %v3049_v9, %v3172_v24  ;;  %v3053_v38 = vpop.permute.xlu0 %3052  ;;  %v3117_v51 = vrot.slane %v3055_v7, 4 }
 0x45a   :  { %3248 = vst [vmem:[#allocation8 + $0xb40] sm:$0xff] %v3173_v14  ;;  %v3116_v30 = vrot.slane %v3053_v38, 4  ;;  %3346 = vrot.lane.b32.xlu1 %v6740_v35, %s4959_s28  ;;  %v7116_v14 = vld [vmem:[#allocation8 + $0x3e8] sm:$0xff] }
 0x45b   :  { %3344 = vrot.lane.b32.xlu0 %v6744_v40, %s4959_s28 }
 0x45c   :  { %v3174_v62 = vsel %vm532_vm0, %v3115_v22, %v3116_v30  ;;  %v3059_v12 = vpop.permute.xlu1 %3058 }
 0x45d   :  { %v3175_v19 = vsel %vm1080_vm3, %v3051_v43, %v3174_v62  ;;  %v3057_v31 = vpop.permute.xlu0 %3056  ;;  %v3119_v41 = vrot.slane %v3059_v12, 4 }
 0x45e   :  { %3249 = vst [vmem:[#allocation8 + $0xb48] sm:$0xff] %v3175_v19  ;;  %v3118_v47 = vrot.slane %v3057_v31, 4  ;;  %3350 = vrot.lane.b32.xlu1 %v6750_v16, %s4959_s28 }
 0x45f   :  { %3348 = vrot.lane.b32.xlu0 %v6524_v32, %s4959_s28 }
 0x460   :  { %v3176_v35 = vsel %vm532_vm0, %v3117_v51, %v3118_v47  ;;  %v3178_v40 = vsel %vm532_vm0, %v3118_v47, %v3119_v41  ;;  %v3063_v10 = vpop.permute.xlu1 %3062  ;;  %v7126_v41 = vld [vmem:[#allocation8 + $0x3f0] sm:$0xff] }
 0x461   :  { %v3177_v61 = vsel %vm1080_vm3, %v3055_v7, %v3176_v35  ;;  %v3179_v34 = vsel %vm1080_vm3, %v3057_v31, %v3178_v40  ;;  %v3061_v28 = vpop.permute.xlu0 %3060  ;;  %v3121_v33 = vrot.slane %v3063_v10, 4  ;;  %v7120_v7 = vld [vmem:[#allocation8 + $0x3e0] sm:$0xff] }
 0x462   :  { %3250 = vst [vmem:[#allocation8 + $0xb50] sm:$0xff] %v3177_v61  ;;  %3251 = vst [vmem:[#allocation8 + $0xb58] sm:$0xff] %v3179_v34  ;;  %v3120_v55 = vrot.slane %v3061_v28, 4  ;;  %3354 = vrot.lane.b32.xlu1 %v6532_v39, %s4959_s28 }
 0x463   :  { %3352 = vrot.lane.b32.xlu0 %v6762_v54, %s4959_s28 }
 0x464   :  { %v3180_v16 = vsel %vm532_vm0, %v3120_v55, %v3121_v33  ;;  %v3067_v42 = vpop.permute.xlu1 %3066  ;;  %v7138_v55 = vld [vmem:[#allocation8 + $0x3f8] sm:$0xff] }
 0x465   :  { %v3181_v20 = vsel %vm1080_vm3, %v3061_v28, %v3180_v16  ;;  %v3065_v1 = vpop.permute.xlu0 %3064  ;;  %v3123_v29 = vrot.slane %v3067_v42, 4 }
 0x466   :  { %3252 = vst [vmem:[#allocation8 + $0xd40] sm:$0xff] %v3181_v20  ;;  %v3122_v36 = vrot.slane %v3065_v1, 4  ;;  %3534 = vrot.lane.b32.xlu1 %v7088_v25, %s4960_s29 }
 0x467   :  { %3532 = vrot.lane.b32.xlu0 %v7092_v3, %s4960_s29 }
 0x468   :  { %v3182_v54 = vsel %vm532_vm0, %v3121_v33, %v3122_v36  ;;  %v3071_v45 = vpop.permute.xlu1 %3070 }
 0x469   :  { %v3183_v58 = vsel %vm1080_vm3, %v3063_v10, %v3182_v54  ;;  %v3069_v2 = vpop.permute.xlu0 %3068  ;;  %v3125_v60 = vrot.slane %v3071_v45, 4  ;;  %v7144_v54 = vld [vmem:[#allocation8 + $0x5e8] sm:$0xff] }
 0x46a   :  { %3253 = vst [vmem:[#allocation8 + $0xd48] sm:$0xff] %v3183_v58  ;;  %v3124_v26 = vrot.slane %v3069_v2, 4  ;;  %3538 = vrot.lane.b32.xlu1 %v7098_v46, %s4960_s29  ;;  %v7148_v58 = vld [vmem:[#allocation8 + $0x5e0] sm:$0xff] }
 0x46b   :  { %3536 = vrot.lane.b32.xlu0 %v6356_v27, %s4960_s29 }
 0x46c   :  { %v3184_v15 = vsel %vm532_vm0, %v3123_v29, %v3124_v26  ;;  %v3186_v8 = vsel %vm532_vm0, %v3124_v26, %v3125_v60  ;;  %v3075_v6 = vpop.permute.xlu1 %3074 }
 0x46d   :  { %v3185_v17 = vsel %vm1080_vm3, %v3067_v42, %v3184_v15  ;;  %v3187_v48 = vsel %vm1080_vm3, %v3069_v2, %v3186_v8  ;;  %v3073_v56 = vpop.permute.xlu0 %3072  ;;  %v3127_v23 = vrot.slane %v3075_v6, 4 }
 0x46e   :  { %3254 = vst [vmem:[#allocation8 + $0xd50] sm:$0xff] %v3185_v17  ;;  %3255 = vst [vmem:[#allocation8 + $0xd58] sm:$0xff] %v3187_v48  ;;  %v3126_v53 = vrot.slane %v3073_v56, 4  ;;  %3542 = vrot.lane.b32.xlu1 %v6364_v11, %s4960_s29  ;;  %v7154_v17 = vld [vmem:[#allocation8 + $0x5f0] sm:$0xff] }
 0x46f   :  { %3540 = vrot.lane.b32.xlu0 %v7110_v50, %s4960_s29 }
 0x470   :  { %v3188_v43 = vsel %vm532_vm0, %v3126_v53, %v3127_v23  ;;  %v3079_v22 = vpop.permute.xlu1 %3078 }
 0x471   :  { %v3189_v9 = vsel %vm1080_vm3, %v3073_v56, %v3188_v43  ;;  %v3077_v18 = vpop.permute.xlu0 %3076  ;;  %v3129_v12 = vrot.slane %v3079_v22, 4 }
 0x472   :  { %3256 = vst [vmem:[#allocation8 + $0xf40] sm:$0xff] %v3189_v9  ;;  %v3128_v24 = vrot.slane %v3077_v18, 4  ;;  %3546 = vrot.lane.b32.xlu1 %v7116_v14, %s4960_s29  ;;  %v7166_v18 = vld [vmem:[#allocation8 + $0x5f8] sm:$0xff] }
 0x473   :  { %3544 = vrot.lane.b32.xlu0 %v7120_v7, %s4960_s29 }
 0x474   :  { %v3190_v38 = vsel %vm532_vm0, %v3127_v23, %v3128_v24  ;;  %v3083_v62 = vpop.permute.xlu1 %3082 }
 0x475   :  { %v3191_v30 = vsel %vm1080_vm3, %v3075_v6, %v3190_v38  ;;  %v3081_v19 = vpop.permute.xlu0 %3080  ;;  %v3131_v31 = vrot.slane %v3083_v62, 4 }
 0x476   :  { %3257 = vst [vmem:[#allocation8 + $0xf48] sm:$0xff] %v3191_v30  ;;  %v3130_v51 = vrot.slane %v3081_v19, 4  ;;  %3550 = vrot.lane.b32.xlu1 %v7126_v41, %s4960_s29 }
 0x477   :  { %3548 = vrot.lane.b32.xlu0 %v6380_v59, %s4960_s29 }
 0x478   :  { %v3192_v47 = vsel %vm532_vm0, %v3129_v12, %v3130_v51  ;;  %v3194_v35 = vsel %vm532_vm0, %v3130_v51, %v3131_v31  ;;  %v3263_v34 = vpop.permute.xlu1 %3262  ;;  %v7172_v12 = vld [vmem:[#allocation8 + $0x7e8] sm:$0xff]  ;;  %v7176_v31 = vld [vmem:[#allocation8 + $0x7e0] sm:$0xff] }
 0x479   :  { %v3193_v40 = vsel %vm1080_vm3, %v3079_v22, %v3192_v47  ;;  %v3195_v61 = vsel %vm1080_vm3, %v3081_v19, %v3194_v35  ;;  %v3261_v10 = vpop.permute.xlu0 %3260  ;;  %v3357_v28 = vrot.slane %v3263_v34, 4 }
 0x47a   :  { %3258 = vst [vmem:[#allocation8 + $0xf50] sm:$0xff] %v3193_v40  ;;  %3259 = vst [vmem:[#allocation8 + $0xf58] sm:$0xff] %v3195_v61  ;;  %v3356_v33 = vrot.slane %v3261_v10, 4  ;;  %3554 = vrot.lane.b32.xlu1 %v6388_v57, %s4960_s29 }
 0x47b   :  { %3552 = vrot.lane.b32.xlu0 %v7138_v55, %s4960_s29 }
 0x47c   :  { %v3404_v16 = vsel %vm532_vm0, %v3356_v33, %v3357_v28  ;;  %v3267_v42 = vpop.permute.xlu1 %3266 }
 0x47d   :  { %v3405_v20 = vsel %vm1353_vm4, %v3261_v10, %v3404_v16  ;;  %v3265_v1 = vpop.permute.xlu0 %3264  ;;  %v3359_v26 = vrot.slane %v3267_v42, 4 }
 0x47e   :  { %3500 = vst [vmem:[#allocation8 + $0x160] sm:$0xff] %v3405_v20  ;;  %v3358_v36 = vrot.slane %v3265_v1, 4  ;;  %3558 = vrot.lane.b32.xlu1 %v7144_v54, %s4960_s29 }
 0x47f   :  { %3556 = vrot.lane.b32.xlu0 %v7148_v58, %s4960_s29 }
 0x480   :  { %v3406_v45 = vsel %vm532_vm0, %v3357_v28, %v3358_v36  ;;  %v3271_v29 = vpop.permute.xlu1 %3270  ;;  %v7182_v28 = vld [vmem:[#allocation8 + $0x7f0] sm:$0xff] }
 0x481   :  { %v3407_v2 = vsel %vm1353_vm4, %v3263_v34, %v3406_v45  ;;  %v3269_v60 = vpop.permute.xlu0 %3268  ;;  %v3361_v15 = vrot.slane %v3271_v29, 4  ;;  %v7194_v29 = vld [vmem:[#allocation8 + $0x7f8] sm:$0xff] }
 0x482   :  { %3501 = vst [vmem:[#allocation8 + $0x168] sm:$0xff] %v3407_v2  ;;  %v3360_v8 = vrot.slane %v3269_v60, 4  ;;  %3562 = vrot.lane.b32.xlu1 %v7154_v17, %s4960_s29 }
 0x483   :  { %3560 = vrot.lane.b32.xlu0 %v6404_v52, %s4960_s29 }
 0x484   :  { %v3408_v48 = vsel %vm532_vm0, %v3359_v26, %v3360_v8  ;;  %v3410_v6 = vsel %vm532_vm0, %v3360_v8, %v3361_v15  ;;  %v3275_v53 = vpop.permute.xlu1 %3274 }
 0x485   :  { %v3409_v56 = vsel %vm1353_vm4, %v3267_v42, %v3408_v48  ;;  %v3411_v23 = vsel %vm1353_vm4, %v3269_v60, %v3410_v6  ;;  %v3273_v43 = vpop.permute.xlu0 %3272  ;;  %v3363_v9 = vrot.slane %v3275_v53, 4  ;;  %v7200_v6 = vld [vmem:[#allocation8 + $0x9e8] sm:$0xff] }
 0x486   :  { %3502 = vst [vmem:[#allocation8 + $0x170] sm:$0xff] %v3409_v56  ;;  %3503 = vst [vmem:[#allocation8 + $0x178] sm:$0xff] %v3411_v23  ;;  %v3362_v22 = vrot.slane %v3273_v43, 4  ;;  %3566 = vrot.lane.b32.xlu1 %v6412_v5, %s4960_s29  ;;  %v7204_v56 = vld [vmem:[#allocation8 + $0x9e0] sm:$0xff] }
 0x487   :  { %3564 = vrot.lane.b32.xlu0 %v7166_v18, %s4960_s29 }
 0x488   :  { %v3412_v24 = vsel %vm532_vm0, %v3362_v22, %v3363_v9  ;;  %v3279_v30 = vpop.permute.xlu1 %3278 }
 0x489   :  { %v3413_v38 = vsel %vm1353_vm4, %v3273_v43, %v3412_v24  ;;  %v3277_v62 = vpop.permute.xlu0 %3276  ;;  %v3365_v61 = vrot.slane %v3279_v30, 4 }
 0x48a   :  { %3504 = vst [vmem:[#allocation8 + $0x360] sm:$0xff] %v3413_v38  ;;  %v3364_v19 = vrot.slane %v3277_v62, 4  ;;  %3570 = vrot.lane.b32.xlu1 %v7172_v12, %s4960_s29 }
 0x48b   :  { %3568 = vrot.lane.b32.xlu0 %v7176_v31, %s4960_s29 }
 0x48c   :  { %v3414_v51 = vsel %vm532_vm0, %v3363_v9, %v3364_v19  ;;  %v3283_v35 = vpop.permute.xlu1 %3282 }
 0x48d   :  { %v3415_v47 = vsel %vm1353_vm4, %v3275_v53, %v3414_v51  ;;  %v3281_v40 = vpop.permute.xlu0 %3280  ;;  %v3367_v34 = vrot.slane %v3283_v35, 4 }
 0x48e   :  { %3505 = vst [vmem:[#allocation8 + $0x368] sm:$0xff] %v3415_v47  ;;  %v3366_v10 = vrot.slane %v3281_v40, 4  ;;  %3574 = vrot.lane.b32.xlu1 %v7182_v28, %s4960_s29 }
 0x48f   :  { %3572 = vrot.lane.b32.xlu0 %v6428_v37, %s4960_s29 }
 0x490   :  { %v3416_v33 = vsel %vm532_vm0, %v3365_v61, %v3366_v10  ;;  %v3418_v16 = vsel %vm532_vm0, %v3366_v10, %v3367_v34  ;;  %v3287_v1 = vpop.permute.xlu1 %3286  ;;  %v7222_v10 = vld [vmem:[#allocation8 + $0x9f8] sm:$0xff] }
 0x491   :  { %v3417_v20 = vsel %vm1353_vm4, %v3279_v30, %v3416_v33  ;;  %v3419_v42 = vsel %vm1353_vm4, %v3281_v40, %v3418_v16  ;;  %v3285_v36 = vpop.permute.xlu0 %3284  ;;  %v3369_v45 = vrot.slane %v3287_v1, 4  ;;  %v7210_v30 = vld [vmem:[#allocation8 + $0x9f0] sm:$0xff] }
 0x492   :  { %3506 = vst [vmem:[#allocation8 + $0x370] sm:$0xff] %v3417_v20  ;;  %3507 = vst [vmem:[#allocation8 + $0x378] sm:$0xff] %v3419_v42  ;;  %v3368_v2 = vrot.slane %v3285_v36, 4  ;;  %3578 = vrot.lane.b32.xlu1 %v6436_v21, %s4960_s29 }
 0x493   :  { %3576 = vrot.lane.b32.xlu0 %v7194_v29, %s4960_s29 }
 0x494   :  { %v3420_v60 = vsel %vm532_vm0, %v3368_v2, %v3369_v45  ;;  %v3291_v15 = vpop.permute.xlu1 %3290 }
 0x495   :  { %v3421_v26 = vsel %vm1353_vm4, %v3285_v36, %v3420_v60  ;;  %v3289_v8 = vpop.permute.xlu0 %3288  ;;  %v3371_v22 = vrot.slane %v3291_v15, 4  ;;  %v7228_v36 = vld [vmem:[#allocation8 + $0xbe8] sm:$0xff] }
 0x496   :  { %3508 = vst [vmem:[#allocation8 + $0x560] sm:$0xff] %v3421_v26  ;;  %v3370_v48 = vrot.slane %v3289_v8, 4  ;;  %3582 = vrot.lane.b32.xlu1 %v7200_v6, %s4960_s29 }
 0x497   :  { %3580 = vrot.lane.b32.xlu0 %v7204_v56, %s4960_s29 }
 0x498   :  { %v3422_v23 = vsel %vm532_vm0, %v3369_v45, %v3370_v48  ;;  %v3295_v43 = vpop.permute.xlu1 %3294  ;;  %v7232_v45 = vld [vmem:[#allocation8 + $0xbe0] sm:$0xff] }
 0x499   :  { %v3423_v53 = vsel %vm1353_vm4, %v3287_v1, %v3422_v23  ;;  %v3293_v9 = vpop.permute.xlu0 %3292  ;;  %v3373_v24 = vrot.slane %v3295_v43, 4 }
 0x49a   :  { %3509 = vst [vmem:[#allocation8 + $0x568] sm:$0xff] %v3423_v53  ;;  %v3372_v38 = vrot.slane %v3293_v9, 4  ;;  %3586 = vrot.lane.b32.xlu1 %v7210_v30, %s4960_s29  ;;  %v7238_v53 = vld [vmem:[#allocation8 + $0xbf0] sm:$0xff] }
 0x49b   :  { %3584 = vrot.lane.b32.xlu0 %v6452_v49, %s4960_s29 }
 0x49c   :  { %v3424_v62 = vsel %vm532_vm0, %v3371_v22, %v3372_v38  ;;  %v3426_v19 = vsel %vm532_vm0, %v3372_v38, %v3373_v24  ;;  %v3299_v35 = vpop.permute.xlu1 %3298 }
 0x49d   :  { %v3425_v51 = vsel %vm1353_vm4, %v3291_v15, %v3424_v62  ;;  %v3427_v47 = vsel %vm1353_vm4, %v3293_v9, %v3426_v19  ;;  %v3297_v40 = vpop.permute.xlu0 %3296  ;;  %v3375_v61 = vrot.slane %v3299_v35, 4 }
 0x49e   :  { %3510 = vst [vmem:[#allocation8 + $0x570] sm:$0xff] %v3425_v51  ;;  %3511 = vst [vmem:[#allocation8 + $0x578] sm:$0xff] %v3427_v47  ;;  %v3374_v34 = vrot.slane %v3297_v40, 4  ;;  %3590 = vrot.lane.b32.xlu1 %v6460_v0, %s4960_s29  ;;  %v7250_v47 = vld [vmem:[#allocation8 + $0xbf8] sm:$0xff] }
 0x49f   :  { %3588 = vrot.lane.b32.xlu0 %v7222_v10, %s4960_s29 }
 0x4a0   :  { %v3428_v33 = vsel %vm532_vm0, %v3374_v34, %v3375_v61  ;;  %v3303_v20 = vpop.permute.xlu1 %3302 }
 0x4a1   :  { %v3429_v16 = vsel %vm1353_vm4, %v3297_v40, %v3428_v33  ;;  %v3301_v42 = vpop.permute.xlu0 %3300  ;;  %v3377_v8 = vrot.slane %v3303_v20, 4 }
 0x4a2   :  { %3512 = vst [vmem:[#allocation8 + $0x760] sm:$0xff] %v3429_v16  ;;  %v3376_v1 = vrot.slane %v3301_v42, 4  ;;  %3594 = vrot.lane.b32.xlu1 %v7228_v36, %s4960_s29  ;;  %v7256_v16 = vld [vmem:[#allocation8 + $0xde8] sm:$0xff] }
 0x4a3   :  { %3592 = vrot.lane.b32.xlu0 %v7232_v45, %s4960_s29 }
 0x4a4   :  { %v3430_v2 = vsel %vm532_vm0, %v3375_v61, %v3376_v1  ;;  %v3307_v26 = vpop.permute.xlu1 %3306 }
 0x4a5   :  { %v3431_v60 = vsel %vm1353_vm4, %v3299_v35, %v3430_v2  ;;  %v3305_v15 = vpop.permute.xlu0 %3304  ;;  %v3379_v48 = vrot.slane %v3307_v26, 4 }
 0x4a6   :  { %3513 = vst [vmem:[#allocation8 + $0x768] sm:$0xff] %v3431_v60  ;;  %v3378_v23 = vrot.slane %v3305_v15, 4  ;;  %3598 = vrot.lane.b32.xlu1 %v7238_v53, %s4960_s29 }
 0x4a7   :  { %3596 = vrot.lane.b32.xlu0 %v6476_v4, %s4960_s29 }
 0x4a8   :  { %v3432_v43 = vsel %vm532_vm0, %v3377_v8, %v3378_v23  ;;  %v3434_v9 = vsel %vm532_vm0, %v3378_v23, %v3379_v48  ;;  %v3311_v38 = vpop.permute.xlu1 %3310  ;;  %v7266_v48 = vld [vmem:[#allocation8 + $0xdf0] sm:$0xff] }
 0x4a9   :  { %v3433_v22 = vsel %vm1353_vm4, %v3303_v20, %v3432_v43  ;;  %v3435_v24 = vsel %vm1353_vm4, %v3305_v15, %v3434_v9  ;;  %v3309_v62 = vpop.permute.xlu0 %3308  ;;  %v3381_v19 = vrot.slane %v3311_v38, 4  ;;  %v7260_v20 = vld [vmem:[#allocation8 + $0xde0] sm:$0xff] }
 0x4aa   :  { %3514 = vst [vmem:[#allocation8 + $0x770] sm:$0xff] %v3433_v22  ;;  %3515 = vst [vmem:[#allocation8 + $0x778] sm:$0xff] %v3435_v24  ;;  %v3380_v51 = vrot.slane %v3309_v62, 4  ;;  %3602 = vrot.lane.b32.xlu1 %v6484_v13, %s4960_s29 }
 0x4ab   :  { %3600 = vrot.lane.b32.xlu0 %v7250_v47, %s4960_s29 }
 0x4ac   :  { %v3436_v35 = vsel %vm532_vm0, %v3380_v51, %v3381_v19  ;;  %v3315_v61 = vpop.permute.xlu1 %3314  ;;  %v7278_v51 = vld [vmem:[#allocation8 + $0xdf8] sm:$0xff] }
 0x4ad   :  { %v3437_v40 = vsel %vm1353_vm4, %v3309_v62, %v3436_v35  ;;  %v3313_v34 = vpop.permute.xlu0 %3312  ;;  %v3383_v26 = vrot.slane %v3315_v61, 4 }
 0x4ae   :  { %3516 = vst [vmem:[#allocation8 + $0x960] sm:$0xff] %v3437_v40  ;;  %v3382_v33 = vrot.slane %v3313_v34, 4  ;;  %3606 = vrot.lane.b32.xlu1 %v7256_v16, %s4960_s29 }
 0x4af   :  { %3604 = vrot.lane.b32.xlu0 %v7260_v20, %s4960_s29 }
 0x4b0   :  { %v3438_v42 = vsel %vm532_vm0, %v3381_v19, %v3382_v33  ;;  %v3319_v2 = vpop.permute.xlu1 %3318 }
 0x4b1   :  { %v3439_v1 = vsel %vm1353_vm4, %v3311_v38, %v3438_v42  ;;  %v3317_v60 = vpop.permute.xlu0 %3316  ;;  %v3385_v15 = vrot.slane %v3319_v2, 4  ;;  %v7284_v42 = vld [vmem:[#allocation8 + $0xfe8] sm:$0xff] }
 0x4b2   :  { %3517 = vst [vmem:[#allocation8 + $0x968] sm:$0xff] %v3439_v1  ;;  %v3384_v8 = vrot.slane %v3317_v60, 4  ;;  %3610 = vrot.lane.b32.xlu1 %v7266_v48, %s4960_s29  ;;  %v7288_v1 = vld [vmem:[#allocation8 + $0xfe0] sm:$0xff] }
 0x4b3   :  { %3608 = vrot.lane.b32.xlu0 %v6500_v44, %s4960_s29 }
 0x4b4   :  { %v3440_v23 = vsel %vm532_vm0, %v3383_v26, %v3384_v8  ;;  %v3442_v43 = vsel %vm532_vm0, %v3384_v8, %v3385_v15  ;;  %v3323_v24 = vpop.permute.xlu1 %3322 }
 0x4b5   :  { %v3441_v9 = vsel %vm1353_vm4, %v3315_v61, %v3440_v23  ;;  %v3443_v22 = vsel %vm1353_vm4, %v3317_v60, %v3442_v43  ;;  %v3321_v38 = vpop.permute.xlu0 %3320  ;;  %v3387_v62 = vrot.slane %v3323_v24, 4 }
 0x4b6   :  { %3518 = vst [vmem:[#allocation8 + $0x970] sm:$0xff] %v3441_v9  ;;  %3519 = vst [vmem:[#allocation8 + $0x978] sm:$0xff] %v3443_v22  ;;  %v3386_v19 = vrot.slane %v3321_v38, 4  ;;  %3614 = vrot.lane.b32.xlu1 %v6508_v63, %s4960_s29  ;;  %v7294_v9 = vld [vmem:[#allocation8 + $0xff0] sm:$0xff] }
 0x4b7   :  { %3612 = vrot.lane.b32.xlu0 %v7278_v51, %s4960_s29 }
 0x4b8   :  { %v3444_v35 = vsel %vm532_vm0, %v3386_v19, %v3387_v62  ;;  %v3327_v61 = vpop.permute.xlu1 %3326 }
 0x4b9   :  { %v3445_v40 = vsel %vm1353_vm4, %v3321_v38, %v3444_v35  ;;  %v3325_v34 = vpop.permute.xlu0 %3324  ;;  %v3389_v8 = vrot.slane %v3327_v61, 4 }
 0x4ba   :  { %3520 = vst [vmem:[#allocation8 + $0xb60] sm:$0xff] %v3445_v40  ;;  %v3388_v33 = vrot.slane %v3325_v34, 4  ;;  %3618 = vrot.lane.b32.xlu1 %v7284_v42, %s4960_s29 }
 0x4bb   :  { %3616 = vrot.lane.b32.xlu0 %v7288_v1, %s4960_s29 }
 0x4bc   :  { %v3446_v2 = vsel %vm532_vm0, %v3387_v62, %v3388_v33  ;;  %v3331_v26 = vpop.permute.xlu1 %3330  ;;  %v7306_v33 = vld [vmem:[#allocation8 + $0xff8] sm:$0xff] }
 0x4bd   :  { %v3447_v60 = vsel %vm1353_vm4, %v3323_v24, %v3446_v2  ;;  %v3329_v15 = vpop.permute.xlu0 %3328  ;;  %v3391_v23 = vrot.slane %v3331_v26, 4 }
 0x4be   :  { %3521 = vst [vmem:[#allocation8 + $0xb68] sm:$0xff] %v3447_v60  ;;  %v3390_v43 = vrot.slane %v3329_v15, 4  ;;  %3622 = vrot.lane.b32.xlu1 %v7294_v9, %s4960_s29 }
 0x4bf   :  { %3620 = vrot.lane.b32.xlu0 %v6524_v32, %s4960_s29 }
 0x4c0   :  { %v3448_v22 = vsel %vm532_vm0, %v3389_v8, %v3390_v43  ;;  %v3450_v38 = vsel %vm532_vm0, %v3390_v43, %v3391_v23  ;;  %v3335_v19 = vpop.permute.xlu1 %3334 }
 0x4c1   :  { %v3449_v24 = vsel %vm1353_vm4, %v3327_v61, %v3448_v22  ;;  %v3451_v62 = vsel %vm1353_vm4, %v3329_v15, %v3450_v38  ;;  %v3333_v35 = vpop.permute.xlu0 %3332  ;;  %v3393_v40 = vrot.slane %v3335_v19, 4 }
 0x4c2   :  { %3522 = vst [vmem:[#allocation8 + $0xb70] sm:$0xff] %v3449_v24  ;;  %3523 = vst [vmem:[#allocation8 + $0xb78] sm:$0xff] %v3451_v62  ;;  %v3392_v34 = vrot.slane %v3333_v35, 4  ;;  %3626 = vrot.lane.b32.xlu1 %v6532_v39, %s4960_s29 }
 0x4c3   :  { %3624 = vrot.lane.b32.xlu0 %v7306_v33, %s4960_s29 }
 0x4c4   :  { %v3452_v2 = vsel %vm532_vm0, %v3392_v34, %v3393_v40  ;;  %v3339_v60 = vpop.permute.xlu1 %3338 }
 0x4c5   :  { %v3453_v61 = vsel %vm1353_vm4, %v3333_v35, %v3452_v2  ;;  %v3337_v26 = vpop.permute.xlu0 %3336  ;;  %v3395_v38 = vrot.slane %v3339_v60, 4 }
 0x4c6   :  { %3524 = vst [vmem:[#allocation8 + $0xd60] sm:$0xff] %v3453_v61  ;;  %v3394_v15 = vrot.slane %v3337_v26, 4  ;;  %3806 = vrot.lane.b32.xlu1 %v7088_v25, %s4961_s5 }
 0x4c7   :  { %3804 = vrot.lane.b32.xlu0 %v7092_v3, %s4961_s5 }
 0x4c8   :  { %v3454_v8 = vsel %vm532_vm0, %v3393_v40, %v3394_v15  ;;  %v3343_v43 = vpop.permute.xlu1 %3342 }
 0x4c9   :  { %v3455_v23 = vsel %vm1353_vm4, %v3335_v19, %v3454_v8  ;;  %v3341_v22 = vpop.permute.xlu0 %3340  ;;  %v3397_v24 = vrot.slane %v3343_v43, 4 }
 0x4ca   :  { %3525 = vst [vmem:[#allocation8 + $0xd68] sm:$0xff] %v3455_v23  ;;  %v3396_v62 = vrot.slane %v3341_v22, 4  ;;  %3810 = vrot.lane.b32.xlu1 %v7098_v46, %s4961_s5 }
 0x4cb   :  { %3808 = vrot.lane.b32.xlu0 %v6356_v27, %s4961_s5 }
 0x4cc   :  { %v3456_v35 = vsel %vm532_vm0, %v3395_v38, %v3396_v62  ;;  %v3458_v34 = vsel %vm532_vm0, %v3396_v62, %v3397_v24  ;;  %v3347_v2 = vpop.permute.xlu1 %3346 }
 0x4cd   :  { %v3457_v40 = vsel %vm1353_vm4, %v3339_v60, %v3456_v35  ;;  %v3459_v19 = vsel %vm1353_vm4, %v3341_v22, %v3458_v34  ;;  %v3345_v61 = vpop.permute.xlu0 %3344  ;;  %v3399_v26 = vrot.slane %v3347_v2, 4 }
 0x4ce   :  { %3526 = vst [vmem:[#allocation8 + $0xd70] sm:$0xff] %v3457_v40  ;;  %3527 = vst [vmem:[#allocation8 + $0xd78] sm:$0xff] %v3459_v19  ;;  %v3398_v15 = vrot.slane %v3345_v61, 4  ;;  %3814 = vrot.lane.b32.xlu1 %v6364_v11, %s4961_s5 }
 0x4cf   :  { %3812 = vrot.lane.b32.xlu0 %v7110_v50, %s4961_s5 }
 0x4d0   :  { %v3460_v8 = vsel %vm532_vm0, %v3398_v15, %v3399_v26  ;;  %v3351_v43 = vpop.permute.xlu1 %3350 }
 0x4d1   :  { %v3461_v23 = vsel %vm1353_vm4, %v3345_v61, %v3460_v8  ;;  %v3349_v60 = vpop.permute.xlu0 %3348  ;;  %v3401_v34 = vrot.slane %v3351_v43, 4 }
 0x4d2   :  { %3528 = vst [vmem:[#allocation8 + $0xf60] sm:$0xff] %v3461_v23  ;;  %v3400_v22 = vrot.slane %v3349_v60, 4  ;;  %3818 = vrot.lane.b32.xlu1 %v7116_v14, %s4961_s5 }
 0x4d3   :  { %3816 = vrot.lane.b32.xlu0 %v7120_v7, %s4961_s5 }
 0x4d4   :  { %v3462_v38 = vsel %vm532_vm0, %v3399_v26, %v3400_v22  ;;  %v3355_v62 = vpop.permute.xlu1 %3354 }
 0x4d5   :  { %v3463_v24 = vsel %vm1353_vm4, %v3347_v2, %v3462_v38  ;;  %v3353_v35 = vpop.permute.xlu0 %3352  ;;  %v3403_v40 = vrot.slane %v3355_v62, 4 }
 0x4d6   :  { %3529 = vst [vmem:[#allocation8 + $0xf68] sm:$0xff] %v3463_v24  ;;  %v3402_v19 = vrot.slane %v3353_v35, 4  ;;  %3822 = vrot.lane.b32.xlu1 %v7126_v41, %s4961_s5 }
 0x4d7   :  { %3820 = vrot.lane.b32.xlu0 %v6380_v59, %s4961_s5 }
 0x4d8   :  { %v3464_v61 = vsel %vm532_vm0, %v3401_v34, %v3402_v19  ;;  %v3466_v15 = vsel %vm532_vm0, %v3402_v19, %v3403_v40  ;;  %v3535_v8 = vpop.permute.xlu1 %3534 }
 0x4d9   :  { %v3465_v26 = vsel %vm1353_vm4, %v3351_v43, %v3464_v61  ;;  %v3467_v2 = vsel %vm1353_vm4, %v3353_v35, %v3466_v15  ;;  %v3533_v23 = vpop.permute.xlu0 %3532  ;;  %v3629_v60 = vrot.slane %v3535_v8, 4 }
 0x4da   :  { %3530 = vst [vmem:[#allocation8 + $0xf70] sm:$0xff] %v3465_v26  ;;  %3531 = vst [vmem:[#allocation8 + $0xf78] sm:$0xff] %v3467_v2  ;;  %v3628_v22 = vrot.slane %v3533_v23, 4  ;;  %3826 = vrot.lane.b32.xlu1 %v6388_v57, %s4961_s5 }
 0x4db   :  { %3824 = vrot.lane.b32.xlu0 %v7138_v55, %s4961_s5 }
 0x4dc   :  { %v3676_v38 = vsel %vm532_vm0, %v3628_v22, %v3629_v60  ;;  %v3539_v62 = vpop.permute.xlu1 %3538 }
 0x4dd   :  { %v3677_v24 = vsel %vm1626_vm5, %v3533_v23, %v3676_v38  ;;  %v3537_v43 = vpop.permute.xlu0 %3536  ;;  %v3631_v15 = vrot.slane %v3539_v62, 4 }
 0x4de   :  { %3772 = vst [vmem:[#allocation8 + $0x180] sm:$0xff] %v3677_v24  ;;  %v3630_v35 = vrot.slane %v3537_v43, 4  ;;  %3830 = vrot.lane.b32.xlu1 %v7144_v54, %s4961_s5 }
 0x4df   :  { %3828 = vrot.lane.b32.xlu0 %v7148_v58, %s4961_s5 }
 0x4e0   :  { %v3678_v34 = vsel %vm532_vm0, %v3629_v60, %v3630_v35  ;;  %v3543_v19 = vpop.permute.xlu1 %3542 }
 0x4e1   :  { %v3679_v40 = vsel %vm1626_vm5, %v3535_v8, %v3678_v34  ;;  %v3541_v61 = vpop.permute.xlu0 %3540  ;;  %v3633_v26 = vrot.slane %v3543_v19, 4 }
 0x4e2   :  { %3773 = vst [vmem:[#allocation8 + $0x188] sm:$0xff] %v3679_v40  ;;  %v3632_v2 = vrot.slane %v3541_v61, 4  ;;  %3834 = vrot.lane.b32.xlu1 %v7154_v17, %s4961_s5 }
 0x4e3   :  { %3832 = vrot.lane.b32.xlu0 %v6404_v52, %s4961_s5 }
 0x4e4   :  { %v3680_v23 = vsel %vm532_vm0, %v3631_v15, %v3632_v2  ;;  %v3682_v22 = vsel %vm532_vm0, %v3632_v2, %v3633_v26  ;;  %v3547_v38 = vpop.permute.xlu1 %3546 }
 0x4e5   :  { %v3681_v60 = vsel %vm1626_vm5, %v3539_v62, %v3680_v23  ;;  %v3683_v8 = vsel %vm1626_vm5, %v3541_v61, %v3682_v22  ;;  %v3545_v24 = vpop.permute.xlu0 %3544  ;;  %v3635_v43 = vrot.slane %v3547_v38, 4 }
 0x4e6   :  { %3774 = vst [vmem:[#allocation8 + $0x190] sm:$0xff] %v3681_v60  ;;  %3775 = vst [vmem:[#allocation8 + $0x198] sm:$0xff] %v3683_v8  ;;  %v3634_v35 = vrot.slane %v3545_v24, 4  ;;  %3838 = vrot.lane.b32.xlu1 %v6412_v5, %s4961_s5 }
 0x4e7   :  { %3836 = vrot.lane.b32.xlu0 %v7166_v18, %s4961_s5 }
 0x4e8   :  { %v3684_v34 = vsel %vm532_vm0, %v3634_v35, %v3635_v43  ;;  %v3551_v19 = vpop.permute.xlu1 %3550 }
 0x4e9   :  { %v3685_v40 = vsel %vm1626_vm5, %v3545_v24, %v3684_v34  ;;  %v3549_v62 = vpop.permute.xlu0 %3548  ;;  %v3637_v22 = vrot.slane %v3551_v19, 4 }
 0x4ea   :  { %3776 = vst [vmem:[#allocation8 + $0x380] sm:$0xff] %v3685_v40  ;;  %v3636_v61 = vrot.slane %v3549_v62, 4  ;;  %3842 = vrot.lane.b32.xlu1 %v7172_v12, %s4961_s5 }
 0x4eb   :  { %3840 = vrot.lane.b32.xlu0 %v7176_v31, %s4961_s5 }
 0x4ec   :  { %v3686_v15 = vsel %vm532_vm0, %v3635_v43, %v3636_v61  ;;  %v3555_v2 = vpop.permute.xlu1 %3554 }
 0x4ed   :  { %v3687_v26 = vsel %vm1626_vm5, %v3547_v38, %v3686_v15  ;;  %v3553_v23 = vpop.permute.xlu0 %3552  ;;  %v3639_v60 = vrot.slane %v3555_v2, 4 }
 0x4ee   :  { %3777 = vst [vmem:[#allocation8 + $0x388] sm:$0xff] %v3687_v26  ;;  %v3638_v8 = vrot.slane %v3553_v23, 4  ;;  %3846 = vrot.lane.b32.xlu1 %v7182_v28, %s4961_s5 }
 0x4ef   :  { %3844 = vrot.lane.b32.xlu0 %v6428_v37, %s4961_s5 }
 0x4f0   :  { %v3688_v24 = vsel %vm532_vm0, %v3637_v22, %v3638_v8  ;;  %v3690_v35 = vsel %vm532_vm0, %v3638_v8, %v3639_v60  ;;  %v3559_v34 = vpop.permute.xlu1 %3558 }
 0x4f1   :  { %v3689_v43 = vsel %vm1626_vm5, %v3551_v19, %v3688_v24  ;;  %v3691_v38 = vsel %vm1626_vm5, %v3553_v23, %v3690_v35  ;;  %v3557_v40 = vpop.permute.xlu0 %3556  ;;  %v3641_v62 = vrot.slane %v3559_v34, 4 }
 0x4f2   :  { %3778 = vst [vmem:[#allocation8 + $0x390] sm:$0xff] %v3689_v43  ;;  %3779 = vst [vmem:[#allocation8 + $0x398] sm:$0xff] %v3691_v38  ;;  %v3640_v61 = vrot.slane %v3557_v40, 4  ;;  %3850 = vrot.lane.b32.xlu1 %v6436_v21, %s4961_s5 }
 0x4f3   :  { %3848 = vrot.lane.b32.xlu0 %v7194_v29, %s4961_s5 }
 0x4f4   :  { %v3692_v15 = vsel %vm532_vm0, %v3640_v61, %v3641_v62  ;;  %v3563_v2 = vpop.permute.xlu1 %3562 }
 0x4f5   :  { %v3693_v26 = vsel %vm1626_vm5, %v3557_v40, %v3692_v15  ;;  %v3561_v19 = vpop.permute.xlu0 %3560  ;;  %v3643_v35 = vrot.slane %v3563_v2, 4 }
 0x4f6   :  { %3780 = vst [vmem:[#allocation8 + $0x580] sm:$0xff] %v3693_v26  ;;  %v3642_v23 = vrot.slane %v3561_v19, 4  ;;  %3854 = vrot.lane.b32.xlu1 %v7200_v6, %s4961_s5 }
 0x4f7   :  { %3852 = vrot.lane.b32.xlu0 %v7204_v56, %s4961_s5 }
 0x4f8   :  { %v3694_v22 = vsel %vm532_vm0, %v3641_v62, %v3642_v23  ;;  %v3567_v8 = vpop.permute.xlu1 %3566 }
 0x4f9   :  { %v3695_v60 = vsel %vm1626_vm5, %v3559_v34, %v3694_v22  ;;  %v3565_v24 = vpop.permute.xlu0 %3564  ;;  %v3645_v43 = vrot.slane %v3567_v8, 4 }
 0x4fa   :  { %3781 = vst [vmem:[#allocation8 + $0x588] sm:$0xff] %v3695_v60  ;;  %v3644_v38 = vrot.slane %v3565_v24, 4  ;;  %3858 = vrot.lane.b32.xlu1 %v7210_v30, %s4961_s5 }
 0x4fb   :  { %3856 = vrot.lane.b32.xlu0 %v6452_v49, %s4961_s5 }
 0x4fc   :  { %v3696_v40 = vsel %vm532_vm0, %v3643_v35, %v3644_v38  ;;  %v3698_v61 = vsel %vm532_vm0, %v3644_v38, %v3645_v43  ;;  %v3571_v15 = vpop.permute.xlu1 %3570 }
 0x4fd   :  { %v3697_v62 = vsel %vm1626_vm5, %v3563_v2, %v3696_v40  ;;  %v3699_v34 = vsel %vm1626_vm5, %v3565_v24, %v3698_v61  ;;  %v3569_v26 = vpop.permute.xlu0 %3568  ;;  %v3647_v19 = vrot.slane %v3571_v15, 4 }
 0x4fe   :  { %3782 = vst [vmem:[#allocation8 + $0x590] sm:$0xff] %v3697_v62  ;;  %3783 = vst [vmem:[#allocation8 + $0x598] sm:$0xff] %v3699_v34  ;;  %v3646_v23 = vrot.slane %v3569_v26, 4  ;;  %3862 = vrot.lane.b32.xlu1 %v6460_v0, %s4961_s5 }
 0x4ff   :  { %3860 = vrot.lane.b32.xlu0 %v7222_v10, %s4961_s5 }
 0x500   :  { %v3700_v22 = vsel %vm532_vm0, %v3646_v23, %v3647_v19  ;;  %v3575_v8 = vpop.permute.xlu1 %3574 }
 0x501   :  { %v3701_v60 = vsel %vm1626_vm5, %v3569_v26, %v3700_v22  ;;  %v3573_v2 = vpop.permute.xlu0 %3572  ;;  %v3649_v61 = vrot.slane %v3575_v8, 4 }
 0x502   :  { %3784 = vst [vmem:[#allocation8 + $0x780] sm:$0xff] %v3701_v60  ;;  %v3648_v24 = vrot.slane %v3573_v2, 4  ;;  %3866 = vrot.lane.b32.xlu1 %v7228_v36, %s4961_s5 }
 0x503   :  { %3864 = vrot.lane.b32.xlu0 %v7232_v45, %s4961_s5 }
 0x504   :  { %v3702_v35 = vsel %vm532_vm0, %v3647_v19, %v3648_v24  ;;  %v3579_v38 = vpop.permute.xlu1 %3578 }
 0x505   :  { %v3703_v43 = vsel %vm1626_vm5, %v3571_v15, %v3702_v35  ;;  %v3577_v40 = vpop.permute.xlu0 %3576  ;;  %v3651_v62 = vrot.slane %v3579_v38, 4 }
 0x506   :  { %3785 = vst [vmem:[#allocation8 + $0x788] sm:$0xff] %v3703_v43  ;;  %v3650_v34 = vrot.slane %v3577_v40, 4  ;;  %3870 = vrot.lane.b32.xlu1 %v7238_v53, %s4961_s5 }
 0x507   :  { %3868 = vrot.lane.b32.xlu0 %v6476_v4, %s4961_s5 }
 0x508   :  { %v3704_v26 = vsel %vm532_vm0, %v3649_v61, %v3650_v34  ;;  %v3706_v23 = vsel %vm532_vm0, %v3650_v34, %v3651_v62  ;;  %v3583_v22 = vpop.permute.xlu1 %3582 }
 0x509   :  { %v3705_v19 = vsel %vm1626_vm5, %v3575_v8, %v3704_v26  ;;  %v3707_v15 = vsel %vm1626_vm5, %v3577_v40, %v3706_v23  ;;  %v3581_v60 = vpop.permute.xlu0 %3580  ;;  %v3653_v2 = vrot.slane %v3583_v22, 4 }
 0x50a   :  { %3786 = vst [vmem:[#allocation8 + $0x790] sm:$0xff] %v3705_v19  ;;  %3787 = vst [vmem:[#allocation8 + $0x798] sm:$0xff] %v3707_v15  ;;  %v3652_v24 = vrot.slane %v3581_v60, 4  ;;  %3874 = vrot.lane.b32.xlu1 %v6484_v13, %s4961_s5 }
 0x50b   :  { %3872 = vrot.lane.b32.xlu0 %v7250_v47, %s4961_s5 }
 0x50c   :  { %v3708_v35 = vsel %vm532_vm0, %v3652_v24, %v3653_v2  ;;  %v3587_v38 = vpop.permute.xlu1 %3586 }
 0x50d   :  { %v3709_v43 = vsel %vm1626_vm5, %v3581_v60, %v3708_v35  ;;  %v3585_v8 = vpop.permute.xlu0 %3584  ;;  %v3655_v23 = vrot.slane %v3587_v38, 4 }
 0x50e   :  { %3788 = vst [vmem:[#allocation8 + $0x980] sm:$0xff] %v3709_v43  ;;  %v3654_v40 = vrot.slane %v3585_v8, 4  ;;  %3878 = vrot.lane.b32.xlu1 %v7256_v16, %s4961_s5 }
 0x50f   :  { %3876 = vrot.lane.b32.xlu0 %v7260_v20, %s4961_s5 }
 0x510   :  { %v3710_v61 = vsel %vm532_vm0, %v3653_v2, %v3654_v40  ;;  %v3591_v34 = vpop.permute.xlu1 %3590 }
 0x511   :  { %v3711_v62 = vsel %vm1626_vm5, %v3583_v22, %v3710_v61  ;;  %v3589_v26 = vpop.permute.xlu0 %3588  ;;  %v3657_v19 = vrot.slane %v3591_v34, 4 }
 0x512   :  { %3789 = vst [vmem:[#allocation8 + $0x988] sm:$0xff] %v3711_v62  ;;  %v3656_v15 = vrot.slane %v3589_v26, 4  ;;  %3882 = vrot.lane.b32.xlu1 %v7266_v48, %s4961_s5 }
 0x513   :  { %3880 = vrot.lane.b32.xlu0 %v6500_v44, %s4961_s5 }
 0x514   :  { %v3712_v60 = vsel %vm532_vm0, %v3655_v23, %v3656_v15  ;;  %v3714_v24 = vsel %vm532_vm0, %v3656_v15, %v3657_v19  ;;  %v3595_v35 = vpop.permute.xlu1 %3594 }
 0x515   :  { %v3713_v2 = vsel %vm1626_vm5, %v3587_v38, %v3712_v60  ;;  %v3715_v22 = vsel %vm1626_vm5, %v3589_v26, %v3714_v24  ;;  %v3593_v43 = vpop.permute.xlu0 %3592  ;;  %v3659_v8 = vrot.slane %v3595_v35, 4 }
 0x516   :  { %3790 = vst [vmem:[#allocation8 + $0x990] sm:$0xff] %v3713_v2  ;;  %3791 = vst [vmem:[#allocation8 + $0x998] sm:$0xff] %v3715_v22  ;;  %v3658_v40 = vrot.slane %v3593_v43, 4  ;;  %3886 = vrot.lane.b32.xlu1 %v6508_v63, %s4961_s5 }
 0x517   :  { %3884 = vrot.lane.b32.xlu0 %v7278_v51, %s4961_s5 }
 0x518   :  { %v3716_v61 = vsel %vm532_vm0, %v3658_v40, %v3659_v8  ;;  %v3599_v34 = vpop.permute.xlu1 %3598 }
 0x519   :  { %v3717_v62 = vsel %vm1626_vm5, %v3593_v43, %v3716_v61  ;;  %v3597_v38 = vpop.permute.xlu0 %3596  ;;  %v3661_v24 = vrot.slane %v3599_v34, 4 }
 0x51a   :  { %3792 = vst [vmem:[#allocation8 + $0xb80] sm:$0xff] %v3717_v62  ;;  %v3660_v26 = vrot.slane %v3597_v38, 4  ;;  %3890 = vrot.lane.b32.xlu1 %v7284_v42, %s4961_s5 }
 0x51b   :  { %3888 = vrot.lane.b32.xlu0 %v7288_v1, %s4961_s5 }
 0x51c   :  { %v3718_v23 = vsel %vm532_vm0, %v3659_v8, %v3660_v26  ;;  %v3603_v15 = vpop.permute.xlu1 %3602 }
 0x51d   :  { %v3719_v19 = vsel %vm1626_vm5, %v3595_v35, %v3718_v23  ;;  %v3601_v60 = vpop.permute.xlu0 %3600  ;;  %v3663_v2 = vrot.slane %v3603_v15, 4 }
 0x51e   :  { %3793 = vst [vmem:[#allocation8 + $0xb88] sm:$0xff] %v3719_v19  ;;  %v3662_v22 = vrot.slane %v3601_v60, 4  ;;  %3894 = vrot.lane.b32.xlu1 %v7294_v9, %s4961_s5 }
 0x51f   :  { %3892 = vrot.lane.b32.xlu0 %v6524_v32, %s4961_s5 }
 0x520   :  { %v3720_v43 = vsel %vm532_vm0, %v3661_v24, %v3662_v22  ;;  %v3722_v40 = vsel %vm532_vm0, %v3662_v22, %v3663_v2  ;;  %v3607_v61 = vpop.permute.xlu1 %3606 }
 0x521   :  { %v3721_v8 = vsel %vm1626_vm5, %v3599_v34, %v3720_v43  ;;  %v3723_v35 = vsel %vm1626_vm5, %v3601_v60, %v3722_v40  ;;  %v3605_v62 = vpop.permute.xlu0 %3604  ;;  %v3665_v38 = vrot.slane %v3607_v61, 4 }
 0x522   :  { %3794 = vst [vmem:[#allocation8 + $0xb90] sm:$0xff] %v3721_v8  ;;  %3795 = vst [vmem:[#allocation8 + $0xb98] sm:$0xff] %v3723_v35  ;;  %v3664_v26 = vrot.slane %v3605_v62, 4  ;;  %3898 = vrot.lane.b32.xlu1 %v6532_v39, %s4961_s5 }
 0x523   :  { %3896 = vrot.lane.b32.xlu0 %v7306_v33, %s4961_s5 }
 0x524   :  { %v3724_v23 = vsel %vm532_vm0, %v3664_v26, %v3665_v38  ;;  %v3611_v15 = vpop.permute.xlu1 %3610 }
 0x525   :  { %v3725_v19 = vsel %vm1626_vm5, %v3605_v62, %v3724_v23  ;;  %v3609_v34 = vpop.permute.xlu0 %3608  ;;  %v3667_v40 = vrot.slane %v3611_v15, 4 }
 0x526   :  { %3796 = vst [vmem:[#allocation8 + $0xd80] sm:$0xff] %v3725_v19  ;;  %v3666_v60 = vrot.slane %v3609_v34, 4  ;;  %4078 = vrot.lane.b32.xlu1 %v7088_v25, %s4962_s6 }
 0x527   :  { %4076 = vrot.lane.b32.xlu0 %v7092_v3, %s4962_s6 }
 0x528   :  { %v3726_v24 = vsel %vm532_vm0, %v3665_v38, %v3666_v60  ;;  %v3615_v22 = vpop.permute.xlu1 %3614 }
 0x529   :  { %v3727_v2 = vsel %vm1626_vm5, %v3607_v61, %v3726_v24  ;;  %v3613_v43 = vpop.permute.xlu0 %3612  ;;  %v3669_v8 = vrot.slane %v3615_v22, 4 }
 0x52a   :  { %3797 = vst [vmem:[#allocation8 + $0xd88] sm:$0xff] %v3727_v2  ;;  %v3668_v35 = vrot.slane %v3613_v43, 4  ;;  %4082 = vrot.lane.b32.xlu1 %v7098_v46, %s4962_s6 }
 0x52b   :  { %4080 = vrot.lane.b32.xlu0 %v6356_v27, %s4962_s6 }
 0x52c   :  { %v3728_v25 = vsel %vm532_vm0, %v3667_v40, %v3668_v35  ;;  %v3730_v3 = vsel %vm532_vm0, %v3668_v35, %v3669_v8  ;;  %v3619_v38 = vpop.permute.xlu1 %3618 }
 0x52d   :  { %v3729_v62 = vsel %vm1626_vm5, %v3611_v15, %v3728_v25  ;;  %v3731_v61 = vsel %vm1626_vm5, %v3613_v43, %v3730_v3  ;;  %v3617_v26 = vpop.permute.xlu0 %3616  ;;  %v3671_v23 = vrot.slane %v3619_v38, 4 }
 0x52e   :  { %3798 = vst [vmem:[#allocation8 + $0xd90] sm:$0xff] %v3729_v62  ;;  %3799 = vst [vmem:[#allocation8 + $0xd98] sm:$0xff] %v3731_v61  ;;  %v3670_v19 = vrot.slane %v3617_v26, 4  ;;  %4086 = vrot.lane.b32.xlu1 %v6364_v11, %s4962_s6 }
 0x52f   :  { %4084 = vrot.lane.b32.xlu0 %v7110_v50, %s4962_s6 }
 0x530   :  { %v3732_v27 = vsel %vm532_vm0, %v3670_v19, %v3671_v23  ;;  %v3623_v34 = vpop.permute.xlu1 %3622 }
 0x531   :  { %v3733_v46 = vsel %vm1626_vm5, %v3617_v26, %v3732_v27  ;;  %v3621_v15 = vpop.permute.xlu0 %3620  ;;  %v3673_v22 = vrot.slane %v3623_v34, 4 }
 0x532   :  { %3800 = vst [vmem:[#allocation8 + $0xf80] sm:$0xff] %v3733_v46  ;;  %v3672_v60 = vrot.slane %v3621_v15, 4  ;;  %4090 = vrot.lane.b32.xlu1 %v7116_v14, %s4962_s6 }
 0x533   :  { %4088 = vrot.lane.b32.xlu0 %v7120_v7, %s4962_s6 }
 0x534   :  { %v3734_v24 = vsel %vm532_vm0, %v3671_v23, %v3672_v60  ;;  %v3627_v2 = vpop.permute.xlu1 %3626 }
 0x535   :  { %v3735_v11 = vsel %vm1626_vm5, %v3619_v38, %v3734_v24  ;;  %v3625_v50 = vpop.permute.xlu0 %3624  ;;  %v3675_v43 = vrot.slane %v3627_v2, 4 }
 0x536   :  { %3801 = vst [vmem:[#allocation8 + $0xf88] sm:$0xff] %v3735_v11  ;;  %v3674_v40 = vrot.slane %v3625_v50, 4  ;;  %4094 = vrot.lane.b32.xlu1 %v7126_v41, %s4962_s6 }
 0x537   :  { %4092 = vrot.lane.b32.xlu0 %v6380_v59, %s4962_s6 }
 0x538   :  { %v3736_v14 = vsel %vm532_vm0, %v3673_v22, %v3674_v40  ;;  %v3738_v7 = vsel %vm532_vm0, %v3674_v40, %v3675_v43  ;;  %v3807_v25 = vpop.permute.xlu1 %3806 }
 0x539   :  { %v3737_v8 = vsel %vm1626_vm5, %v3623_v34, %v3736_v14  ;;  %v3739_v35 = vsel %vm1626_vm5, %v3625_v50, %v3738_v7  ;;  %v3805_v3 = vpop.permute.xlu0 %3804  ;;  %v3901_v62 = vrot.slane %v3807_v25, 4 }
 0x53a   :  { %3802 = vst [vmem:[#allocation8 + $0xf90] sm:$0xff] %v3737_v8  ;;  %3803 = vst [vmem:[#allocation8 + $0xf98] sm:$0xff] %v3739_v35  ;;  %v3900_v61 = vrot.slane %v3805_v3, 4  ;;  %4098 = vrot.lane.b32.xlu1 %v6388_v57, %s4962_s6 }
 0x53b   :  { %4096 = vrot.lane.b32.xlu0 %v7138_v55, %s4962_s6 }
 0x53c   :  { %v3948_v59 = vsel %vm532_vm0, %v3900_v61, %v3901_v62  ;;  %v3811_v38 = vpop.permute.xlu1 %3810 }
 0x53d   :  { %v3949_v41 = vsel %vm1899_vm6, %v3805_v3, %v3948_v59  ;;  %v3809_v26 = vpop.permute.xlu0 %3808  ;;  %v3903_v46 = vrot.slane %v3811_v38, 4 }
 0x53e   :  { %4044 = vst [vmem:[#allocation8 + $0x1a0] sm:$0xff] %v3949_v41  ;;  %v3902_v23 = vrot.slane %v3809_v26, 4  ;;  %4102 = vrot.lane.b32.xlu1 %v7144_v54, %s4962_s6 }
 0x53f   :  { %4100 = vrot.lane.b32.xlu0 %v7148_v58, %s4962_s6 }
 0x540   :  { %v3950_v19 = vsel %vm532_vm0, %v3901_v62, %v3902_v23  ;;  %v3815_v27 = vpop.permute.xlu1 %3814 }
 0x541   :  { %v3951_v57 = vsel %vm1899_vm6, %v3807_v25, %v3950_v19  ;;  %v3813_v55 = vpop.permute.xlu0 %3812  ;;  %v3905_v34 = vrot.slane %v3815_v27, 4 }
 0x542   :  { %4045 = vst [vmem:[#allocation8 + $0x1a8] sm:$0xff] %v3951_v57  ;;  %v3904_v15 = vrot.slane %v3813_v55, 4  ;;  %4106 = vrot.lane.b32.xlu1 %v7154_v17, %s4962_s6 }
 0x543   :  { %4104 = vrot.lane.b32.xlu0 %v6404_v52, %s4962_s6 }
 0x544   :  { %v3952_v54 = vsel %vm532_vm0, %v3903_v46, %v3904_v15  ;;  %v3954_v58 = vsel %vm532_vm0, %v3904_v15, %v3905_v34  ;;  %v3819_v11 = vpop.permute.xlu1 %3818 }
 0x545   :  { %v3953_v60 = vsel %vm1899_vm6, %v3811_v38, %v3952_v54  ;;  %v3955_v24 = vsel %vm1899_vm6, %v3813_v55, %v3954_v58  ;;  %v3817_v2 = vpop.permute.xlu0 %3816  ;;  %v3907_v50 = vrot.slane %v3819_v11, 4 }
 0x546   :  { %4046 = vst [vmem:[#allocation8 + $0x1b0] sm:$0xff] %v3953_v60  ;;  %4047 = vst [vmem:[#allocation8 + $0x1b8] sm:$0xff] %v3955_v24  ;;  %v3906_v22 = vrot.slane %v3817_v2, 4  ;;  %4110 = vrot.lane.b32.xlu1 %v6412_v5, %s4962_s6 }
 0x547   :  { %4108 = vrot.lane.b32.xlu0 %v7166_v18, %s4962_s6 }
 0x548   :  { %v3956_v52 = vsel %vm532_vm0, %v3906_v22, %v3907_v50  ;;  %v3823_v43 = vpop.permute.xlu1 %3822 }
 0x549   :  { %v3957_v17 = vsel %vm1899_vm6, %v3817_v2, %v3956_v52  ;;  %v3821_v40 = vpop.permute.xlu0 %3820  ;;  %v3909_v35 = vrot.slane %v3823_v43, 4 }
 0x54a   :  { %4048 = vst [vmem:[#allocation8 + $0x3a0] sm:$0xff] %v3957_v17  ;;  %v3908_v14 = vrot.slane %v3821_v40, 4  ;;  %4114 = vrot.lane.b32.xlu1 %v7172_v12, %s4962_s6 }
 0x54b   :  { %4112 = vrot.lane.b32.xlu0 %v7176_v31, %s4962_s6 }
 0x54c   :  { %v3958_v7 = vsel %vm532_vm0, %v3907_v50, %v3908_v14  ;;  %v3827_v8 = vpop.permute.xlu1 %3826 }
 0x54d   :  { %v3959_v5 = vsel %vm1899_vm6, %v3819_v11, %v3958_v7  ;;  %v3825_v18 = vpop.permute.xlu0 %3824  ;;  %v3911_v25 = vrot.slane %v3827_v8, 4 }
 0x54e   :  { %4049 = vst [vmem:[#allocation8 + $0x3a8] sm:$0xff] %v3959_v5  ;;  %v3910_v3 = vrot.slane %v3825_v18, 4  ;;  %4118 = vrot.lane.b32.xlu1 %v7182_v28, %s4962_s6 }
 0x54f   :  { %4116 = vrot.lane.b32.xlu0 %v6428_v37, %s4962_s6 }
 0x550   :  { %v3960_v12 = vsel %vm532_vm0, %v3909_v35, %v3910_v3  ;;  %v3962_v31 = vsel %vm532_vm0, %v3910_v3, %v3911_v25  ;;  %v3831_v59 = vpop.permute.xlu1 %3830 }
 0x551   :  { %v3961_v62 = vsel %vm1899_vm6, %v3823_v43, %v3960_v12  ;;  %v3963_v61 = vsel %vm1899_vm6, %v3825_v18, %v3962_v31  ;;  %v3829_v41 = vpop.permute.xlu0 %3828  ;;  %v3913_v38 = vrot.slane %v3831_v59, 4 }
 0x552   :  { %4050 = vst [vmem:[#allocation8 + $0x3b0] sm:$0xff] %v3961_v62  ;;  %4051 = vst [vmem:[#allocation8 + $0x3b8] sm:$0xff] %v3963_v61  ;;  %v3912_v26 = vrot.slane %v3829_v41, 4  ;;  %4122 = vrot.lane.b32.xlu1 %v6436_v21, %s4962_s6 }
 0x553   :  { %4120 = vrot.lane.b32.xlu0 %v7194_v29, %s4962_s6 }
 0x554   :  { %v3964_v37 = vsel %vm532_vm0, %v3912_v26, %v3913_v38  ;;  %v3835_v23 = vpop.permute.xlu1 %3834 }
 0x555   :  { %v3965_v28 = vsel %vm1899_vm6, %v3829_v41, %v3964_v37  ;;  %v3833_v19 = vpop.permute.xlu0 %3832  ;;  %v3915_v46 = vrot.slane %v3835_v23, 4 }
 0x556   :  { %4052 = vst [vmem:[#allocation8 + $0x5a0] sm:$0xff] %v3965_v28  ;;  %v3914_v57 = vrot.slane %v3833_v19, 4  ;;  %4126 = vrot.lane.b32.xlu1 %v7200_v6, %s4962_s6 }
 0x557   :  { %4124 = vrot.lane.b32.xlu0 %v7204_v56, %s4962_s6 }
 0x558   :  { %v3966_v27 = vsel %vm532_vm0, %v3913_v38, %v3914_v57  ;;  %v3839_v55 = vpop.permute.xlu1 %3838 }
 0x559   :  { %v3967_v21 = vsel %vm1899_vm6, %v3831_v59, %v3966_v27  ;;  %v3837_v29 = vpop.permute.xlu0 %3836  ;;  %v3917_v34 = vrot.slane %v3839_v55, 4 }
 0x55a   :  { %4053 = vst [vmem:[#allocation8 + $0x5a8] sm:$0xff] %v3967_v21  ;;  %v3916_v15 = vrot.slane %v3837_v29, 4  ;;  %4130 = vrot.lane.b32.xlu1 %v7210_v30, %s4962_s6 }
 0x55b   :  { %4128 = vrot.lane.b32.xlu0 %v6452_v49, %s4962_s6 }
 0x55c   :  { %v3968_v6 = vsel %vm532_vm0, %v3915_v46, %v3916_v15  ;;  %v3970_v56 = vsel %vm532_vm0, %v3916_v15, %v3917_v34  ;;  %v3843_v60 = vpop.permute.xlu1 %3842 }
 0x55d   :  { %v3969_v54 = vsel %vm1899_vm6, %v3835_v23, %v3968_v6  ;;  %v3971_v58 = vsel %vm1899_vm6, %v3837_v29, %v3970_v56  ;;  %v3841_v24 = vpop.permute.xlu0 %3840  ;;  %v3919_v11 = vrot.slane %v3843_v60, 4 }
 0x55e   :  { %4054 = vst [vmem:[#allocation8 + $0x5b0] sm:$0xff] %v3969_v54  ;;  %4055 = vst [vmem:[#allocation8 + $0x5b8] sm:$0xff] %v3971_v58  ;;  %v3918_v2 = vrot.slane %v3841_v24, 4  ;;  %4134 = vrot.lane.b32.xlu1 %v6460_v0, %s4962_s6 }
 0x55f   :  { %4132 = vrot.lane.b32.xlu0 %v7222_v10, %s4962_s6 }
 0x560   :  { %v3972_v49 = vsel %vm532_vm0, %v3918_v2, %v3919_v11  ;;  %v3847_v50 = vpop.permute.xlu1 %3846 }
 0x561   :  { %v3973_v30 = vsel %vm1899_vm6, %v3841_v24, %v3972_v49  ;;  %v3845_v22 = vpop.permute.xlu0 %3844  ;;  %v3921_v40 = vrot.slane %v3847_v50, 4 }
 0x562   :  { %4056 = vst [vmem:[#allocation8 + $0x7a0] sm:$0xff] %v3973_v30  ;;  %v3920_v52 = vrot.slane %v3845_v22, 4  ;;  %4138 = vrot.lane.b32.xlu1 %v7228_v36, %s4962_s6 }
 0x563   :  { %4136 = vrot.lane.b32.xlu0 %v7232_v45, %s4962_s6 }
 0x564   :  { %v3974_v17 = vsel %vm532_vm0, %v3919_v11, %v3920_v52  ;;  %v3851_v43 = vpop.permute.xlu1 %3850 }
 0x565   :  { %v3975_v0 = vsel %vm1899_vm6, %v3843_v60, %v3974_v17  ;;  %v3849_v10 = vpop.permute.xlu0 %3848  ;;  %v3923_v14 = vrot.slane %v3851_v43, 4 }
 0x566   :  { %4057 = vst [vmem:[#allocation8 + $0x7a8] sm:$0xff] %v3975_v0  ;;  %v3922_v7 = vrot.slane %v3849_v10, 4  ;;  %4142 = vrot.lane.b32.xlu1 %v7238_v53, %s4962_s6 }
 0x567   :  { %4140 = vrot.lane.b32.xlu0 %v6476_v4, %s4962_s6 }
 0x568   :  { %v3976_v36 = vsel %vm532_vm0, %v3921_v40, %v3922_v7  ;;  %v3978_v45 = vsel %vm532_vm0, %v3922_v7, %v3923_v14  ;;  %v3855_v18 = vpop.permute.xlu1 %3854 }
 0x569   :  { %v3977_v5 = vsel %vm1899_vm6, %v3847_v50, %v3976_v36  ;;  %v3979_v8 = vsel %vm1899_vm6, %v3849_v10, %v3978_v45  ;;  %v3853_v35 = vpop.permute.xlu0 %3852  ;;  %v3925_v25 = vrot.slane %v3855_v18, 4 }
 0x56a   :  { %4058 = vst [vmem:[#allocation8 + $0x7b0] sm:$0xff] %v3977_v5  ;;  %4059 = vst [vmem:[#allocation8 + $0x7b8] sm:$0xff] %v3979_v8  ;;  %v3924_v3 = vrot.slane %v3853_v35, 4  ;;  %4146 = vrot.lane.b32.xlu1 %v6484_v13, %s4962_s6 }
 0x56b   :  { %4144 = vrot.lane.b32.xlu0 %v7250_v47, %s4962_s6 }
 0x56c   :  { %v3980_v4 = vsel %vm532_vm0, %v3924_v3, %v3925_v25  ;;  %v3859_v12 = vpop.permute.xlu1 %3858 }
 0x56d   :  { %v3981_v53 = vsel %vm1899_vm6, %v3853_v35, %v3980_v4  ;;  %v3857_v31 = vpop.permute.xlu0 %3856  ;;  %v3927_v41 = vrot.slane %v3859_v12, 4 }
 0x56e   :  { %4060 = vst [vmem:[#allocation8 + $0x9a0] sm:$0xff] %v3981_v53  ;;  %v3926_v62 = vrot.slane %v3857_v31, 4  ;;  %4150 = vrot.lane.b32.xlu1 %v7256_v16, %s4962_s6 }
 0x56f   :  { %4148 = vrot.lane.b32.xlu0 %v7260_v20, %s4962_s6 }
 0x570   :  { %v3982_v61 = vsel %vm532_vm0, %v3925_v25, %v3926_v62  ;;  %v3863_v59 = vpop.permute.xlu1 %3862 }
 0x571   :  { %v3983_v13 = vsel %vm1899_vm6, %v3855_v18, %v3982_v61  ;;  %v3861_v47 = vpop.permute.xlu0 %3860  ;;  %v3929_v38 = vrot.slane %v3863_v59, 4 }
 0x572   :  { %4061 = vst [vmem:[#allocation8 + $0x9a8] sm:$0xff] %v3983_v13  ;;  %v3928_v26 = vrot.slane %v3861_v47, 4  ;;  %4154 = vrot.lane.b32.xlu1 %v7266_v48, %s4962_s6 }
 0x573   :  { %4152 = vrot.lane.b32.xlu0 %v6500_v44, %s4962_s6 }
 0x574   :  { %v3984_v16 = vsel %vm532_vm0, %v3927_v41, %v3928_v26  ;;  %v3986_v20 = vsel %vm532_vm0, %v3928_v26, %v3929_v38  ;;  %v3867_v23 = vpop.permute.xlu1 %3866 }
 0x575   :  { %v3985_v37 = vsel %vm1899_vm6, %v3859_v12, %v3984_v16  ;;  %v3987_v28 = vsel %vm1899_vm6, %v3861_v47, %v3986_v20  ;;  %v3865_v19 = vpop.permute.xlu0 %3864  ;;  %v3931_v57 = vrot.slane %v3867_v23, 4 }
 0x576   :  { %4062 = vst [vmem:[#allocation8 + $0x9b0] sm:$0xff] %v3985_v37  ;;  %4063 = vst [vmem:[#allocation8 + $0x9b8] sm:$0xff] %v3987_v28  ;;  %v3930_v27 = vrot.slane %v3865_v19, 4  ;;  %4158 = vrot.lane.b32.xlu1 %v6508_v63, %s4962_s6 }
 0x577   :  { %4156 = vrot.lane.b32.xlu0 %v7278_v51, %s4962_s6 }
 0x578   :  { %v3988_v44 = vsel %vm532_vm0, %v3930_v27, %v3931_v57  ;;  %v3871_v21 = vpop.permute.xlu1 %3870 }
 0x579   :  { %v3989_v48 = vsel %vm1899_vm6, %v3865_v19, %v3988_v44  ;;  %v3869_v55 = vpop.permute.xlu0 %3868  ;;  %v3933_v15 = vrot.slane %v3871_v21, 4 }
 0x57a   :  { %4064 = vst [vmem:[#allocation8 + $0xba0] sm:$0xff] %v3989_v48  ;;  %v3932_v29 = vrot.slane %v3869_v55, 4  ;;  %4162 = vrot.lane.b32.xlu1 %v7284_v42, %s4962_s6 }
 0x57b   :  { %4160 = vrot.lane.b32.xlu0 %v7288_v1, %s4962_s6 }
 0x57c   :  { %v3990_v46 = vsel %vm532_vm0, %v3931_v57, %v3932_v29  ;;  %v3875_v34 = vpop.permute.xlu1 %3874 }
 0x57d   :  { %v3991_v63 = vsel %vm1899_vm6, %v3867_v23, %v3990_v46  ;;  %v3873_v51 = vpop.permute.xlu0 %3872  ;;  %v3935_v6 = vrot.slane %v3875_v34, 4 }
 0x57e   :  { %4065 = vst [vmem:[#allocation8 + $0xba8] sm:$0xff] %v3991_v63  ;;  %v3934_v56 = vrot.slane %v3873_v51, 4  ;;  %4166 = vrot.lane.b32.xlu1 %v7294_v9, %s4962_s6 }
 0x57f   :  { %4164 = vrot.lane.b32.xlu0 %v6524_v32, %s4962_s6 }
 0x580   :  { %v3992_v42 = vsel %vm532_vm0, %v3933_v15, %v3934_v56  ;;  %v3994_v1 = vsel %vm532_vm0, %v3934_v56, %v3935_v6  ;;  %v3879_v60 = vpop.permute.xlu1 %3878 }
 0x581   :  { %v3993_v54 = vsel %vm1899_vm6, %v3871_v21, %v3992_v42  ;;  %v3995_v58 = vsel %vm1899_vm6, %v3873_v51, %v3994_v1  ;;  %v3877_v24 = vpop.permute.xlu0 %3876  ;;  %v3937_v11 = vrot.slane %v3879_v60, 4 }
 0x582   :  { %4066 = vst [vmem:[#allocation8 + $0xbb0] sm:$0xff] %v3993_v54  ;;  %4067 = vst [vmem:[#allocation8 + $0xbb8] sm:$0xff] %v3995_v58  ;;  %v3936_v2 = vrot.slane %v3877_v24, 4  ;;  %4170 = vrot.lane.b32.xlu1 %v6532_v39, %s4962_s6 }
 0x583   :  { %4168 = vrot.lane.b32.xlu0 %v7306_v33, %s4962_s6 }
 0x584   :  { %v3996_v32 = vsel %vm532_vm0, %v3936_v2, %v3937_v11  ;;  %v3883_v49 = vpop.permute.xlu1 %3882 }
 0x585   :  { %v3997_v9 = vsel %vm1899_vm6, %v3877_v24, %v3996_v32  ;;  %v3881_v30 = vpop.permute.xlu0 %3880  ;;  %v3939_v43 = vrot.slane %v3883_v49, 4 }
 0x586   :  { %4068 = vst [vmem:[#allocation8 + $0xda0] sm:$0xff] %v3997_v9  ;;  %v3938_v50 = vrot.slane %v3881_v30, 4 }
 0x588   :  { %v3998_v22 = vsel %vm532_vm0, %v3937_v11, %v3938_v50  ;;  %v3887_v17 = vpop.permute.xlu1 %3886 }
 0x589   :  { %v3999_v52 = vsel %vm1899_vm6, %v3879_v60, %v3998_v22  ;;  %v3885_v0 = vpop.permute.xlu0 %3884  ;;  %v3941_v39 = vrot.slane %v3887_v17, 4 }
 0x58a   :  { %4069 = vst [vmem:[#allocation8 + $0xda8] sm:$0xff] %v3999_v52  ;;  %v3940_v10 = vrot.slane %v3885_v0, 4 }
 0x58c   :  { %v4000_v33 = vsel %vm532_vm0, %v3939_v43, %v3940_v10  ;;  %v4002_v40 = vsel %vm532_vm0, %v3940_v10, %v3941_v39  ;;  %v3891_v36 = vpop.permute.xlu1 %3890 }
 0x58d   :  { %v4001_v14 = vsel %vm1899_vm6, %v3883_v49, %v4000_v33  ;;  %v4003_v7 = vsel %vm1899_vm6, %v3885_v0, %v4002_v40  ;;  %v3889_v45 = vpop.permute.xlu0 %3888  ;;  %v3943_v5 = vrot.slane %v3891_v36, 4 }
 0x58e   :  { %4070 = vst [vmem:[#allocation8 + $0xdb0] sm:$0xff] %v4001_v14  ;;  %4071 = vst [vmem:[#allocation8 + $0xdb8] sm:$0xff] %v4003_v7  ;;  %v3942_v8 = vrot.slane %v3889_v45, 4 }
 0x590   :  { %v4004_v18 = vsel %vm532_vm0, %v3942_v8, %v3943_v5  ;;  %v3895_v25 = vpop.permute.xlu1 %3894 }
 0x591   :  { %v4005_v35 = vsel %vm1899_vm6, %v3889_v45, %v4004_v18  ;;  %v3893_v3 = vpop.permute.xlu0 %3892  ;;  %v3945_v61 = vrot.slane %v3895_v25, 4 }
 0x592   :  { %4072 = vst [vmem:[#allocation8 + $0xfa0] sm:$0xff] %v4005_v35  ;;  %v3944_v4 = vrot.slane %v3893_v3, 4 }
 0x594   :  { %v4006_v53 = vsel %vm532_vm0, %v3943_v5, %v3944_v4  ;;  %v3899_v31 = vpop.permute.xlu1 %3898 }
 0x595   :  { %v4007_v12 = vsel %vm1899_vm6, %v3891_v36, %v4006_v53  ;;  %v3897_v62 = vpop.permute.xlu0 %3896  ;;  %v3947_v13 = vrot.slane %v3899_v31, 4 }
 0x596   :  { %4073 = vst [vmem:[#allocation8 + $0xfa8] sm:$0xff] %v4007_v12  ;;  %v3946_v59 = vrot.slane %v3897_v62, 4 }
 0x598   :  { %v4008_v47 = vsel %vm532_vm0, %v3945_v61, %v3946_v59  ;;  %v4010_v41 = vsel %vm532_vm0, %v3946_v59, %v3947_v13  ;;  %v4079_v16 = vpop.permute.xlu1 %4078 }
 0x599   :  { %v4009_v38 = vsel %vm1899_vm6, %v3895_v25, %v4008_v47  ;;  %v4011_v26 = vsel %vm1899_vm6, %v3897_v62, %v4010_v41  ;;  %v4077_v20 = vpop.permute.xlu0 %4076  ;;  %v4173_v37 = vrot.slane %v4079_v16, 4 }
 0x59a   :  { %4074 = vst [vmem:[#allocation8 + $0xfb0] sm:$0xff] %v4009_v38  ;;  %4075 = vst [vmem:[#allocation8 + $0xfb8] sm:$0xff] %v4011_v26  ;;  %v4172_v28 = vrot.slane %v4077_v20, 4 }
 0x59c   :  { %v4220_v23 = vsel %vm532_vm0, %v4172_v28, %v4173_v37  ;;  %v4083_v57 = vpop.permute.xlu1 %4082 }
 0x59d   :  { %v4221_v19 = vsel %vm2172_vm7, %v4077_v20, %v4220_v23  ;;  %v4081_v27 = vpop.permute.xlu0 %4080  ;;  %v4175_v46 = vrot.slane %v4083_v57, 4 }
 0x59e   :  { %4316 = vst [vmem:[#allocation8 + $0x1c0] sm:$0xff] %v4221_v19  ;;  %v4174_v44 = vrot.slane %v4081_v27, 4 }
 0x5a0   :  { %v4222_v48 = vsel %vm532_vm0, %v4173_v37, %v4174_v44  ;;  %v4087_v55 = vpop.permute.xlu1 %4086 }
 0x5a1   :  { %v4223_v21 = vsel %vm2172_vm7, %v4079_v16, %v4222_v48  ;;  %v4085_v29 = vpop.permute.xlu0 %4084  ;;  %v4177_v63 = vrot.slane %v4087_v55, 4 }
 0x5a2   :  { %4317 = vst [vmem:[#allocation8 + $0x1c8] sm:$0xff] %v4223_v21  ;;  %v4176_v34 = vrot.slane %v4085_v29, 4 }
 0x5a4   :  { %v4224_v51 = vsel %vm532_vm0, %v4175_v46, %v4176_v34  ;;  %v4226_v15 = vsel %vm532_vm0, %v4176_v34, %v4177_v63  ;;  %v4091_v42 = vpop.permute.xlu1 %4090 }
 0x5a5   :  { %v4225_v6 = vsel %vm2172_vm7, %v4083_v57, %v4224_v51  ;;  %v4227_v56 = vsel %vm2172_vm7, %v4085_v29, %v4226_v15  ;;  %v4089_v1 = vpop.permute.xlu0 %4088  ;;  %v4179_v54 = vrot.slane %v4091_v42, 4 }
 0x5a6   :  { %4318 = vst [vmem:[#allocation8 + $0x1d0] sm:$0xff] %v4225_v6  ;;  %4319 = vst [vmem:[#allocation8 + $0x1d8] sm:$0xff] %v4227_v56  ;;  %v4178_v58 = vrot.slane %v4089_v1, 4 }
 0x5a8   :  { %v4228_v60 = vsel %vm532_vm0, %v4178_v58, %v4179_v54  ;;  %v4095_v11 = vpop.permute.xlu1 %4094 }
 0x5a9   :  { %v4229_v24 = vsel %vm2172_vm7, %v4089_v1, %v4228_v60  ;;  %v4093_v2 = vpop.permute.xlu0 %4092  ;;  %v4181_v22 = vrot.slane %v4095_v11, 4 }
 0x5aa   :  { %4320 = vst [vmem:[#allocation8 + $0x3c0] sm:$0xff] %v4229_v24  ;;  %v4180_v32 = vrot.slane %v4093_v2, 4 }
 0x5ac   :  { %v4230_v9 = vsel %vm532_vm0, %v4179_v54, %v4180_v32  ;;  %v4099_v30 = vpop.permute.xlu1 %4098 }
 0x5ad   :  { %v4231_v49 = vsel %vm2172_vm7, %v4091_v42, %v4230_v9  ;;  %v4097_v50 = vpop.permute.xlu0 %4096  ;;  %v4183_v52 = vrot.slane %v4099_v30, 4 }
 0x5ae   :  { %4321 = vst [vmem:[#allocation8 + $0x3c8] sm:$0xff] %v4231_v49  ;;  %v4182_v17 = vrot.slane %v4097_v50, 4 }
 0x5b0   :  { %v4232_v0 = vsel %vm532_vm0, %v4181_v22, %v4182_v17  ;;  %v4234_v43 = vsel %vm532_vm0, %v4182_v17, %v4183_v52  ;;  %v4103_v33 = vpop.permute.xlu1 %4102 }
 0x5b1   :  { %v4233_v39 = vsel %vm2172_vm7, %v4095_v11, %v4232_v0  ;;  %v4235_v10 = vsel %vm2172_vm7, %v4097_v50, %v4234_v43  ;;  %v4101_v40 = vpop.permute.xlu0 %4100  ;;  %v4185_v14 = vrot.slane %v4103_v33, 4 }
 0x5b2   :  { %4322 = vst [vmem:[#allocation8 + $0x3d0] sm:$0xff] %v4233_v39  ;;  %4323 = vst [vmem:[#allocation8 + $0x3d8] sm:$0xff] %v4235_v10  ;;  %v4184_v7 = vrot.slane %v4101_v40, 4 }
 0x5b4   :  { %v4236_v36 = vsel %vm532_vm0, %v4184_v7, %v4185_v14  ;;  %v4107_v5 = vpop.permute.xlu1 %4106 }
 0x5b5   :  { %v4237_v45 = vsel %vm2172_vm7, %v4101_v40, %v4236_v36  ;;  %v4105_v8 = vpop.permute.xlu0 %4104  ;;  %v4187_v53 = vrot.slane %v4107_v5, 4 }
 0x5b6   :  { %4324 = vst [vmem:[#allocation8 + $0x5c0] sm:$0xff] %v4237_v45  ;;  %v4186_v18 = vrot.slane %v4105_v8, 4 }
 0x5b8   :  { %v4238_v35 = vsel %vm532_vm0, %v4185_v14, %v4186_v18  ;;  %v4111_v3 = vpop.permute.xlu1 %4110 }
 0x5b9   :  { %v4239_v25 = vsel %vm2172_vm7, %v4103_v33, %v4238_v35  ;;  %v4109_v4 = vpop.permute.xlu0 %4108  ;;  %v4189_v12 = vrot.slane %v4111_v3, 4 }
 0x5ba   :  { %4325 = vst [vmem:[#allocation8 + $0x5c8] sm:$0xff] %v4239_v25  ;;  %v4188_v31 = vrot.slane %v4109_v4, 4 }
 0x5bc   :  { %v4240_v62 = vsel %vm532_vm0, %v4187_v53, %v4188_v31  ;;  %v4242_v61 = vsel %vm532_vm0, %v4188_v31, %v4189_v12  ;;  %v4115_v47 = vpop.permute.xlu1 %4114 }
 0x5bd   :  { %v4241_v13 = vsel %vm2172_vm7, %v4107_v5, %v4240_v62  ;;  %v4243_v59 = vsel %vm2172_vm7, %v4109_v4, %v4242_v61  ;;  %v4113_v41 = vpop.permute.xlu0 %4112  ;;  %v4191_v38 = vrot.slane %v4115_v47, 4 }
 0x5be   :  { %4326 = vst [vmem:[#allocation8 + $0x5d0] sm:$0xff] %v4241_v13  ;;  %4327 = vst [vmem:[#allocation8 + $0x5d8] sm:$0xff] %v4243_v59  ;;  %v4190_v26 = vrot.slane %v4113_v41, 4 }
 0x5c0   :  { %v4244_v16 = vsel %vm532_vm0, %v4190_v26, %v4191_v38  ;;  %v4119_v37 = vpop.permute.xlu1 %4118 }
 0x5c1   :  { %v4245_v20 = vsel %vm2172_vm7, %v4113_v41, %v4244_v16  ;;  %v4117_v28 = vpop.permute.xlu0 %4116  ;;  %v4193_v48 = vrot.slane %v4119_v37, 4 }
 0x5c2   :  { %4328 = vst [vmem:[#allocation8 + $0x7c0] sm:$0xff] %v4245_v20  ;;  %v4192_v23 = vrot.slane %v4117_v28, 4 }
 0x5c4   :  { %v4246_v19 = vsel %vm532_vm0, %v4191_v38, %v4192_v23  ;;  %v4123_v27 = vpop.permute.xlu1 %4122 }
 0x5c5   :  { %v4247_v57 = vsel %vm2172_vm7, %v4115_v47, %v4246_v19  ;;  %v4121_v44 = vpop.permute.xlu0 %4120  ;;  %v4195_v21 = vrot.slane %v4123_v27, 4 }
 0x5c6   :  { %4329 = vst [vmem:[#allocation8 + $0x7c8] sm:$0xff] %v4247_v57  ;;  %v4194_v55 = vrot.slane %v4121_v44, 4 }
 0x5c8   :  { %v4248_v29 = vsel %vm532_vm0, %v4193_v48, %v4194_v55  ;;  %v4250_v46 = vsel %vm532_vm0, %v4194_v55, %v4195_v21  ;;  %v4127_v51 = vpop.permute.xlu1 %4126 }
 0x5c9   :  { %v4249_v63 = vsel %vm2172_vm7, %v4119_v37, %v4248_v29  ;;  %v4251_v34 = vsel %vm2172_vm7, %v4121_v44, %v4250_v46  ;;  %v4125_v15 = vpop.permute.xlu0 %4124  ;;  %v4197_v6 = vrot.slane %v4127_v51, 4 }
 0x5ca   :  { %4330 = vst [vmem:[#allocation8 + $0x7d0] sm:$0xff] %v4249_v63  ;;  %4331 = vst [vmem:[#allocation8 + $0x7d8] sm:$0xff] %v4251_v34  ;;  %v4196_v56 = vrot.slane %v4125_v15, 4 }
 0x5cc   :  { %v4252_v42 = vsel %vm532_vm0, %v4196_v56, %v4197_v6  ;;  %v4131_v54 = vpop.permute.xlu1 %4130 }
 0x5cd   :  { %v4253_v1 = vsel %vm2172_vm7, %v4125_v15, %v4252_v42  ;;  %v4129_v58 = vpop.permute.xlu0 %4128  ;;  %v4199_v9 = vrot.slane %v4131_v54, 4 }
 0x5ce   :  { %4332 = vst [vmem:[#allocation8 + $0x9c0] sm:$0xff] %v4253_v1  ;;  %v4198_v60 = vrot.slane %v4129_v58, 4 }
 0x5d0   :  { %v4254_v24 = vsel %vm532_vm0, %v4197_v6, %v4198_v60  ;;  %v4135_v2 = vpop.permute.xlu1 %4134 }
 0x5d1   :  { %v4255_v11 = vsel %vm2172_vm7, %v4127_v51, %v4254_v24  ;;  %v4133_v32 = vpop.permute.xlu0 %4132  ;;  %v4201_v49 = vrot.slane %v4135_v2, 4 }
 0x5d2   :  { %4333 = vst [vmem:[#allocation8 + $0x9c8] sm:$0xff] %v4255_v11  ;;  %v4200_v30 = vrot.slane %v4133_v32, 4 }
 0x5d4   :  { %v4256_v50 = vsel %vm532_vm0, %v4199_v9, %v4200_v30  ;;  %v4258_v22 = vsel %vm532_vm0, %v4200_v30, %v4201_v49  ;;  %v4139_v0 = vpop.permute.xlu1 %4138 }
 0x5d5   :  { %v4257_v52 = vsel %vm2172_vm7, %v4131_v54, %v4256_v50  ;;  %v4259_v17 = vsel %vm2172_vm7, %v4133_v32, %v4258_v22  ;;  %v4137_v43 = vpop.permute.xlu0 %4136  ;;  %v4203_v39 = vrot.slane %v4139_v0, 4 }
 0x5d6   :  { %4334 = vst [vmem:[#allocation8 + $0x9d0] sm:$0xff] %v4257_v52  ;;  %4335 = vst [vmem:[#allocation8 + $0x9d8] sm:$0xff] %v4259_v17  ;;  %v4202_v10 = vrot.slane %v4137_v43, 4 }
 0x5d8   :  { %v4260_v33 = vsel %vm532_vm0, %v4202_v10, %v4203_v39  ;;  %v4143_v14 = vpop.permute.xlu1 %4142 }
 0x5d9   :  { %v4261_v40 = vsel %vm2172_vm7, %v4137_v43, %v4260_v33  ;;  %v4141_v7 = vpop.permute.xlu0 %4140  ;;  %v4205_v35 = vrot.slane %v4143_v14, 4 }
 0x5da   :  { %4336 = vst [vmem:[#allocation8 + $0xbc0] sm:$0xff] %v4261_v40  ;;  %v4204_v36 = vrot.slane %v4141_v7, 4 }
 0x5dc   :  { %v4262_v45 = vsel %vm532_vm0, %v4203_v39, %v4204_v36  ;;  %v4147_v8 = vpop.permute.xlu1 %4146 }
 0x5dd   :  { %v4263_v5 = vsel %vm2172_vm7, %v4139_v0, %v4262_v45  ;;  %v4145_v18 = vpop.permute.xlu0 %4144  ;;  %v4207_v25 = vrot.slane %v4147_v8, 4 }
 0x5de   :  { %4337 = vst [vmem:[#allocation8 + $0xbc8] sm:$0xff] %v4263_v5  ;;  %v4206_v3 = vrot.slane %v4145_v18, 4 }
 0x5e0   :  { %v4264_v4 = vsel %vm532_vm0, %v4205_v35, %v4206_v3  ;;  %v4266_v53 = vsel %vm532_vm0, %v4206_v3, %v4207_v25  ;;  %v4151_v62 = vpop.permute.xlu1 %4150 }
 0x5e1   :  { %v4265_v12 = vsel %vm2172_vm7, %v4143_v14, %v4264_v4  ;;  %v4267_v31 = vsel %vm2172_vm7, %v4145_v18, %v4266_v53  ;;  %v4149_v61 = vpop.permute.xlu0 %4148  ;;  %v4209_v13 = vrot.slane %v4151_v62, 4 }
 0x5e2   :  { %4338 = vst [vmem:[#allocation8 + $0xbd0] sm:$0xff] %v4265_v12  ;;  %4339 = vst [vmem:[#allocation8 + $0xbd8] sm:$0xff] %v4267_v31  ;;  %v4208_v59 = vrot.slane %v4149_v61, 4 }
 0x5e4   :  { %v4268_v47 = vsel %vm532_vm0, %v4208_v59, %v4209_v13  ;;  %v4155_v38 = vpop.permute.xlu1 %4154 }
 0x5e5   :  { %v4269_v41 = vsel %vm2172_vm7, %v4149_v61, %v4268_v47  ;;  %v4153_v26 = vpop.permute.xlu0 %4152  ;;  %v4211_v19 = vrot.slane %v4155_v38, 4 }
 0x5e6   :  { %4340 = vst [vmem:[#allocation8 + $0xdc0] sm:$0xff] %v4269_v41  ;;  %v4210_v16 = vrot.slane %v4153_v26, 4 }
 0x5e8   :  { %v4270_v20 = vsel %vm532_vm0, %v4209_v13, %v4210_v16  ;;  %v4159_v28 = vpop.permute.xlu1 %4158 }
 0x5e9   :  { %v4271_v37 = vsel %vm2172_vm7, %v4151_v62, %v4270_v20  ;;  %v4157_v23 = vpop.permute.xlu0 %4156  ;;  %v4213_v57 = vrot.slane %v4159_v28, 4 }
 0x5ea   :  { %4341 = vst [vmem:[#allocation8 + $0xdc8] sm:$0xff] %v4271_v37  ;;  %v4212_v27 = vrot.slane %v4157_v23, 4 }
 0x5ec   :  { %v4272_v44 = vsel %vm532_vm0, %v4211_v19, %v4212_v27  ;;  %v4274_v48 = vsel %vm532_vm0, %v4212_v27, %v4213_v57  ;;  %v4163_v29 = vpop.permute.xlu1 %4162 }
 0x5ed   :  { %v4273_v21 = vsel %vm2172_vm7, %v4155_v38, %v4272_v44  ;;  %v4275_v55 = vsel %vm2172_vm7, %v4157_v23, %v4274_v48  ;;  %v4161_v46 = vpop.permute.xlu0 %4160  ;;  %v4215_v63 = vrot.slane %v4163_v29, 4 }
 0x5ee   :  { %4342 = vst [vmem:[#allocation8 + $0xdd0] sm:$0xff] %v4273_v21  ;;  %4343 = vst [vmem:[#allocation8 + $0xdd8] sm:$0xff] %v4275_v55  ;;  %v4214_v34 = vrot.slane %v4161_v46, 4 }
 0x5f0   :  { %v4276_v51 = vsel %vm532_vm0, %v4214_v34, %v4215_v63  ;;  %v4167_v6 = vpop.permute.xlu1 %4166 }
 0x5f1   :  { %v4277_v15 = vsel %vm2172_vm7, %v4161_v46, %v4276_v51  ;;  %v4165_v56 = vpop.permute.xlu0 %4164  ;;  %v4217_v24 = vrot.slane %v4167_v6, 4 }
 0x5f2   :  { %4344 = vst [vmem:[#allocation8 + $0xfc0] sm:$0xff] %v4277_v15  ;;  %v4216_v42 = vrot.slane %v4165_v56, 4 }
 0x5f4   :  { %v4278_v1 = vsel %vm532_vm0, %v4215_v63, %v4216_v42  ;;  %v4171_v58 = vpop.permute.xlu1 %4170 }
 0x5f5   :  { %v4279_v54 = vsel %vm2172_vm7, %v4163_v29, %v4278_v1  ;;  %v4169_v60 = vpop.permute.xlu0 %4168  ;;  %v4219_v11 = vrot.slane %v4171_v58, 4 }
 0x5f6   :  { %4345 = vst [vmem:[#allocation8 + $0xfc8] sm:$0xff] %v4279_v54  ;;  %v4218_v2 = vrot.slane %v4169_v60, 4 }
 0x5f8   :  { %v4280_v32 = vsel %vm532_vm0, %v4217_v24, %v4218_v2  ;;  %v4282_v9 = vsel %vm532_vm0, %v4218_v2, %v4219_v11 }
 0x5f9   :  { %v4281_v49 = vsel %vm2172_vm7, %v4167_v6, %v4280_v32  ;;  %v4283_v30 = vsel %vm2172_vm7, %v4169_v60, %v4282_v9 }
 0x5fa   :  { %4346 = vst [vmem:[#allocation8 + $0xfd0] sm:$0xff] %v4281_v49  ;;  %4347 = vst [vmem:[#allocation8 + $0xfd8] sm:$0xff] %v4283_v30 }
 0x5fb   :  { %4416 = vsyncadd [#allocation4], 64512  ;;  %s4963_s30 = smov [#allocation8]   ;;  %s4964_s8 = smov 8192  }
 0x5fc   :  { %s4433_s7 = sshll.u32 %s4963_s30, 4  ;;  %4440 = sst [smem:[#allocation10]] %s4964_s8  ;;  %s4434_s7 = int_to_ptr.vmem [resolvable:$true] %s4433_s7 }
 0x5fd   :  { %s4965_s9 = smov 128   ;;  %s4966_s10 = smov 2  }
 0x5fe   :  { %4442 = sst [smem:[#allocation10 + $0x1]] %s4965_s9  ;;  %s4967_s11 = smov 256  }
 0x5ff   :  { %4444 = sst [smem:[#allocation10 + $0x2]] %s4966_s10  ;;  %s4968_s12 = smov 64  }
 0x600   :  { %4446 = sst [smem:[#allocation10 + $0x3]] %s4967_s11  ;;  %s4969_s13 = smov 4  }
 0x601   :  { %4448 = sst [smem:[#allocation10 + $0x4]] %s4968_s12  ;;  %s4970_s14 = smov [#allocation4]  }
 0x602   :  { %4450 = sst [smem:[#allocation10 + $0x5]] %s4969_s13  ;;  %s4971_s15 = smov [#allocation9]  }
 0x603   :  { %s4972_s16 = smov 0  }
 0x604   :  { %4452 = dma.general %s4434_s7, 1024, %s7716_s3, %s4970_s14, %s4971_s15, [#allocation10], %s4972_s16, 0  }
 0x605   :  { %4949 = dma.done.wait [#allocation4], 65536  }
 0x606   :  { %4950 = vsyncadd [#allocation4], 4294901760 }
 0x607   :  { %4456 = vsyncpa [#allocation3], 1 }
 0x608   :  { %4457 = vsyncpa [#allocation6], 1 }
 0x609   :  { %4458 = vsyncpa [#allocation4], 1 }

</bundles_post_ra>
